<compile_context>
chip_gen: v6e
topology: v6e:2x2x1
jax: 0.10.0
libtpu: 0.0.40
codegen_flags: <defaults>
</compile_context>

<pallas_src>
import math
import numpy as np
import jax
import jax.numpy as jnp
from jax.experimental import pallas as pl
from jax.experimental.pallas import tpu as pltpu

_F32_EPS = float(np.finfo(np.float32).eps)   # torch.finfo(torch.float32).eps
_INV_LN10 = 1.0 / math.log(10.0)


def _round_up(v: int, m: int) -> int:
    return ((v + m - 1) // m) * m


# --------------------------------------------------------------------------
# deterministic "parameter" construction (host-side, plain numpy)
# --------------------------------------------------------------------------
def _delta_matrix(n_frames: int) -> np.ndarray:
    """(F, F) matrix D so that D @ m == torchaudio.functional.compute_deltas
    along the frame axis (win_length=5, replicate padding)."""
    coeffs = np.array([-2.0, -1.0, 0.0, 1.0, 2.0], dtype=np.float64) / 10.0
    D = np.zeros((n_frames, n_frames), dtype=np.float64)
    for t in range(n_frames):
        for j, c in enumerate(coeffs):
            s = min(max(t + j - 2, 0), n_frames - 1)
            D[t, s] += c
    return D


def _hann_window_padded(win_length: int, fft_size: int) -> np.ndarray:
    """torch.hann_window(win_length) zero-padded (centered) to fft_size."""
    n = np.arange(win_length, dtype=np.float64)
    w = 0.5 - 0.5 * np.cos(2.0 * np.pi * n / win_length)   # periodic hann
    out = np.zeros((fft_size,), dtype=np.float64)
    lpad = (fft_size - win_length) // 2
    out[lpad:lpad + win_length] = w
    return out


def _windowed_dft_basis(fft_size: int, win_length: int, k_pad: int) -> np.ndarray:
    """(N, 2*k_pad) lane-dense DFT basis with the Hann window folded in.

    Lanes [0, K)          : win[n] *  cos(2 pi n k / N)   (real part)
    Lanes [k_pad, k_pad+K): win[n] * -sin(2 pi n k / N)   (imag part)
    Remaining lanes are zero (padding)."""
    n_freq = fft_size // 2 + 1
    win = _hann_window_padded(win_length, fft_size)          # (N,)
    nn = np.arange(fft_size, dtype=np.float64)[:, None]
    kk = np.arange(n_freq, dtype=np.float64)[None, :]
    ang = 2.0 * np.pi * nn * kk / fft_size
    basis = np.zeros((fft_size, 2 * k_pad), dtype=np.float32)
    basis[:, :n_freq] = (win[:, None] * np.cos(ang)).astype(np.float32)
    basis[:, k_pad:k_pad + n_freq] = (win[:, None] * (-np.sin(ang))).astype(np.float32)
    return basis


def _fused_delta_matrix(n_frames: int, f2_pad: int):
    """(6*f_pad, f2_pad) matrix applied to stacked [x; y; zero-pad] rows of
    the (f2_pad, lanes) magnitude / log-magnitude slab.  Output row blocks
    (each f_pad tall, zero-padded below row F):
      slot 0: y - x          slot 3: y
      slot 1: y_del - x_del  slot 4: y_del
      slot 2: y_acc - x_acc  slot 5: y_acc
    where *_del / *_acc are compute_deltas / compute_deltas^2 along frames.
    Columns beyond 2F are zero so host zero-padded frame rows never leak."""
    F = n_frames
    f_pad = _round_up(F, 8)
    D = _delta_matrix(F)
    D2 = D @ D
    I = np.eye(F, dtype=np.float64)
    Z = np.zeros((F, F), dtype=np.float64)
    blocks = [(-I, I), (-D, D), (-D2, D2), (Z, I), (Z, D), (Z, D2)]
    M = np.zeros((6 * f_pad, f2_pad), dtype=np.float32)
    for i, (bx, by) in enumerate(blocks):
        M[i * f_pad:i * f_pad + F, :F] = bx.astype(np.float32)
        M[i * f_pad:i * f_pad + F, F:2 * F] = by.astype(np.float32)
    return M, f_pad


# --------------------------------------------------------------------------
# fused Pallas kernel (one batch element per grid step, all resolutions)
# --------------------------------------------------------------------------
def _make_fused_kernel(res_meta):
    """res_meta: list of (n_frames, n_freq, f_pad, k_pad) per resolution."""
    n_res = len(res_meta)
    inv_res = 1.0 / float(n_res)

    def kernel(*refs):
        x_ref, y_ref = refs[0], refs[1]
        out_ref = refs[-1]

        total_sc = 0.0
        total_mag = 0.0
        for r, (F, K, f_pad, k_pad) in enumerate(res_meta):
            xyf_ref = refs[2 + 3 * r]      # (1, 2F_pad, N)  x-frames ; y-frames ; 0
            basis_ref = refs[3 + 3 * r]    # (N, 2*k_pad)    window-folded DFT
            dmat_ref = refs[4 + 3 * r]     # (6*f_pad, 2F_pad) fused diff/delta mat

            frames = xyf_ref[0]            # (2F_pad, N)

            # One lane-dense MXU matmul gives real & imag for x and y at once.
            S = jnp.dot(frames, basis_ref[...],
                        preferred_element_type=jnp.float32)   # (2F_pad, 2*k_pad)
            re = S[:, :k_pad]
            im = S[:, k_pad:]
            power = re * re + im * im
            mag_full = jnp.sqrt(jnp.maximum(power, 1e-5))      # (2F_pad, k_pad)

            # zero padded frequency lanes so they drop out of every sum
            lane = jax.lax.broadcasted_iota(jnp.int32, (1, k_pad), 1)
            mask = lane < K
            mag = jnp.where(mask, mag_full, 0.0)
            logm = jnp.where(mask, jnp.log(mag_full), 0.0)

            # [mag | log_mag] -> one MXU matmul for all deltas / diffs / y-terms
            ml = jnp.concatenate([mag, logm], axis=-1)         # (2F_pad, 2*k_pad)
            R = jnp.dot(dmat_ref[...], ml,
                        preferred_element_type=jnp.float32)    # (6*f_pad, 2*k_pad)
            Rm = R[:, :k_pad]      # magnitude half (spectral convergence)
            Rl = R[:, k_pad:]      # log-magnitude half (L1 terms)

            inv_cnt = 1.0 / float(F * K)
            for s in range(3):
                diff = Rm[s * f_pad:(s + 1) * f_pad]
                ydn = Rm[(s + 3) * f_pad:(s + 4) * f_pad]
                num = jnp.sqrt(jnp.sum(diff * diff))
                den = jnp.sqrt(jnp.sum(ydn * ydn))
                total_sc = total_sc + num / jnp.maximum(den, 1e-5)
                ldiff = Rl[s * f_pad:(s + 1) * f_pad]
                total_mag = total_mag + jnp.sum(jnp.abs(ldiff)) * inv_cnt

        loss = (total_sc + total_mag) * inv_res

        # ---- neg SI-SDR (torchmetrics definition, zero_mean=False) ----
        xs = x_ref[0]                                  # (1, T) preds
        ys = y_ref[0]                                  # (1, T) target
        eps = _F32_EPS
        alpha = (jnp.sum(xs * ys) + eps) / (jnp.sum(ys * ys) + eps)
        t_scaled = alpha * ys
        noise = t_scaled - xs
        val = (jnp.sum(t_scaled * t_scaled) + eps) / (jnp.sum(noise * noise) + eps)
        si_sdr = 10.0 * jnp.log(val) * _INV_LN10
        loss = loss - si_sdr

        out_ref[...] = jnp.broadcast_to(loss, out_ref.shape).astype(jnp.float32)

    return kernel


# --------------------------------------------------------------------------
# wrapper (framing / padding / constant setup, then ONE pallas_call)
# --------------------------------------------------------------------------
def multi_resolution_stft_loss(preds, target,
                               fft_sizes=(64, 128, 32),
                               hop_sizes=(16, 32, 8),
                               win_lengths=(40, 80, 16)):
    """MultiResolutionSTFTLoss.forward. Returns per-example loss, shape (B*subband,)."""
    assert len(fft_sizes) == len(hop_sizes) == len(win_lengths)
    x = preds
    y = target
    if x.ndim == 3:
        x = x.reshape(-1, x.shape[2])
        y = y.reshape(-1, y.shape[2])
    x = x.astype(jnp.float32)
    y = y.astype(jnp.float32)
    B, T = x.shape
    assert max(fft_sizes) // 2 < T, "reflect padding requires fft_size//2 < T"

    inputs = [x.reshape(B, 1, T), y.reshape(B, 1, T)]
    in_specs = [
        pl.BlockSpec((1, 1, T), lambda b: (b, 0, 0)),
        pl.BlockSpec((1, 1, T), lambda b: (b, 0, 0)),
    ]

    res_meta = []
    for fs, hs, wl in zip(fft_sizes, hop_sizes, win_lengths):
        n_freq = fs // 2 + 1
        n_frames = 1 + T // hs
        k_pad = max(128, _round_up(n_freq, 128))
        f2_pad = _round_up(2 * n_frames, 8)      # sublane-aligned frame stack

        # torch.stft(center=True): reflect-pad by n_fft//2 each side, then frame.
        pad = fs // 2
        xp = jnp.pad(x, ((0, 0), (pad, pad)), mode="reflect")
        yp = jnp.pad(y, ((0, 0), (pad, pad)), mode="reflect")
        idx = (np.arange(n_frames)[:, None] * hs
               + np.arange(fs)[None, :])                          # (F, N)
        xyf = jnp.concatenate([xp[:, idx], yp[:, idx]], axis=1)   # (B, 2F, N)
        xyf = jnp.pad(xyf, ((0, 0), (0, f2_pad - 2 * n_frames), (0, 0)))

        basis = jnp.asarray(_windowed_dft_basis(fs, wl, k_pad))   # (N, 2*k_pad)
        m_all, f_pad = _fused_delta_matrix(n_frames, f2_pad)
        dmat = jnp.asarray(m_all)                                 # (6*f_pad, f2_pad)

        res_meta.append((n_frames, n_freq, f_pad, k_pad))
        inputs += [xyf, basis, dmat]
        in_specs += [
            pl.BlockSpec((1, f2_pad, fs), lambda b: (b, 0, 0)),
            pl.BlockSpec((fs, 2 * k_pad), lambda b: (0, 0)),
            pl.BlockSpec((6 * f_pad, f2_pad), lambda b: (0, 0)),
        ]

    kernel = _make_fused_kernel(res_meta)
    grid_spec = pltpu.PrefetchScalarGridSpec(
        num_scalar_prefetch=0,
        grid=(B,),
        in_specs=in_specs,
        out_specs=pl.BlockSpec((1, 8, 128), lambda b: (b, 0, 0)),
    )
    out = pl.pallas_call(
        kernel,
        out_shape=jax.ShapeDtypeStruct((B, 8, 128), jnp.float32),
        grid_spec=grid_spec,
        compiler_params=pltpu.CompilerParams(
            dimension_semantics=("parallel",)),
    )(*inputs)
    return out[:, 0, 0]


if __name__ == "__main__":
    key = jax.random.PRNGKey(0)
    k1, k2 = jax.random.split(key)
    # (B, #subband, T) input variant (module flattens to (B*subband, T))
    preds = jax.random.normal(k1, (2, 2, 256), dtype=jnp.float32)
    target = preds + 0.1 * jax.random.normal(k2, (2, 2, 256), dtype=jnp.float32)

    out = multi_resolution_stft_loss(preds, target)
    out = jax.block_until_ready(out)

    assert out.shape == (4,), out.shape
    assert bool(jnp.all(jnp.isfinite(out))), out
    print("KERNEL_OK")
</pallas_src>

<mosaic_0001>
module attributes {stable_mosaic.version = 11 : i64} {
  func.func @kernel(%arg0: i32, %arg1: memref<1x1x256xf32, #tpu.memory_space<vmem>>, %arg2: memref<1x1x256xf32, #tpu.memory_space<vmem>>, %arg3: memref<1x40x64xf32, #tpu.memory_space<vmem>>, %arg4: memref<64x256xf32, #tpu.memory_space<vmem>>, %arg5: memref<144x40xf32, #tpu.memory_space<vmem>>, %arg6: memref<1x24x128xf32, #tpu.memory_space<vmem>>, %arg7: memref<128x256xf32, #tpu.memory_space<vmem>>, %arg8: memref<96x24xf32, #tpu.memory_space<vmem>>, %arg9: memref<1x72x32xf32, #tpu.memory_space<vmem>>, %arg10: memref<32x256xf32, #tpu.memory_space<vmem>>, %arg11: memref<240x72xf32, #tpu.memory_space<vmem>>, %arg12: memref<1x8x128xf32, #tpu.memory_space<vmem>>) attributes {dimension_semantics = [#tpu.dimension_semantics<parallel>], iteration_bounds = array<i64: 4>, scalar_prefetch = 0 : i64, scratch_operands = 0 : i64, tpu.core_type = #tpu.core_type<tc>, window_params = [{transform_indices = @transform_0, window_bounds = array<i64: 1, 1, 256>}, {transform_indices = @transform_1, window_bounds = array<i64: 1, 1, 256>}, {transform_indices = @transform_2, window_bounds = array<i64: 1, 40, 64>}, {pipeline_mode = #tpu.pipeline_mode<synchronous>, transform_indices = @transform_3, window_bounds = array<i64: 64, 256>}, {pipeline_mode = #tpu.pipeline_mode<synchronous>, transform_indices = @transform_4, window_bounds = array<i64: 144, 40>}, {transform_indices = @transform_5, window_bounds = array<i64: 1, 24, 128>}, {pipeline_mode = #tpu.pipeline_mode<synchronous>, transform_indices = @transform_6, window_bounds = array<i64: 128, 256>}, {pipeline_mode = #tpu.pipeline_mode<synchronous>, transform_indices = @transform_7, window_bounds = array<i64: 96, 24>}, {transform_indices = @transform_8, window_bounds = array<i64: 1, 72, 32>}, {pipeline_mode = #tpu.pipeline_mode<synchronous>, transform_indices = @transform_9, window_bounds = array<i64: 32, 256>}, {pipeline_mode = #tpu.pipeline_mode<synchronous>, transform_indices = @transform_10, window_bounds = array<i64: 240, 72>}, {transform_indices = @transform_11, window_bounds = array<i64: 1, 8, 128>}]} {
    %c0 = arith.constant 0 : index
    %c0_0 = arith.constant 0 : index
    %c0_1 = arith.constant 0 : index
    %0 = vector.load %arg3[%c0, %c0_0, %c0_1] : memref<1x40x64xf32, #tpu.memory_space<vmem>>, vector<1x40x64xf32>
    %1 = vector.shape_cast %0 : vector<1x40x64xf32> to vector<40x64xf32>
    %c0_2 = arith.constant 0 : index
    %c0_3 = arith.constant 0 : index
    %2 = vector.load %arg4[%c0_2, %c0_3] : memref<64x256xf32, #tpu.memory_space<vmem>>, vector<64x256xf32>
    %cst = arith.constant dense<0.000000e+00> : vector<40x256xf32>
    %3 = tpu.matmul %1, %2, %cst {dimension_numbers = #tpu.dot_dimension_numbers<[1], [0], [0], [1], [0, 0, 1, 1], [], []>} : vector<40x64xf32>, vector<64x256xf32>, vector<40x256xf32> -> vector<40x256xf32>
    %4 = vector.extract_strided_slice %3 {offsets = [0, 0], sizes = [40, 128], strides = [1, 1]} : vector<40x256xf32> to vector<40x128xf32>
    %5 = vector.extract_strided_slice %3 {offsets = [0, 128], sizes = [40, 128], strides = [1, 1]} : vector<40x256xf32> to vector<40x128xf32>
    %6 = arith.mulf %4, %4 : vector<40x128xf32>
    %7 = arith.mulf %5, %5 : vector<40x128xf32>
    %8 = arith.addf %6, %7 : vector<40x128xf32>
    %cst_4 = arith.constant 9.99999974E-6 : f32
    %9 = vector.broadcast %cst_4 : f32 to vector<40x128xf32>
    %10 = arith.maximumf %8, %9 : vector<40x128xf32>
    %11 = math.sqrt %10 : vector<40x128xf32>
    %12 = tpu.iota {dimensions = array<i32: 1>} : vector<1x128xi32>
    %c33_i32 = arith.constant 33 : i32
    %13 = vector.broadcast %c33_i32 : i32 to vector<1x128xi32>
    %14 = arith.cmpi slt, %12, %13 : vector<1x128xi32>
    %cst_5 = arith.constant 0.000000e+00 : f32
    %15 = vector.shape_cast %14 : vector<1x128xi1> to vector<1x128xi1>
    %16 = vector.broadcast %15 : vector<1x128xi1> to vector<40x128xi1>
    %17 = vector.broadcast %cst_5 : f32 to vector<40x128xf32>
    %18 = arith.select %16, %11, %17 : vector<40x128xi1>, vector<40x128xf32>
    %19 = math.log %11 : vector<40x128xf32>
    %cst_6 = arith.constant 0.000000e+00 : f32
    %20 = vector.shape_cast %14 : vector<1x128xi1> to vector<1x128xi1>
    %21 = vector.broadcast %20 : vector<1x128xi1> to vector<40x128xi1>
    %22 = vector.broadcast %cst_6 : f32 to vector<40x128xf32>
    %23 = arith.select %21, %19, %22 : vector<40x128xi1>, vector<40x128xf32>
    %24 = tpu.concatenate %18, %23 in 1 : vector<40x128xf32>, vector<40x128xf32> -> vector<40x256xf32>
    %c0_7 = arith.constant 0 : index
    %c0_8 = arith.constant 0 : index
    %25 = vector.load %arg5[%c0_7, %c0_8] : memref<144x40xf32, #tpu.memory_space<vmem>>, vector<144x40xf32>
    %cst_9 = arith.constant dense<0.000000e+00> : vector<144x256xf32>
    %26 = tpu.matmul %25, %24, %cst_9 {dimension_numbers = #tpu.dot_dimension_numbers<[1], [0], [0], [1], [0, 0, 1, 1], [], []>} : vector<144x40xf32>, vector<40x256xf32>, vector<144x256xf32> -> vector<144x256xf32>
    %27 = vector.extract_strided_slice %26 {offsets = [0, 0], sizes = [144, 128], strides = [1, 1]} : vector<144x256xf32> to vector<144x128xf32>
    %28 = vector.extract_strided_slice %26 {offsets = [0, 128], sizes = [144, 128], strides = [1, 1]} : vector<144x256xf32> to vector<144x128xf32>
    %29 = vector.extract_strided_slice %27 {offsets = [0, 0], sizes = [24, 128], strides = [1, 1]} : vector<144x128xf32> to vector<24x128xf32>
    %30 = vector.extract_strided_slice %27 {offsets = [72, 0], sizes = [24, 128], strides = [1, 1]} : vector<144x128xf32> to vector<24x128xf32>
    %31 = arith.mulf %29, %29 : vector<24x128xf32>
    %32 = vector.shape_cast %31 : vector<24x128xf32> to vector<1x24x128xf32>
    %cst_10 = arith.constant dense<0.000000e+00> : vector<1xf32>
    %33 = vector.multi_reduction <add>, %32, %cst_10 [1, 2] : vector<1x24x128xf32> to vector<1xf32>
    %34 = vector.shape_cast %33 : vector<1xf32> to vector<1x1x1xf32>
    %35 = vector.extract %34[0, 0, 0] : f32 from vector<1x1x1xf32>
    %36 = math.sqrt %35 : f32
    %37 = arith.mulf %30, %30 : vector<24x128xf32>
    %38 = vector.shape_cast %37 : vector<24x128xf32> to vector<1x24x128xf32>
    %cst_11 = arith.constant dense<0.000000e+00> : vector<1xf32>
    %39 = vector.multi_reduction <add>, %38, %cst_11 [1, 2] : vector<1x24x128xf32> to vector<1xf32>
    %40 = vector.shape_cast %39 : vector<1xf32> to vector<1x1x1xf32>
    %41 = vector.extract %40[0, 0, 0] : f32 from vector<1x1x1xf32>
    %42 = math.sqrt %41 : f32
    %cst_12 = arith.constant 9.99999974E-6 : f32
    %43 = arith.maximumf %42, %cst_12 : f32
    %44 = arith.divf %36, %43 : f32
    %cst_13 = arith.constant 0.000000e+00 : f32
    %45 = arith.addf %cst_13, %44 : f32
    %46 = vector.extract_strided_slice %28 {offsets = [0, 0], sizes = [24, 128], strides = [1, 1]} : vector<144x128xf32> to vector<24x128xf32>
    %47 = math.absf %46 : vector<24x128xf32>
    %48 = vector.shape_cast %47 : vector<24x128xf32> to vector<1x24x128xf32>
    %cst_14 = arith.constant dense<0.000000e+00> : vector<1xf32>
    %49 = vector.multi_reduction <add>, %48, %cst_14 [1, 2] : vector<1x24x128xf32> to vector<1xf32>
    %50 = vector.shape_cast %49 : vector<1xf32> to vector<1x1x1xf32>
    %51 = vector.extract %50[0, 0, 0] : f32 from vector<1x1x1xf32>
    %cst_15 = arith.constant 0.00178253115 : f32
    %52 = arith.mulf %51, %cst_15 : f32
    %cst_16 = arith.constant 0.000000e+00 : f32
    %53 = arith.addf %cst_16, %52 : f32
    %54 = vector.extract_strided_slice %27 {offsets = [24, 0], sizes = [24, 128], strides = [1, 1]} : vector<144x128xf32> to vector<24x128xf32>
    %55 = vector.extract_strided_slice %27 {offsets = [96, 0], sizes = [24, 128], strides = [1, 1]} : vector<144x128xf32> to vector<24x128xf32>
    %56 = arith.mulf %54, %54 : vector<24x128xf32>
    %57 = vector.shape_cast %56 : vector<24x128xf32> to vector<1x24x128xf32>
    %cst_17 = arith.constant dense<0.000000e+00> : vector<1xf32>
    %58 = vector.multi_reduction <add>, %57, %cst_17 [1, 2] : vector<1x24x128xf32> to vector<1xf32>
    %59 = vector.shape_cast %58 : vector<1xf32> to vector<1x1x1xf32>
    %60 = vector.extract %59[0, 0, 0] : f32 from vector<1x1x1xf32>
    %61 = math.sqrt %60 : f32
    %62 = arith.mulf %55, %55 : vector<24x128xf32>
    %63 = vector.shape_cast %62 : vector<24x128xf32> to vector<1x24x128xf32>
    %cst_18 = arith.constant dense<0.000000e+00> : vector<1xf32>
    %64 = vector.multi_reduction <add>, %63, %cst_18 [1, 2] : vector<1x24x128xf32> to vector<1xf32>
    %65 = vector.shape_cast %64 : vector<1xf32> to vector<1x1x1xf32>
    %66 = vector.extract %65[0, 0, 0] : f32 from vector<1x1x1xf32>
    %67 = math.sqrt %66 : f32
    %cst_19 = arith.constant 9.99999974E-6 : f32
    %68 = arith.maximumf %67, %cst_19 : f32
    %69 = arith.divf %61, %68 : f32
    %70 = arith.addf %45, %69 : f32
    %71 = vector.extract_strided_slice %28 {offsets = [24, 0], sizes = [24, 128], strides = [1, 1]} : vector<144x128xf32> to vector<24x128xf32>
    %72 = math.absf %71 : vector<24x128xf32>
    %73 = vector.shape_cast %72 : vector<24x128xf32> to vector<1x24x128xf32>
    %cst_20 = arith.constant dense<0.000000e+00> : vector<1xf32>
    %74 = vector.multi_reduction <add>, %73, %cst_20 [1, 2] : vector<1x24x128xf32> to vector<1xf32>
    %75 = vector.shape_cast %74 : vector<1xf32> to vector<1x1x1xf32>
    %76 = vector.extract %75[0, 0, 0] : f32 from vector<1x1x1xf32>
    %cst_21 = arith.constant 0.00178253115 : f32
    %77 = arith.mulf %76, %cst_21 : f32
    %78 = arith.addf %53, %77 : f32
    %79 = vector.extract_strided_slice %27 {offsets = [48, 0], sizes = [24, 128], strides = [1, 1]} : vector<144x128xf32> to vector<24x128xf32>
    %80 = vector.extract_strided_slice %27 {offsets = [120, 0], sizes = [24, 128], strides = [1, 1]} : vector<144x128xf32> to vector<24x128xf32>
    %81 = arith.mulf %79, %79 : vector<24x128xf32>
    %82 = vector.shape_cast %81 : vector<24x128xf32> to vector<1x24x128xf32>
    %cst_22 = arith.constant dense<0.000000e+00> : vector<1xf32>
    %83 = vector.multi_reduction <add>, %82, %cst_22 [1, 2] : vector<1x24x128xf32> to vector<1xf32>
    %84 = vector.shape_cast %83 : vector<1xf32> to vector<1x1x1xf32>
    %85 = vector.extract %84[0, 0, 0] : f32 from vector<1x1x1xf32>
    %86 = math.sqrt %85 : f32
    %87 = arith.mulf %80, %80 : vector<24x128xf32>
    %88 = vector.shape_cast %87 : vector<24x128xf32> to vector<1x24x128xf32>
    %cst_23 = arith.constant dense<0.000000e+00> : vector<1xf32>
    %89 = vector.multi_reduction <add>, %88, %cst_23 [1, 2] : vector<1x24x128xf32> to vector<1xf32>
    %90 = vector.shape_cast %89 : vector<1xf32> to vector<1x1x1xf32>
    %91 = vector.extract %90[0, 0, 0] : f32 from vector<1x1x1xf32>
    %92 = math.sqrt %91 : f32
    %cst_24 = arith.constant 9.99999974E-6 : f32
    %93 = arith.maximumf %92, %cst_24 : f32
    %94 = arith.divf %86, %93 : f32
    %95 = arith.addf %70, %94 : f32
    %96 = vector.extract_strided_slice %28 {offsets = [48, 0], sizes = [24, 128], strides = [1, 1]} : vector<144x128xf32> to vector<24x128xf32>
    %97 = math.absf %96 : vector<24x128xf32>
    %98 = vector.shape_cast %97 : vector<24x128xf32> to vector<1x24x128xf32>
    %cst_25 = arith.constant dense<0.000000e+00> : vector<1xf32>
    %99 = vector.multi_reduction <add>, %98, %cst_25 [1, 2] : vector<1x24x128xf32> to vector<1xf32>
    %100 = vector.shape_cast %99 : vector<1xf32> to vector<1x1x1xf32>
    %101 = vector.extract %100[0, 0, 0] : f32 from vector<1x1x1xf32>
    %cst_26 = arith.constant 0.00178253115 : f32
    %102 = arith.mulf %101, %cst_26 : f32
    %103 = arith.addf %78, %102 : f32
    %c0_27 = arith.constant 0 : index
    %c0_28 = arith.constant 0 : index
    %c0_29 = arith.constant 0 : index
    %104 = vector.load %arg6[%c0_27, %c0_28, %c0_29] : memref<1x24x128xf32, #tpu.memory_space<vmem>>, vector<1x24x128xf32>
    %105 = vector.shape_cast %104 : vector<1x24x128xf32> to vector<24x128xf32>
    %c0_30 = arith.constant 0 : index
    %c0_31 = arith.constant 0 : index
    %106 = vector.load %arg7[%c0_30, %c0_31] : memref<128x256xf32, #tpu.memory_space<vmem>>, vector<128x256xf32>
    %cst_32 = arith.constant dense<0.000000e+00> : vector<24x256xf32>
    %107 = tpu.matmul %105, %106, %cst_32 {dimension_numbers = #tpu.dot_dimension_numbers<[1], [0], [0], [1], [0, 0, 1, 1], [], []>} : vector<24x128xf32>, vector<128x256xf32>, vector<24x256xf32> -> vector<24x256xf32>
    %108 = vector.extract_strided_slice %107 {offsets = [0, 0], sizes = [24, 128], strides = [1, 1]} : vector<24x256xf32> to vector<24x128xf32>
    %109 = vector.extract_strided_slice %107 {offsets = [0, 128], sizes = [24, 128], strides = [1, 1]} : vector<24x256xf32> to vector<24x128xf32>
    %110 = arith.mulf %108, %108 : vector<24x128xf32>
    %111 = arith.mulf %109, %109 : vector<24x128xf32>
    %112 = arith.addf %110, %111 : vector<24x128xf32>
    %cst_33 = arith.constant 9.99999974E-6 : f32
    %113 = vector.broadcast %cst_33 : f32 to vector<24x128xf32>
    %114 = arith.maximumf %112, %113 : vector<24x128xf32>
    %115 = math.sqrt %114 : vector<24x128xf32>
    %116 = tpu.iota {dimensions = array<i32: 1>} : vector<1x128xi32>
    %c65_i32 = arith.constant 65 : i32
    %117 = vector.broadcast %c65_i32 : i32 to vector<1x128xi32>
    %118 = arith.cmpi slt, %116, %117 : vector<1x128xi32>
    %cst_34 = arith.constant 0.000000e+00 : f32
    %119 = vector.shape_cast %118 : vector<1x128xi1> to vector<1x128xi1>
    %120 = vector.broadcast %119 : vector<1x128xi1> to vector<24x128xi1>
    %121 = vector.broadcast %cst_34 : f32 to vector<24x128xf32>
    %122 = arith.select %120, %115, %121 : vector<24x128xi1>, vector<24x128xf32>
    %123 = math.log %115 : vector<24x128xf32>
    %cst_35 = arith.constant 0.000000e+00 : f32
    %124 = vector.shape_cast %118 : vector<1x128xi1> to vector<1x128xi1>
    %125 = vector.broadcast %124 : vector<1x128xi1> to vector<24x128xi1>
    %126 = vector.broadcast %cst_35 : f32 to vector<24x128xf32>
    %127 = arith.select %125, %123, %126 : vector<24x128xi1>, vector<24x128xf32>
    %128 = tpu.concatenate %122, %127 in 1 : vector<24x128xf32>, vector<24x128xf32> -> vector<24x256xf32>
    %c0_36 = arith.constant 0 : index
    %c0_37 = arith.constant 0 : index
    %129 = vector.load %arg8[%c0_36, %c0_37] : memref<96x24xf32, #tpu.memory_space<vmem>>, vector<96x24xf32>
    %cst_38 = arith.constant dense<0.000000e+00> : vector<96x256xf32>
    %130 = tpu.matmul %129, %128, %cst_38 {dimension_numbers = #tpu.dot_dimension_numbers<[1], [0], [0], [1], [0, 0, 1, 1], [], []>} : vector<96x24xf32>, vector<24x256xf32>, vector<96x256xf32> -> vector<96x256xf32>
    %131 = vector.extract_strided_slice %130 {offsets = [0, 0], sizes = [96, 128], strides = [1, 1]} : vector<96x256xf32> to vector<96x128xf32>
    %132 = vector.extract_strided_slice %130 {offsets = [0, 128], sizes = [96, 128], strides = [1, 1]} : vector<96x256xf32> to vector<96x128xf32>
    %133 = vector.extract_strided_slice %131 {offsets = [0, 0], sizes = [16, 128], strides = [1, 1]} : vector<96x128xf32> to vector<16x128xf32>
    %134 = vector.extract_strided_slice %131 {offsets = [48, 0], sizes = [16, 128], strides = [1, 1]} : vector<96x128xf32> to vector<16x128xf32>
    %135 = arith.mulf %133, %133 : vector<16x128xf32>
    %136 = vector.shape_cast %135 : vector<16x128xf32> to vector<1x16x128xf32>
    %cst_39 = arith.constant dense<0.000000e+00> : vector<1xf32>
    %137 = vector.multi_reduction <add>, %136, %cst_39 [1, 2] : vector<1x16x128xf32> to vector<1xf32>
    %138 = vector.shape_cast %137 : vector<1xf32> to vector<1x1x1xf32>
    %139 = vector.extract %138[0, 0, 0] : f32 from vector<1x1x1xf32>
    %140 = math.sqrt %139 : f32
    %141 = arith.mulf %134, %134 : vector<16x128xf32>
    %142 = vector.shape_cast %141 : vector<16x128xf32> to vector<1x16x128xf32>
    %cst_40 = arith.constant dense<0.000000e+00> : vector<1xf32>
    %143 = vector.multi_reduction <add>, %142, %cst_40 [1, 2] : vector<1x16x128xf32> to vector<1xf32>
    %144 = vector.shape_cast %143 : vector<1xf32> to vector<1x1x1xf32>
    %145 = vector.extract %144[0, 0, 0] : f32 from vector<1x1x1xf32>
    %146 = math.sqrt %145 : f32
    %cst_41 = arith.constant 9.99999974E-6 : f32
    %147 = arith.maximumf %146, %cst_41 : f32
    %148 = arith.divf %140, %147 : f32
    %149 = arith.addf %95, %148 : f32
    %150 = vector.extract_strided_slice %132 {offsets = [0, 0], sizes = [16, 128], strides = [1, 1]} : vector<96x128xf32> to vector<16x128xf32>
    %151 = math.absf %150 : vector<16x128xf32>
    %152 = vector.shape_cast %151 : vector<16x128xf32> to vector<1x16x128xf32>
    %cst_42 = arith.constant dense<0.000000e+00> : vector<1xf32>
    %153 = vector.multi_reduction <add>, %152, %cst_42 [1, 2] : vector<1x16x128xf32> to vector<1xf32>
    %154 = vector.shape_cast %153 : vector<1xf32> to vector<1x1x1xf32>
    %155 = vector.extract %154[0, 0, 0] : f32 from vector<1x1x1xf32>
    %cst_43 = arith.constant 0.00170940172 : f32
    %156 = arith.mulf %155, %cst_43 : f32
    %157 = arith.addf %103, %156 : f32
    %158 = vector.extract_strided_slice %131 {offsets = [16, 0], sizes = [16, 128], strides = [1, 1]} : vector<96x128xf32> to vector<16x128xf32>
    %159 = vector.extract_strided_slice %131 {offsets = [64, 0], sizes = [16, 128], strides = [1, 1]} : vector<96x128xf32> to vector<16x128xf32>
    %160 = arith.mulf %158, %158 : vector<16x128xf32>
    %161 = vector.shape_cast %160 : vector<16x128xf32> to vector<1x16x128xf32>
    %cst_44 = arith.constant dense<0.000000e+00> : vector<1xf32>
    %162 = vector.multi_reduction <add>, %161, %cst_44 [1, 2] : vector<1x16x128xf32> to vector<1xf32>
    %163 = vector.shape_cast %162 : vector<1xf32> to vector<1x1x1xf32>
    %164 = vector.extract %163[0, 0, 0] : f32 from vector<1x1x1xf32>
    %165 = math.sqrt %164 : f32
    %166 = arith.mulf %159, %159 : vector<16x128xf32>
    %167 = vector.shape_cast %166 : vector<16x128xf32> to vector<1x16x128xf32>
    %cst_45 = arith.constant dense<0.000000e+00> : vector<1xf32>
    %168 = vector.multi_reduction <add>, %167, %cst_45 [1, 2] : vector<1x16x128xf32> to vector<1xf32>
    %169 = vector.shape_cast %168 : vector<1xf32> to vector<1x1x1xf32>
    %170 = vector.extract %169[0, 0, 0] : f32 from vector<1x1x1xf32>
    %171 = math.sqrt %170 : f32
    %cst_46 = arith.constant 9.99999974E-6 : f32
    %172 = arith.maximumf %171, %cst_46 : f32
    %173 = arith.divf %165, %172 : f32
    %174 = arith.addf %149, %173 : f32
    %175 = vector.extract_strided_slice %132 {offsets = [16, 0], sizes = [16, 128], strides = [1, 1]} : vector<96x128xf32> to vector<16x128xf32>
    %176 = math.absf %175 : vector<16x128xf32>
    %177 = vector.shape_cast %176 : vector<16x128xf32> to vector<1x16x128xf32>
    %cst_47 = arith.constant dense<0.000000e+00> : vector<1xf32>
    %178 = vector.multi_reduction <add>, %177, %cst_47 [1, 2] : vector<1x16x128xf32> to vector<1xf32>
    %179 = vector.shape_cast %178 : vector<1xf32> to vector<1x1x1xf32>
    %180 = vector.extract %179[0, 0, 0] : f32 from vector<1x1x1xf32>
    %cst_48 = arith.constant 0.00170940172 : f32
    %181 = arith.mulf %180, %cst_48 : f32
    %182 = arith.addf %157, %181 : f32
    %183 = vector.extract_strided_slice %131 {offsets = [32, 0], sizes = [16, 128], strides = [1, 1]} : vector<96x128xf32> to vector<16x128xf32>
    %184 = vector.extract_strided_slice %131 {offsets = [80, 0], sizes = [16, 128], strides = [1, 1]} : vector<96x128xf32> to vector<16x128xf32>
    %185 = arith.mulf %183, %183 : vector<16x128xf32>
    %186 = vector.shape_cast %185 : vector<16x128xf32> to vector<1x16x128xf32>
    %cst_49 = arith.constant dense<0.000000e+00> : vector<1xf32>
    %187 = vector.multi_reduction <add>, %186, %cst_49 [1, 2] : vector<1x16x128xf32> to vector<1xf32>
    %188 = vector.shape_cast %187 : vector<1xf32> to vector<1x1x1xf32>
    %189 = vector.extract %188[0, 0, 0] : f32 from vector<1x1x1xf32>
    %190 = math.sqrt %189 : f32
    %191 = arith.mulf %184, %184 : vector<16x128xf32>
    %192 = vector.shape_cast %191 : vector<16x128xf32> to vector<1x16x128xf32>
    %cst_50 = arith.constant dense<0.000000e+00> : vector<1xf32>
    %193 = vector.multi_reduction <add>, %192, %cst_50 [1, 2] : vector<1x16x128xf32> to vector<1xf32>
    %194 = vector.shape_cast %193 : vector<1xf32> to vector<1x1x1xf32>
    %195 = vector.extract %194[0, 0, 0] : f32 from vector<1x1x1xf32>
    %196 = math.sqrt %195 : f32
    %cst_51 = arith.constant 9.99999974E-6 : f32
    %197 = arith.maximumf %196, %cst_51 : f32
    %198 = arith.divf %190, %197 : f32
    %199 = arith.addf %174, %198 : f32
    %200 = vector.extract_strided_slice %132 {offsets = [32, 0], sizes = [16, 128], strides = [1, 1]} : vector<96x128xf32> to vector<16x128xf32>
    %201 = math.absf %200 : vector<16x128xf32>
    %202 = vector.shape_cast %201 : vector<16x128xf32> to vector<1x16x128xf32>
    %cst_52 = arith.constant dense<0.000000e+00> : vector<1xf32>
    %203 = vector.multi_reduction <add>, %202, %cst_52 [1, 2] : vector<1x16x128xf32> to vector<1xf32>
    %204 = vector.shape_cast %203 : vector<1xf32> to vector<1x1x1xf32>
    %205 = vector.extract %204[0, 0, 0] : f32 from vector<1x1x1xf32>
    %cst_53 = arith.constant 0.00170940172 : f32
    %206 = arith.mulf %205, %cst_53 : f32
    %207 = arith.addf %182, %206 : f32
    %c0_54 = arith.constant 0 : index
    %c0_55 = arith.constant 0 : index
    %c0_56 = arith.constant 0 : index
    %208 = vector.load %arg9[%c0_54, %c0_55, %c0_56] : memref<1x72x32xf32, #tpu.memory_space<vmem>>, vector<1x72x32xf32>
    %209 = vector.shape_cast %208 : vector<1x72x32xf32> to vector<72x32xf32>
    %c0_57 = arith.constant 0 : index
    %c0_58 = arith.constant 0 : index
    %210 = vector.load %arg10[%c0_57, %c0_58] : memref<32x256xf32, #tpu.memory_space<vmem>>, vector<32x256xf32>
    %cst_59 = arith.constant dense<0.000000e+00> : vector<72x256xf32>
    %211 = tpu.matmul %209, %210, %cst_59 {dimension_numbers = #tpu.dot_dimension_numbers<[1], [0], [0], [1], [0, 0, 1, 1], [], []>} : vector<72x32xf32>, vector<32x256xf32>, vector<72x256xf32> -> vector<72x256xf32>
    %212 = vector.extract_strided_slice %211 {offsets = [0, 0], sizes = [72, 128], strides = [1, 1]} : vector<72x256xf32> to vector<72x128xf32>
    %213 = vector.extract_strided_slice %211 {offsets = [0, 128], sizes = [72, 128], strides = [1, 1]} : vector<72x256xf32> to vector<72x128xf32>
    %214 = arith.mulf %212, %212 : vector<72x128xf32>
    %215 = arith.mulf %213, %213 : vector<72x128xf32>
    %216 = arith.addf %214, %215 : vector<72x128xf32>
    %cst_60 = arith.constant 9.99999974E-6 : f32
    %217 = vector.broadcast %cst_60 : f32 to vector<72x128xf32>
    %218 = arith.maximumf %216, %217 : vector<72x128xf32>
    %219 = math.sqrt %218 : vector<72x128xf32>
    %220 = tpu.iota {dimensions = array<i32: 1>} : vector<1x128xi32>
    %c17_i32 = arith.constant 17 : i32
    %221 = vector.broadcast %c17_i32 : i32 to vector<1x128xi32>
    %222 = arith.cmpi slt, %220, %221 : vector<1x128xi32>
    %cst_61 = arith.constant 0.000000e+00 : f32
    %223 = vector.shape_cast %222 : vector<1x128xi1> to vector<1x128xi1>
    %224 = vector.broadcast %223 : vector<1x128xi1> to vector<72x128xi1>
    %225 = vector.broadcast %cst_61 : f32 to vector<72x128xf32>
    %226 = arith.select %224, %219, %225 : vector<72x128xi1>, vector<72x128xf32>
    %227 = math.log %219 : vector<72x128xf32>
    %cst_62 = arith.constant 0.000000e+00 : f32
    %228 = vector.shape_cast %222 : vector<1x128xi1> to vector<1x128xi1>
    %229 = vector.broadcast %228 : vector<1x128xi1> to vector<72x128xi1>
    %230 = vector.broadcast %cst_62 : f32 to vector<72x128xf32>
    %231 = arith.select %229, %227, %230 : vector<72x128xi1>, vector<72x128xf32>
    %232 = tpu.concatenate %226, %231 in 1 : vector<72x128xf32>, vector<72x128xf32> -> vector<72x256xf32>
    %c0_63 = arith.constant 0 : index
    %c0_64 = arith.constant 0 : index
    %233 = vector.load %arg11[%c0_63, %c0_64] : memref<240x72xf32, #tpu.memory_space<vmem>>, vector<240x72xf32>
    %cst_65 = arith.constant dense<0.000000e+00> : vector<240x256xf32>
    %234 = tpu.matmul %233, %232, %cst_65 {dimension_numbers = #tpu.dot_dimension_numbers<[1], [0], [0], [1], [0, 0, 1, 1], [], []>} : vector<240x72xf32>, vector<72x256xf32>, vector<240x256xf32> -> vector<240x256xf32>
    %235 = vector.extract_strided_slice %234 {offsets = [0, 0], sizes = [240, 128], strides = [1, 1]} : vector<240x256xf32> to vector<240x128xf32>
    %236 = vector.extract_strided_slice %234 {offsets = [0, 128], sizes = [240, 128], strides = [1, 1]} : vector<240x256xf32> to vector<240x128xf32>
    %237 = vector.extract_strided_slice %235 {offsets = [0, 0], sizes = [40, 128], strides = [1, 1]} : vector<240x128xf32> to vector<40x128xf32>
    %238 = vector.extract_strided_slice %235 {offsets = [120, 0], sizes = [40, 128], strides = [1, 1]} : vector<240x128xf32> to vector<40x128xf32>
    %239 = arith.mulf %237, %237 : vector<40x128xf32>
    %240 = vector.shape_cast %239 : vector<40x128xf32> to vector<1x40x128xf32>
    %cst_66 = arith.constant dense<0.000000e+00> : vector<1xf32>
    %241 = vector.multi_reduction <add>, %240, %cst_66 [1, 2] : vector<1x40x128xf32> to vector<1xf32>
    %242 = vector.shape_cast %241 : vector<1xf32> to vector<1x1x1xf32>
    %243 = vector.extract %242[0, 0, 0] : f32 from vector<1x1x1xf32>
    %244 = math.sqrt %243 : f32
    %245 = arith.mulf %238, %238 : vector<40x128xf32>
    %246 = vector.shape_cast %245 : vector<40x128xf32> to vector<1x40x128xf32>
    %cst_67 = arith.constant dense<0.000000e+00> : vector<1xf32>
    %247 = vector.multi_reduction <add>, %246, %cst_67 [1, 2] : vector<1x40x128xf32> to vector<1xf32>
    %248 = vector.shape_cast %247 : vector<1xf32> to vector<1x1x1xf32>
    %249 = vector.extract %248[0, 0, 0] : f32 from vector<1x1x1xf32>
    %250 = math.sqrt %249 : f32
    %cst_68 = arith.constant 9.99999974E-6 : f32
    %251 = arith.maximumf %250, %cst_68 : f32
    %252 = arith.divf %244, %251 : f32
    %253 = arith.addf %199, %252 : f32
    %254 = vector.extract_strided_slice %236 {offsets = [0, 0], sizes = [40, 128], strides = [1, 1]} : vector<240x128xf32> to vector<40x128xf32>
    %255 = math.absf %254 : vector<40x128xf32>
    %256 = vector.shape_cast %255 : vector<40x128xf32> to vector<1x40x128xf32>
    %cst_69 = arith.constant dense<0.000000e+00> : vector<1xf32>
    %257 = vector.multi_reduction <add>, %256, %cst_69 [1, 2] : vector<1x40x128xf32> to vector<1xf32>
    %258 = vector.shape_cast %257 : vector<1xf32> to vector<1x1x1xf32>
    %259 = vector.extract %258[0, 0, 0] : f32 from vector<1x1x1xf32>
    %cst_70 = arith.constant 0.00178253115 : f32
    %260 = arith.mulf %259, %cst_70 : f32
    %261 = arith.addf %207, %260 : f32
    %262 = vector.extract_strided_slice %235 {offsets = [40, 0], sizes = [40, 128], strides = [1, 1]} : vector<240x128xf32> to vector<40x128xf32>
    %263 = vector.extract_strided_slice %235 {offsets = [160, 0], sizes = [40, 128], strides = [1, 1]} : vector<240x128xf32> to vector<40x128xf32>
    %264 = arith.mulf %262, %262 : vector<40x128xf32>
    %265 = vector.shape_cast %264 : vector<40x128xf32> to vector<1x40x128xf32>
    %cst_71 = arith.constant dense<0.000000e+00> : vector<1xf32>
    %266 = vector.multi_reduction <add>, %265, %cst_71 [1, 2] : vector<1x40x128xf32> to vector<1xf32>
    %267 = vector.shape_cast %266 : vector<1xf32> to vector<1x1x1xf32>
    %268 = vector.extract %267[0, 0, 0] : f32 from vector<1x1x1xf32>
    %269 = math.sqrt %268 : f32
    %270 = arith.mulf %263, %263 : vector<40x128xf32>
    %271 = vector.shape_cast %270 : vector<40x128xf32> to vector<1x40x128xf32>
    %cst_72 = arith.constant dense<0.000000e+00> : vector<1xf32>
    %272 = vector.multi_reduction <add>, %271, %cst_72 [1, 2] : vector<1x40x128xf32> to vector<1xf32>
    %273 = vector.shape_cast %272 : vector<1xf32> to vector<1x1x1xf32>
    %274 = vector.extract %273[0, 0, 0] : f32 from vector<1x1x1xf32>
    %275 = math.sqrt %274 : f32
    %cst_73 = arith.constant 9.99999974E-6 : f32
    %276 = arith.maximumf %275, %cst_73 : f32
    %277 = arith.divf %269, %276 : f32
    %278 = arith.addf %253, %277 : f32
    %279 = vector.extract_strided_slice %236 {offsets = [40, 0], sizes = [40, 128], strides = [1, 1]} : vector<240x128xf32> to vector<40x128xf32>
    %280 = math.absf %279 : vector<40x128xf32>
    %281 = vector.shape_cast %280 : vector<40x128xf32> to vector<1x40x128xf32>
    %cst_74 = arith.constant dense<0.000000e+00> : vector<1xf32>
    %282 = vector.multi_reduction <add>, %281, %cst_74 [1, 2] : vector<1x40x128xf32> to vector<1xf32>
    %283 = vector.shape_cast %282 : vector<1xf32> to vector<1x1x1xf32>
    %284 = vector.extract %283[0, 0, 0] : f32 from vector<1x1x1xf32>
    %cst_75 = arith.constant 0.00178253115 : f32
    %285 = arith.mulf %284, %cst_75 : f32
    %286 = arith.addf %261, %285 : f32
    %287 = vector.extract_strided_slice %235 {offsets = [80, 0], sizes = [40, 128], strides = [1, 1]} : vector<240x128xf32> to vector<40x128xf32>
    %288 = vector.extract_strided_slice %235 {offsets = [200, 0], sizes = [40, 128], strides = [1, 1]} : vector<240x128xf32> to vector<40x128xf32>
    %289 = arith.mulf %287, %287 : vector<40x128xf32>
    %290 = vector.shape_cast %289 : vector<40x128xf32> to vector<1x40x128xf32>
    %cst_76 = arith.constant dense<0.000000e+00> : vector<1xf32>
    %291 = vector.multi_reduction <add>, %290, %cst_76 [1, 2] : vector<1x40x128xf32> to vector<1xf32>
    %292 = vector.shape_cast %291 : vector<1xf32> to vector<1x1x1xf32>
    %293 = vector.extract %292[0, 0, 0] : f32 from vector<1x1x1xf32>
    %294 = math.sqrt %293 : f32
    %295 = arith.mulf %288, %288 : vector<40x128xf32>
    %296 = vector.shape_cast %295 : vector<40x128xf32> to vector<1x40x128xf32>
    %cst_77 = arith.constant dense<0.000000e+00> : vector<1xf32>
    %297 = vector.multi_reduction <add>, %296, %cst_77 [1, 2] : vector<1x40x128xf32> to vector<1xf32>
    %298 = vector.shape_cast %297 : vector<1xf32> to vector<1x1x1xf32>
    %299 = vector.extract %298[0, 0, 0] : f32 from vector<1x1x1xf32>
    %300 = math.sqrt %299 : f32
    %cst_78 = arith.constant 9.99999974E-6 : f32
    %301 = arith.maximumf %300, %cst_78 : f32
    %302 = arith.divf %294, %301 : f32
    %303 = arith.addf %278, %302 : f32
    %304 = vector.extract_strided_slice %236 {offsets = [80, 0], sizes = [40, 128], strides = [1, 1]} : vector<240x128xf32> to vector<40x128xf32>
    %305 = math.absf %304 : vector<40x128xf32>
    %306 = vector.shape_cast %305 : vector<40x128xf32> to vector<1x40x128xf32>
    %cst_79 = arith.constant dense<0.000000e+00> : vector<1xf32>
    %307 = vector.multi_reduction <add>, %306, %cst_79 [1, 2] : vector<1x40x128xf32> to vector<1xf32>
    %308 = vector.shape_cast %307 : vector<1xf32> to vector<1x1x1xf32>
    %309 = vector.extract %308[0, 0, 0] : f32 from vector<1x1x1xf32>
    %cst_80 = arith.constant 0.00178253115 : f32
    %310 = arith.mulf %309, %cst_80 : f32
    %311 = arith.addf %286, %310 : f32
    %312 = arith.addf %303, %311 : f32
    %cst_81 = arith.constant 0.333333343 : f32
    %313 = arith.mulf %312, %cst_81 : f32
    %c0_82 = arith.constant 0 : index
    %c0_83 = arith.constant 0 : index
    %c0_84 = arith.constant 0 : index
    %314 = vector.load %arg1[%c0_82, %c0_83, %c0_84] : memref<1x1x256xf32, #tpu.memory_space<vmem>>, vector<1x1x256xf32>
    %315 = vector.shape_cast %314 : vector<1x1x256xf32> to vector<1x256xf32>
    %c0_85 = arith.constant 0 : index
    %c0_86 = arith.constant 0 : index
    %c0_87 = arith.constant 0 : index
    %316 = vector.load %arg2[%c0_85, %c0_86, %c0_87] : memref<1x1x256xf32, #tpu.memory_space<vmem>>, vector<1x1x256xf32>
    %317 = vector.shape_cast %316 : vector<1x1x256xf32> to vector<1x256xf32>
    %318 = arith.mulf %315, %317 : vector<1x256xf32>
    %319 = vector.shape_cast %318 : vector<1x256xf32> to vector<1x1x256xf32>
    %cst_88 = arith.constant dense<0.000000e+00> : vector<1xf32>
    %320 = vector.multi_reduction <add>, %319, %cst_88 [1, 2] : vector<1x1x256xf32> to vector<1xf32>
    %321 = vector.shape_cast %320 : vector<1xf32> to vector<1x1x1xf32>
    %322 = vector.extract %321[0, 0, 0] : f32 from vector<1x1x1xf32>
    %cst_89 = arith.constant 1.1920929E-7 : f32
    %323 = arith.addf %322, %cst_89 : f32
    %324 = arith.mulf %317, %317 : vector<1x256xf32>
    %325 = vector.shape_cast %324 : vector<1x256xf32> to vector<1x1x256xf32>
    %cst_90 = arith.constant dense<0.000000e+00> : vector<1xf32>
    %326 = vector.multi_reduction <add>, %325, %cst_90 [1, 2] : vector<1x1x256xf32> to vector<1xf32>
    %327 = vector.shape_cast %326 : vector<1xf32> to vector<1x1x1xf32>
    %328 = vector.extract %327[0, 0, 0] : f32 from vector<1x1x1xf32>
    %cst_91 = arith.constant 1.1920929E-7 : f32
    %329 = arith.addf %328, %cst_91 : f32
    %330 = arith.divf %323, %329 : f32
    %331 = vector.broadcast %330 : f32 to vector<1x256xf32>
    %332 = arith.mulf %331, %317 : vector<1x256xf32>
    %333 = arith.subf %332, %315 : vector<1x256xf32>
    %334 = arith.mulf %332, %332 : vector<1x256xf32>
    %335 = vector.shape_cast %334 : vector<1x256xf32> to vector<1x1x256xf32>
    %cst_92 = arith.constant dense<0.000000e+00> : vector<1xf32>
    %336 = vector.multi_reduction <add>, %335, %cst_92 [1, 2] : vector<1x1x256xf32> to vector<1xf32>
    %337 = vector.shape_cast %336 : vector<1xf32> to vector<1x1x1xf32>
    %338 = vector.extract %337[0, 0, 0] : f32 from vector<1x1x1xf32>
    %cst_93 = arith.constant 1.1920929E-7 : f32
    %339 = arith.addf %338, %cst_93 : f32
    %340 = arith.mulf %333, %333 : vector<1x256xf32>
    %341 = vector.shape_cast %340 : vector<1x256xf32> to vector<1x1x256xf32>
    %cst_94 = arith.constant dense<0.000000e+00> : vector<1xf32>
    %342 = vector.multi_reduction <add>, %341, %cst_94 [1, 2] : vector<1x1x256xf32> to vector<1xf32>
    %343 = vector.shape_cast %342 : vector<1xf32> to vector<1x1x1xf32>
    %344 = vector.extract %343[0, 0, 0] : f32 from vector<1x1x1xf32>
    %cst_95 = arith.constant 1.1920929E-7 : f32
    %345 = arith.addf %344, %cst_95 : f32
    %346 = arith.divf %339, %345 : f32
    %347 = math.log %346 : f32
    %cst_96 = arith.constant 1.000000e+01 : f32
    %348 = arith.mulf %cst_96, %347 : f32
    %cst_97 = arith.constant 0.434294492 : f32
    %349 = arith.mulf %348, %cst_97 : f32
    %350 = arith.subf %313, %349 : f32
    %351 = vector.broadcast %350 : f32 to vector<1x8x128xf32>
    %c0_98 = arith.constant 0 : index
    %c0_99 = arith.constant 0 : index
    %c0_100 = arith.constant 0 : index
    %352 = vector.load %arg12[%c0_98, %c0_99, %c0_100] : memref<1x8x128xf32, #tpu.memory_space<vmem>>, vector<1x8x128xf32>
    tpu.vector_store %arg12[%c0_98, %c0_99, %c0_100], %351 {strides = array<i32>} : memref<1x8x128xf32, #tpu.memory_space<vmem>>, vector<1x8x128xf32>,
    return
  }
  func.func @transform_0(%arg0: i32) -> (i32, i32, i32) {
    %c0_i32 = arith.constant 0 : i32
    %c0_i32_0 = arith.constant 0 : i32
    %c0_i32_1 = arith.constant 0 : i32
    return %arg0, %c0_i32, %c0_i32_0 : i32, i32, i32
  }
  func.func @transform_1(%arg0: i32) -> (i32, i32, i32) {
    %c0_i32 = arith.constant 0 : i32
    %c0_i32_0 = arith.constant 0 : i32
    %c0_i32_1 = arith.constant 0 : i32
    return %arg0, %c0_i32, %c0_i32_0 : i32, i32, i32
  }
  func.func @transform_2(%arg0: i32) -> (i32, i32, i32) {
    %c0_i32 = arith.constant 0 : i32
    %c0_i32_0 = arith.constant 0 : i32
    %c0_i32_1 = arith.constant 0 : i32
    return %arg0, %c0_i32, %c0_i32_0 : i32, i32, i32
  }
  func.func @transform_3(%arg0: i32) -> (i32, i32) {
    %c0_i32 = arith.constant 0 : i32
    %c0_i32_0 = arith.constant 0 : i32
    %c0_i32_1 = arith.constant 0 : i32
    return %c0_i32, %c0_i32_0 : i32, i32
  }
  func.func @transform_4(%arg0: i32) -> (i32, i32) {
    %c0_i32 = arith.constant 0 : i32
    %c0_i32_0 = arith.constant 0 : i32
    %c0_i32_1 = arith.constant 0 : i32
    return %c0_i32, %c0_i32_0 : i32, i32
  }
  func.func @transform_5(%arg0: i32) -> (i32, i32, i32) {
    %c0_i32 = arith.constant 0 : i32
    %c0_i32_0 = arith.constant 0 : i32
    %c0_i32_1 = arith.constant 0 : i32
    return %arg0, %c0_i32, %c0_i32_0 : i32, i32, i32
  }
  func.func @transform_6(%arg0: i32) -> (i32, i32) {
    %c0_i32 = arith.constant 0 : i32
    %c0_i32_0 = arith.constant 0 : i32
    %c0_i32_1 = arith.constant 0 : i32
    return %c0_i32, %c0_i32_0 : i32, i32
  }
  func.func @transform_7(%arg0: i32) -> (i32, i32) {
    %c0_i32 = arith.constant 0 : i32
    %c0_i32_0 = arith.constant 0 : i32
    %c0_i32_1 = arith.constant 0 : i32
    return %c0_i32, %c0_i32_0 : i32, i32
  }
  func.func @transform_8(%arg0: i32) -> (i32, i32, i32) {
    %c0_i32 = arith.constant 0 : i32
    %c0_i32_0 = arith.constant 0 : i32
    %c0_i32_1 = arith.constant 0 : i32
    return %arg0, %c0_i32, %c0_i32_0 : i32, i32, i32
  }
  func.func @transform_9(%arg0: i32) -> (i32, i32) {
    %c0_i32 = arith.constant 0 : i32
    %c0_i32_0 = arith.constant 0 : i32
    %c0_i32_1 = arith.constant 0 : i32
    return %c0_i32, %c0_i32_0 : i32, i32
  }
  func.func @transform_10(%arg0: i32) -> (i32, i32) {
    %c0_i32 = arith.constant 0 : i32
    %c0_i32_0 = arith.constant 0 : i32
    %c0_i32_1 = arith.constant 0 : i32
    return %c0_i32, %c0_i32_0 : i32, i32
  }
  func.func @transform_11(%arg0: i32) -> (i32, i32, i32) {
    %c0_i32 = arith.constant 0 : i32
    %c0_i32_0 = arith.constant 0 : i32
    %c0_i32_1 = arith.constant 0 : i32
    return %arg0, %c0_i32, %c0_i32_0 : i32, i32, i32
  }
}

</mosaic_0001>

<bundles_post_ra>
// kernel: tpu_custom_call.1
= control target key start
LH: loop header
LB: loop body
LE: loop exit
PB: predicated region body
PF: predicated region fallthrough
CT: control target
= control target key end

     0   :  { %s4278_s0 = inlined_call_operand.vmem [shape: f32[4,1,256], index: 0, kind: input, shape index: {}]   ;;  %s4279_s1 = inlined_call_operand.vmem [shape: f32[4,1,256], index: 1, kind: input, shape index: {}]   ;;  %s4280_s2 = inlined_call_operand.vmem [shape: f32[4,40,64], index: 2, kind: input, shape index: {}]   ;;  %s4281_s3 = inlined_call_operand.vmem [shape: f32[64,256], index: 3, kind: input, shape index: {}]   ;;  %s4282_s4 = inlined_call_operand.vmem [shape: f32[144,40], index: 4, kind: input, shape index: {}]   ;;  %s4283_s5 = inlined_call_operand.vmem [shape: f32[4,24,128], index: 5, kind: input, shape index: {}]   ;;  %s4284_s6 = inlined_call_operand.vmem [shape: f32[128,256], index: 6, kind: input, shape index: {}]   ;;  %s4285_s7 = inlined_call_operand.vmem [shape: f32[96,24], index: 7, kind: input, shape index: {}]   ;;  %s4286_s8 = inlined_call_operand.vmem [shape: f32[4,72,32], index: 8, kind: input, shape index: {}]   ;;  %s4287_s9 = inlined_call_operand.vmem [shape: f32[32,256], index: 9, kind: input, shape index: {}]   ;;  %s4288_s10 = inlined_call_operand.vmem [shape: f32[240,72], index: 10, kind: input, shape index: {}]   ;;  %s4289_s11 = inlined_call_operand.hbm [shape: f32[4,8,128], index: 11, kind: output, shape index: {}]  }
   0x1   :  { %4295 = sst [smem:[#allocation8_spill]] %s4278_s0 }
   0x2   :  { %4296 = sst [smem:[#allocation9_spill]] %s4280_s2 }
   0x3   :  { %4297 = sst [smem:[#allocation10_spill]] %s4281_s3 }
   0x4   :  { %4298 = sst [smem:[#allocation11_spill]] %s4282_s4 }
   0x5   :  { %4299 = sst [smem:[#allocation12_spill]] %s4283_s5 }
   0x6   :  { %16 = vsyncpa [#allocation3], 0 }
   0x7   :  { %18 = vsyncpa [#allocation3 + $0x1], 0  ;;  %s3342_s17 = smov 0   ;;  %s3344_s18 = smov 0  }
   0x8   :  { %s3346_s19 = smov 0   ;;  %s3348_s20 = smov 0  }
   0x9 LB: > { %4300 = sst [smem:[#allocation5_spill]] %s3273_s19  ;;  %s3363_s21 = sadd.s32 4294967295, %s3277_s20   ;;  %s3277_s20 = sphi %s3348_s20, %s4311_s20   ;;  %s3273_s19 = sphi %s3346_s19, %s4313_s19   ;;  %s3269_s18 = sphi %s3344_s18, %s4315_s18   ;;  %s3265_s17 = sphi %s3342_s17, %s4314_s17  }
   0xa   : > { %s2783_s22 = sadd.s32 4294967294, %s3277_s20   ;;  %s3367_s23 = sadd.s32 1, %s3277_s20  }
   0xb   : > { %4301 = sst [smem:[#allocation6_spill]] %s3367_s23  ;;  %s287_s24 = sadd.s32 1, %s3273_s19 }
   0xc   : > { %s284_s25 = ssub.s32 %s3277_s20, %s3367_s23  ;;  %p297_p0 = scmp.ne.s32.totalorder %s3273_s19, %s3269_s18 }
   0xd   : > { %p285_p1 = scmp.eq.s32.totalorder %s284_s25, 0  ;;  %p298_p2 = scmp.eq.s32.totalorder %s3363_s21, 3 }
   0xe   : > { %p303_p3 = scmp.ne.s32.totalorder %s3269_s18, %s3265_s17  ;;  %p304_p4 = scmp.eq.s32.totalorder %s2783_s22, 3 }
   0xf   : > { %s3378_s26 = scalar_select %p285_p1, %s3273_s19, %s287_s24  }
  0x10   : > { %p3380_p5 = por %p298_p2, %p297_p0  ;;  %p3384_p6 = por %p304_p4, %p303_p3 }
  0x11   : > { %4302 = sst [smem:[#allocation7_spill]] %s3378_s26  ;;  %p2786_p7 = scmp.ge.s32.totalorder %s3277_s20, 1 }
  0x12   : > { %p378_p8 = scmp.lt.s32.totalorder %s3277_s20, 5 }
  0x14   : > { %p379_p9 = pnand %p2786_p7, %p378_p8 }
  0x15   : > { %s4305_s3 = sld [smem:[#allocation10_spill]] (!%p379_p9)  ;;  %p436_p10 = scmp.lt.s32.totalorder (!%p379_p9), %s3363_s21, 3 }
  0x16   : > { %382 = sbr.rel (%p379_p9) target bundleno = 3012 (0xbc4), region = 64  ;;  %s4306_s2 = sld [smem:[#allocation9_spill]] (!%p379_p9) }
  0x17   : > { %s4307_s4 = sld [smem:[#allocation11_spill]] (!%p379_p9) }
  0x18   : > { %s4308_s5 = sld [smem:[#allocation12_spill]] (!%p379_p9) }
  0x19   : > { %s4310_s0 = sld [smem:[#allocation8_spill]] (!%p379_p9) }
  0x1b   : > { %v479_v0 = vld [vmem:[%s4305_s3 + $0x78] sm:$0xff]  ;;  %v478_v1 = vld [vmem:[%s4305_s3 + $0x70] sm:$0xff]  ;;  %v477_v2 = vld [vmem:[%s4305_s3 + $0x68] sm:$0xff]  ;;  %v3279_v4 = vmov 0.0   ;;  %s3412_s12 = scalar_select %p436_p10, %s3363_s21, 3  ;;  %vm480_vm0 = vcmask 523264  }
  0x1c   : > { %512 = vmatprep.subr.mxu0 %v479_v0  ;;  %v476_v3 = vld [vmem:[%s4305_s3 + $0x60] sm:$0xff]  ;;  %560 = vmatprep.mubr.f32.mxu0 %v3279_v4  ;;  %v475_v5 = vld [vmem:[%s4305_s3 + $0x58] sm:$0xff]  ;;  %v474_v6 = vld [vmem:[%s4305_s3 + $0x50] sm:$0xff]  ;;  %vm689_vm12 = vcmask 326656  }
  0x1d   : > { %513 = vmatpush1.msra.mxu0 %v478_v1  ;;  %808 = vmatprep.mubr.f32.mxu1 %v3279_v4  ;;  %v473_v7 = vld [vmem:[%s4305_s3 + $0x48] sm:$0xff]  ;;  %v472_v8 = vld [vmem:[%s4305_s3 + $0x40] sm:$0xff]  ;;  %v471_v9 = vld [vmem:[%s4305_s3 + $0x38] sm:$0xff]  ;;  %s2923_s30 = smul.u32 40, %s3412_s12 }
  0x1e   : > { %514 = vmatprep.subr.mxu0 %v477_v2  ;;  %v470_v10 = vld [vmem:[%s4305_s3 + $0x30] sm:$0xff]  ;;  %v469_v11 = vld [vmem:[%s4305_s3 + $0x28] sm:$0xff]  ;;  %v468_v12 = vld [vmem:[%s4305_s3 + $0x20] sm:$0xff]  ;;  %s2924_s14 = smul.u32 24, %s3412_s12 }
  0x1f   : > { %515 = vmatpush1.msra.mxu0 %v476_v3  ;;  %v467_v13 = vld [vmem:[%s4305_s3 + $0x18] sm:$0xff]  ;;  %v466_v14 = vld [vmem:[%s4305_s3 + $0x10] sm:$0xff]  ;;  %s448_s26 = scalar_lea.vmem %s4306_s2, %s2923_s30  ;;  %v465_v15 = vld [vmem:[%s4305_s3 + $0x8] sm:$0xff]  ;;  %s2925_s16 = smul.u32 72, %s3412_s12 }
  0x20   : > { %516 = vmatprep.subr.mxu0 %v475_v5  ;;  %v464_v16 = vld [vmem:[%s4305_s3] sm:$0xff]  ;;  %v460_v18 = vld [vmem:[%s448_s26 + $0x8] sm:$0xff]  ;;  %v461_v19 = vld [vmem:[%s448_s26 + $0x10] sm:$0xff]  ;;  %s453_s13 = scalar_lea.vmem %s4308_s5, %s2924_s14  ;;  %s4309_s3 = smov 1e-05  }
  0x21   : > { %517 = vmatpush1.msra.mxu0 %v474_v6  ;;  %v459_v17 = vld [vmem:[%s448_s26] sm:$0xff]  ;;  %v462_v20 = vld [vmem:[%s448_s26 + $0x18] sm:$0xff]  ;;  %s3744_s25 = scalar_lea.vmem %s4286_s8, %s2925_s16 }
  0x22   : > { %518 = vmatprep.subr.mxu0 %v473_v7  ;;  %v463_v21 = vld [vmem:[%s448_s26 + $0x20] sm:$0xff] }
  0x23   : > { %519 = vmatpush1.msra.mxu0 %v472_v8 }
  0x24   : > { %520 = vmatprep.subr.mxu0 %v471_v9 }
  0x25   : > { %521 = vmatpush1.msra.mxu0 %v470_v10 }
  0x26   : > { %522 = vmatprep.subr.mxu0 %v469_v11 }
  0x27   : > { %523 = vmatpush1.msra.mxu0 %v468_v12 }
  0x28   : > { %524 = vmatprep.subr.mxu0 %v467_v13 }
  0x29   : > { %525 = vmatpush1.msra.mxu0 %v466_v14  ;;  %v646_v14 = vlaneseq }
  0x2a   : > { %526 = vmatprep.subr.mxu0 %v465_v15 }
  0x2b   : > { %527 = vmatpush1.msra.mxu0 %v464_v16  ;;  %v3455_v15 = vand.u32 127, %v646_v14 }
  0x2c   : > { %2793 = vmatmul.mubr.msk.f32.vlgmr.msra.gmra.mxu0 %vm480_vm0, %v459_v17 }
  0x2d   : > { %566 = vmatprep.mubr.f32.mxu0 %v3279_v4  ;;  %vm648_vm11 = vcmp.lt.s32.totalorder %v3455_v15, 33 }
  0x30   : > { %2794 = vmatmul.mubr.msk.f32.gmra.mxu0 %vm480_vm0, %v460_v18 }
  0x31   : > { %572 = vmatprep.mubr.f32.mxu0 %v3279_v4 }
  0x34   : > { %2795 = vmatmul.mubr.msk.f32.gmra.mxu0 %vm480_vm0, %v461_v19 }
  0x35   : > { %578 = vmatprep.mubr.f32.mxu0 %v3279_v4 }
  0x38   : > { %2796 = vmatmul.mubr.msk.f32.gmra.mxu0 %vm480_vm0, %v462_v20 }
  0x39   : > { %584 = vmatprep.mubr.f32.mxu0 %v3279_v4 }
  0x3c   : > { %2797 = vmatmul.mubr.msk.f32.gmra.mxu0 %vm480_vm0, %v463_v21 }
  0x3d   : > { %1211 = vmatprep.mubr.f32.mxu0 %v3279_v4 }
  0xec   : > { %v562_v22 = vpop.f32.mrf.mxu0 }
  0xed   : > { %v591_v33 = vmul.f32 %v562_v22, %v562_v22 }
  0xee   : > { %v564_v23 = vpop.f32.mrf.mxu0 }
  0xef   : > { %v596_v28 = vmul.f32 %v564_v23, %v564_v23 }
  0xf0   : > { %v568_v24 = vpop.f32.mrf.mxu0 }
  0xf1   : > { %v592_v29 = vmul.f32 %v568_v24, %v568_v24  ;;  %v601_v37 = vadd.f32 %v596_v28, %v591_v33  ;;  %v673_v28 = vld [vmem:[%s4307_s4 + $0x10] sm:$0xff]  ;;  %v678_v33 = vld [vmem:[%s4307_s4 + $0x38] sm:$0xff] }
  0xf2   : > { %v570_v25 = vpop.f32.mrf.mxu0 }
  0xf3   : > { %v597_v26 = vmul.f32 %v570_v25, %v570_v25  ;;  %v606_v45 = vmax.f32 %v601_v37, 1e-05  ;;  %v682_v37 = vld [vmem:[%s4307_s4 + $0x58] sm:$0xff] }
  0xf4   : > { %v574_v27 = vpop.f32.mrf.mxu0 }
  0xf5   : > { %v593_v31 = vmul.f32 %v574_v27, %v574_v27  ;;  %v602_v34 = vadd.f32 %v597_v26, %v592_v29  ;;  %vm613_vm4 = vcmp.eq.f32.partialorder %v606_v45, inf  ;;  %v616_v12 = vand.u32 2147483648, %v606_v45  ;;  %v671_v26 = vld [vmem:[%s4307_s4] sm:$0xff]  ;;  %v672_v27 = vld [vmem:[%s4307_s4 + $0x8] sm:$0xff]  ;;  %v674_v29 = vld [vmem:[%s4307_s4 + $0x18] sm:$0xff] }
  0xf6   : > { %v576_v30 = vpop.f32.mrf.mxu0  ;;  %vm615_vm10 = vcmp.eq.f32.partialorder %v606_v45, 0.0 }
  0xf7   : > { %v598_v32 = vmul.f32 %v576_v30, %v576_v30  ;;  %v607_v42 = vmax.f32 %v602_v34, 1e-05  ;;  %v675_v30 = vld [vmem:[%s4307_s4 + $0x20] sm:$0xff] }
  0xf8   : > { %v580_v35 = vpop.f32.mrf.mxu0  ;;  %v679_v34 = vld [vmem:[%s4307_s4 + $0x40] sm:$0xff] }
  0xf9   : > { %v603_v36 = vadd.f32 %v598_v32, %v593_v31  ;;  %v594_v40 = vmul.f32 %v580_v35, %v580_v35  ;;  %vm620_vm6 = vcmp.eq.f32.partialorder %v607_v42, inf  ;;  %v623_v9 = vand.u32 2147483648, %v607_v42  ;;  %v676_v31 = vld [vmem:[%s4307_s4 + $0x28] sm:$0xff]  ;;  %v677_v32 = vld [vmem:[%s4307_s4 + $0x30] sm:$0xff] }
  0xfa   : > { %v582_v38 = vpop.f32.mrf.mxu0  ;;  %vm622_vm9 = vcmp.eq.f32.partialorder %v607_v42, 0.0  ;;  %v680_v35 = vld [vmem:[%s4307_s4 + $0x48] sm:$0xff] }
  0xfb   : > { %v608_v39 = vmax.f32 %v603_v36, 1e-05  ;;  %v599_v41 = vmul.f32 %v582_v38, %v582_v38  ;;  %v681_v36 = vld [vmem:[%s4307_s4 + $0x50] sm:$0xff]  ;;  %v683_v38 = vld [vmem:[%s4307_s4 + $0x60] sm:$0xff] }
  0xfc   : > { %v586_v43 = vpop.f32.mrf.mxu0 }
  0xfd   : > { %v604_v44 = vadd.f32 %v599_v41, %v594_v40  ;;  %3089 = vrsqrt.f32 %v608_v39  ;;  %v595_v48 = vmul.f32 %v586_v43, %v586_v43  ;;  %vm627_vm3 = vcmp.eq.f32.partialorder %v608_v39, inf  ;;  %v685_v40 = vld [vmem:[%s4307_s4 + $0x70] sm:$0xff]  ;;  %v1146_v41 = vld [vmem:[%s4284_s6 + $0xf8] sm:$0xff]  ;;  %v1144_v43 = vld [vmem:[%s4284_s6 + $0xe8] sm:$0xff] }
  0xfe   : > { %v588_v46 = vpop.f32.mrf.mxu0  ;;  %3091 = vrsqrt.f32 %v607_v42  ;;  %v630_v3 = vand.u32 2147483648, %v608_v39  ;;  %vm629_vm8 = vcmp.eq.f32.partialorder %v608_v39, 0.0  ;;  %1147 = vmatprep.subr.mxu0 %v1146_v41 }
  0xff   : > { %v609_v47 = vmax.f32 %v604_v44, 1e-05  ;;  %v600_v49 = vmul.f32 %v588_v46, %v588_v46  ;;  %v1143_v44 = vld [vmem:[%s4284_s6 + $0xe0] sm:$0xff]  ;;  %v1141_v46 = vld [vmem:[%s4284_s6 + $0xd0] sm:$0xff] }
 0x101   : > { %3093 = vrsqrt.f32 %v609_v47  ;;  %v605_v50 = vadd.f32 %v600_v49, %v595_v48  ;;  %vm634_vm1 = vcmp.eq.f32.partialorder %v609_v47, inf  ;;  %v637_v59 = vand.u32 2147483648, %v609_v47  ;;  %v1139_v48 = vld [vmem:[%s4284_s6 + $0xc0] sm:$0xff]  ;;  %v1138_v49 = vld [vmem:[%s4284_s6 + $0xb8] sm:$0xff] }
 0x102   : > { %3095 = vrsqrt.f32 %v606_v45  ;;  %vm636_vm2 = vcmp.eq.f32.partialorder %v609_v47, 0.0 }
 0x103   : > { %v610_v51 = vmax.f32 %v605_v50, 1e-05  ;;  %v1137_v50 = vld [vmem:[%s4284_s6 + $0xb0] sm:$0xff] }
 0x105   : > { %3097 = vrsqrt.f32 %v610_v51  ;;  %vm641_vm5 = vcmp.eq.f32.partialorder %v610_v51, inf  ;;  %v644_v2 = vand.u32 2147483648, %v610_v51  ;;  %vm643_vm7 = vcmp.eq.f32.partialorder %v610_v51, 0.0 }
 0x10a   : > { %v3090_v52 = vpop.eup %3089 }
 0x10b   : > { %v3092_v53 = vpop.eup %3091  ;;  %v626_v56 = vmul.f32 %v3090_v52, %v608_v39  ;;  %v1135_v52 = vld [vmem:[%s4284_s6 + $0xa0] sm:$0xff] }
 0x10c   : > { %v619_v60 = vmul.f32 %v3092_v53, %v607_v42  ;;  %v1134_v53 = vld [vmem:[%s4284_s6 + $0x98] sm:$0xff] }
 0x10d   : > { %v628_v0 = vsel %vm627_vm3, %v608_v39, %v626_v56  ;;  %v684_v39 = vld [vmem:[%s4307_s4 + $0x68] sm:$0xff]  ;;  %v1131_v56 = vld [vmem:[%s4284_s6 + $0x80] sm:$0xff] }
 0x10e   : > { %v3094_v54 = vpop.eup %3093  ;;  %v621_v6 = vsel %vm620_vm6, %v607_v42, %v619_v60  ;;  %v631_v8 = vsel %vm629_vm8, %v630_v3, %v628_v0  ;;  %v1145_v42 = vld [vmem:[%s4284_s6 + $0xf0] sm:$0xff]  ;;  %v1127_v60 = vld [vmem:[%s4284_s6 + $0x60] sm:$0xff]  ;;  %v1120_v3 = vld [vmem:[%s4284_s6 + $0x28] sm:$0xff]  ;;  %vm1290_vm6 = vcmask 195584  }
 0x10f   : > { %v633_v55 = vmul.f32 %v3094_v54, %v609_v47  ;;  %v3096_v57 = vpop.eup %3095  ;;  %v624_v11 = vsel %vm622_vm9, %v623_v9, %v621_v6  ;;  %1148 = vmatpush1.msra.mxu0 %v1145_v42  ;;  %v1133_v54 = vld [vmem:[%s4284_s6 + $0x90] sm:$0xff]  ;;  %v1123_v0 = vld [vmem:[%s4284_s6 + $0x40] sm:$0xff]  ;;  %v1118_v6 = vld [vmem:[%s4284_s6 + $0x18] sm:$0xff] }
 0x110   : > { %v612_v1 = vmul.f32 %v3096_v57, %v606_v45  ;;  %1149 = vmatprep.subr.mxu0 %v1144_v43  ;;  %v1130_v57 = vld [vmem:[%s4284_s6 + $0x78] sm:$0xff]  ;;  %v1115_v9 = vld [vmem:[%s4284_s6] sm:$0xff] }
 0x111   : > { %v635_v58 = vsel %vm634_vm1, %v609_v47, %v633_v55  ;;  %1150 = vmatpush1.msra.mxu0 %v1143_v44  ;;  %v1140_v47 = vld [vmem:[%s4284_s6 + $0xc8] sm:$0xff] }
 0x112   : > { %v3098_v61 = vpop.eup %3097  ;;  %v638_v63 = vsel %vm636_vm2, %v637_v59, %v635_v58  ;;  %v614_v10 = vsel %vm613_vm4, %v606_v45, %v612_v1  ;;  %v1142_v45 = vld [vmem:[%s4284_s6 + $0xd8] sm:$0xff]  ;;  %v1132_v55 = vld [vmem:[%s4284_s6 + $0x88] sm:$0xff]  ;;  %v1129_v58 = vld [vmem:[%s4284_s6 + $0x70] sm:$0xff] }
 0x113   : > { %v640_v62 = vmul.f32 %v3098_v61, %v610_v51  ;;  %3099 = vlog2.f32 %v638_v63  ;;  %v617_v13 = vsel %vm615_vm10, %v616_v12, %v614_v10  ;;  %1151 = vmatprep.subr.mxu0 %v1142_v45  ;;  %v1128_v59 = vld [vmem:[%s4284_s6 + $0x68] sm:$0xff]  ;;  %v1126_v61 = vld [vmem:[%s4284_s6 + $0x58] sm:$0xff]  ;;  %v1112_v10 = vld [vmem:[%s453_s13] sm:$0xff] }
 0x114   : > { %1152 = vmatpush1.msra.mxu0 %v1141_v46  ;;  %v1122_v1 = vld [vmem:[%s4284_s6 + $0x38] sm:$0xff]  ;;  %v1114_v12 = vld [vmem:[%s453_s13 + $0x10] sm:$0xff] }
 0x115   : > { %v642_v5 = vsel %vm641_vm5, %v610_v51, %v640_v62  ;;  %1153 = vmatprep.subr.mxu0 %v1140_v47  ;;  %v1136_v51 = vld [vmem:[%s4284_s6 + $0xa8] sm:$0xff]  ;;  %v1125_v62 = vld [vmem:[%s4284_s6 + $0x50] sm:$0xff]  ;;  %vm1263_vm5 = vcmp.lt.s32.totalorder %v3455_v15, 65 }
 0x116   : > { %v645_v7 = vsel %vm643_vm7, %v644_v2, %v642_v5  ;;  %1154 = vmatpush1.msra.mxu0 %v1139_v48  ;;  %v1121_v2 = vld [vmem:[%s4284_s6 + $0x30] sm:$0xff]  ;;  %v1119_v5 = vld [vmem:[%s4284_s6 + $0x20] sm:$0xff] }
 0x117   : > { %3101 = vlog2.f32 %v645_v7  ;;  %1155 = vmatprep.subr.mxu0 %v1138_v49 }
 0x118   : > { %3103 = vlog2.f32 %v631_v8  ;;  %1156 = vmatpush1.msra.mxu0 %v1137_v50 }
 0x119   : > { %3105 = vlog2.f32 %v624_v11  ;;  %1157 = vmatprep.subr.mxu0 %v1136_v51 }
 0x11a   : > { %3107 = vlog2.f32 %v617_v13  ;;  %1158 = vmatpush1.msra.mxu0 %v1135_v52 }
 0x11b   : > { %1159 = vmatprep.subr.mxu0 %v1134_v53 }
 0x11c   : > { %1160 = vmatpush1.msra.mxu0 %v1133_v54 }
 0x11d   : > { %1161 = vmatprep.subr.mxu0 %v1132_v55 }
 0x11e   : > { %1162 = vmatpush1.msra.mxu0 %v1131_v56 }
 0x11f   : > { %1163 = vmatprep.subr.mxu0 %v1130_v57 }
 0x120   : > { %v3100_v16 = vpop.eup %3099  ;;  %1164 = vmatpush1.msra.mxu0 %v1129_v58 }
 0x121   : > { %v663_v20 = vmul.f32 0.6931472, %v3100_v16  ;;  %1165 = vmatprep.subr.mxu0 %v1128_v59 }
 0x122   : > { %1166 = vmatpush1.msra.mxu0 %v1127_v60 }
 0x123   : > { %1167 = vmatprep.subr.mxu0 %v1126_v61 }
 0x124   : > { %v3102_v17 = vpop.eup %3101  ;;  %1168 = vmatpush1.msra.mxu0 %v1125_v62 }
 0x125   : > { %v665_v18 = vmul.f32 0.6931472, %v3102_v17  ;;  %v3104_v19 = vpop.eup %3103 }
 0x126   : > { %v3106_v21 = vpop.eup %3105  ;;  %v661_v22 = vmul.f32 0.6931472, %v3104_v19 }
 0x127   : > { %2798 = vmatprep.subr.msk.mxu1 %vm648_vm11, %v665_v18  ;;  %v3108_v23 = vpop.eup %3107  ;;  %v659_v24 = vmul.f32 0.6931472, %v3106_v21 }
 0x128   : > { %2799 = vmatpush1.msk.msra.mxu1 %vm648_vm11, %v645_v7  ;;  %v657_v25 = vmul.f32 0.6931472, %v3108_v23  ;;  %v1117_v7 = vld [vmem:[%s4284_s6 + $0x10] sm:$0xff] }
 0x129   : > { %2800 = vmatprep.subr.msk.mxu1 %vm648_vm11, %v663_v20 }
 0x12a   : > { %2801 = vmatpush1.msk.msra.mxu1 %vm648_vm11, %v638_v63  ;;  %v1124_v63 = vld [vmem:[%s4284_s6 + $0x48] sm:$0xff] }
 0x12b   : > { %2802 = vmatprep.subr.msk.mxu1 %vm648_vm11, %v661_v22  ;;  %1169 = vmatprep.subr.mxu0 %v1124_v63 }
 0x12c   : > { %2803 = vmatpush1.msk.msra.mxu1 %vm648_vm11, %v631_v8  ;;  %1170 = vmatpush1.msra.mxu0 %v1123_v0  ;;  %v1116_v8 = vld [vmem:[%s4284_s6 + $0x8] sm:$0xff] }
 0x12d   : > { %2804 = vmatprep.subr.msk.mxu1 %vm648_vm11, %v659_v24  ;;  %1171 = vmatprep.subr.mxu0 %v1122_v1 }
 0x12e   : > { %2805 = vmatpush1.msk.msra.mxu1 %vm648_vm11, %v624_v11  ;;  %1172 = vmatpush1.msra.mxu0 %v1121_v2  ;;  %v1113_v11 = vld [vmem:[%s453_s13 + $0x8] sm:$0xff]  ;;  %s4293_s13 = smov 1e-05  }
 0x12f   : > { %2806 = vmatprep.subr.msk.mxu1 %vm648_vm11, %v657_v25  ;;  %1173 = vmatprep.subr.mxu0 %v1120_v3 }
 0x130   : > { %2807 = vmatpush1.msk.msra.mxu1 %vm648_vm11, %v617_v13  ;;  %1174 = vmatpush1.msra.mxu0 %v1119_v5  ;;  %vm1661_vm11 = vcmask 261120  }
 0x131   : > { %2808 = vmatmul.mubr.msk.f32.vlgmr.msra.gmra.mxu1 %vm689_vm12, %v671_v26  ;;  %1175 = vmatprep.subr.mxu0 %v1118_v6 }
 0x132   : > { %814 = vmatprep.mubr.f32.mxu1 %v3279_v4  ;;  %1176 = vmatpush1.msra.mxu0 %v1117_v7 }
 0x133   : > { %1177 = vmatprep.subr.mxu0 %v1116_v8 }
 0x134   : > { %1178 = vmatpush1.msra.mxu0 %v1115_v9 }
 0x135   : > { %2809 = vmatmul.mubr.msk.f32.gmra.mxu1 %vm689_vm12, %v672_v27  ;;  %1212 = vmatmul.mubr.f32.vlgmr.msra.gmra.mxu0 %v1112_v10 }
 0x136   : > { %820 = vmatprep.mubr.f32.mxu1 %v3279_v4  ;;  %1217 = vmatprep.mubr.f32.mxu0 %v3279_v4 }
 0x139   : > { %2810 = vmatmul.mubr.msk.f32.gmra.mxu1 %vm689_vm12, %v673_v28  ;;  %1218 = vmatmul.mubr.f32.gmra.mxu0 %v1113_v11 }
 0x13a   : > { %826 = vmatprep.mubr.f32.mxu1 %v3279_v4  ;;  %1223 = vmatprep.mubr.f32.mxu0 %v3279_v4 }
 0x13d   : > { %2811 = vmatmul.mubr.msk.f32.gmra.mxu1 %vm689_vm12, %v674_v29  ;;  %1224 = vmatmul.mubr.f32.gmra.mxu0 %v1114_v12 }
 0x13e   : > { %832 = vmatprep.mubr.f32.mxu1 %v3279_v4  ;;  %1391 = vmatprep.mubr.f32.mxu0 %v3279_v4 }
 0x141   : > { %2812 = vmatmul.mubr.msk.f32.gmra.mxu1 %vm689_vm12, %v675_v30 }
 0x142   : > { %838 = vmatprep.mubr.f32.mxu1 %v3279_v4 }
 0x145   : > { %2813 = vmatmul.mubr.msk.f32.gmra.mxu1 %vm689_vm12, %v676_v31 }
 0x146   : > { %844 = vmatprep.mubr.f32.mxu1 %v3279_v4 }
 0x149   : > { %2814 = vmatmul.mubr.msk.f32.gmra.mxu1 %vm689_vm12, %v677_v32 }
 0x14a   : > { %850 = vmatprep.mubr.f32.mxu1 %v3279_v4 }
 0x14d   : > { %2815 = vmatmul.mubr.msk.f32.gmra.mxu1 %vm689_vm12, %v678_v33 }
 0x14e   : > { %856 = vmatprep.mubr.f32.mxu1 %v3279_v4 }
 0x151   : > { %2816 = vmatmul.mubr.msk.f32.gmra.mxu1 %vm689_vm12, %v679_v34 }
 0x152   : > { %862 = vmatprep.mubr.f32.mxu1 %v3279_v4 }
 0x155   : > { %2817 = vmatmul.mubr.msk.f32.gmra.mxu1 %vm689_vm12, %v680_v35 }
 0x156   : > { %867 = vmatprep.mubr.f32.mxu1 %v3279_v4 }
 0x159   : > { %2818 = vmatmul.mubr.msk.f32.gmra.mxu1 %vm689_vm12, %v681_v36 }
 0x15a   : > { %872 = vmatprep.mubr.f32.mxu1 %v3279_v4 }
 0x15d   : > { %2819 = vmatmul.mubr.msk.f32.gmra.mxu1 %vm689_vm12, %v682_v37 }
 0x15e   : > { %877 = vmatprep.mubr.f32.mxu1 %v3279_v4 }
 0x161   : > { %2820 = vmatmul.mubr.msk.f32.gmra.mxu1 %vm689_vm12, %v683_v38 }
 0x162   : > { %882 = vmatprep.mubr.f32.mxu1 %v3279_v4 }
 0x165   : > { %2821 = vmatmul.mubr.msk.f32.gmra.mxu1 %vm689_vm12, %v684_v39 }
 0x166   : > { %887 = vmatprep.mubr.f32.mxu1 %v3279_v4 }
 0x169   : > { %2822 = vmatmul.mubr.msk.f32.gmra.mxu1 %vm689_vm12, %v685_v40 }
 0x16a   : > { %892 = vmatprep.mubr.f32.mxu1 %v3279_v4 }
 0x1f1   : > { %v810_v13 = vpop.f32.mrf.mxu1 }
 0x1f2   : > { %v908_v20 = vmul.f32 %v810_v13, %v810_v13 }
 0x1f3   : > { %v812_v16 = vpop.f32.mrf.mxu1 }
 0x1f4   : > { %v960_v23 = vand.u32 2147483647, %v812_v16 }
 0x1f5   : > { %v816_v17 = vpop.f32.mrf.mxu1 }
 0x1f6   : > { %v909_v18 = vmul.f32 %v816_v17, %v816_v17 }
 0x1f7   : > { %v818_v19 = vpop.f32.mrf.mxu1 }
 0x1f8   : > { %v961_v21 = vand.u32 2147483647, %v818_v19  ;;  %v911_v25 = vadd.f32 %v909_v18, %v908_v20 }
 0x1f9   : > { %v822_v22 = vpop.f32.mrf.mxu1 }
 0x1fa   : > { %v910_v24 = vmul.f32 %v822_v22, %v822_v22  ;;  %v963_v29 = vadd.f32 %v961_v21, %v960_v23 }
 0x1fb   : > { %v824_v26 = vpop.f32.mrf.mxu1 }
 0x1fc   : > { %v962_v27 = vand.u32 2147483647, %v824_v26  ;;  %v912_v28 = vadd.f32 %v911_v25, %v910_v24  ;;  %v686_v24 = vld [vmem:[%s4307_s4 + $0x78] sm:$0xff]  ;;  %v687_v25 = vld [vmem:[%s4307_s4 + $0x80] sm:$0xff]  ;;  %v688_v26 = vld [vmem:[%s4307_s4 + $0x88] sm:$0xff] }
 0x1fd   : > { %v828_v30 = vpop.f32.mrf.mxu1  ;;  %2823 = vmatmul.mubr.msk.f32.gmra.mxu1 %vm689_vm12, %v686_v24 }
 0x1fe   : > { %913 = vadd.xlane.f32.xlu0 %v912_v28  ;;  %v964_v31 = vadd.f32 %v963_v29, %v962_v27  ;;  %v976_v33 = vmul.f32 %v828_v30, %v828_v30  ;;  %897 = vmatprep.mubr.f32.mxu1 %v3279_v4 }
 0x1ff   : > { %v830_v32 = vpop.f32.mrf.mxu1 }
 0x200   : > { %965 = vadd.xlane.f32.xlu1 %v964_v31  ;;  %v1028_v35 = vand.u32 2147483647, %v830_v32 }
 0x201   : > { %v834_v34 = vpop.f32.mrf.mxu1  ;;  %2824 = vmatmul.mubr.msk.f32.gmra.mxu1 %vm689_vm12, %v687_v25  ;;  %v1278_v25 = vld [vmem:[%s4285_s7] sm:$0xff] }
 0x202   : > { %v977_v36 = vmul.f32 %v834_v34, %v834_v34  ;;  %902 = vmatprep.mubr.f32.mxu1 %v3279_v4  ;;  %v1213_v34 = vpop.f32.mrf.mxu0 }
 0x203   : > { %v836_v37 = vpop.f32.mrf.mxu1 }
 0x204   : > { %v979_v38 = vadd.f32 %v977_v36, %v976_v33  ;;  %v1029_v39 = vand.u32 2147483647, %v836_v37 }
 0x205   : > { %v840_v40 = vpop.f32.mrf.mxu1  ;;  %2825 = vmatmul.mubr.msk.f32.gmra.mxu1 %vm689_vm12, %v688_v26  ;;  %v1279_v26 = vld [vmem:[%s4285_s7 + $0x8] sm:$0xff] }
 0x206   : > { %v1031_v41 = vadd.f32 %v1029_v39, %v1028_v35  ;;  %v978_v42 = vmul.f32 %v840_v40, %v840_v40  ;;  %1753 = vmatprep.mubr.f32.mxu1 %v3279_v4  ;;  %v1215_v35 = vpop.f32.mrf.mxu0 }
 0x207   : > { %v842_v43 = vpop.f32.mrf.mxu1 }
 0x208   : > { %v1030_v44 = vand.u32 2147483647, %v842_v43  ;;  %v980_v45 = vadd.f32 %v979_v38, %v978_v42  ;;  %v1219_v36 = vpop.f32.mrf.mxu0 }
 0x209   : > { %v846_v46 = vpop.f32.mrf.mxu1  ;;  %v1231_v42 = vmul.f32 %v1219_v36, %v1219_v36 }
 0x20a   : > { %981 = vadd.xlane.f32.xlu1 %v980_v45  ;;  %v1032_v47 = vadd.f32 %v1031_v41, %v1030_v44  ;;  %v1044_v5 = vmul.f32 %v846_v46, %v846_v46  ;;  %v1221_v37 = vpop.f32.mrf.mxu0  ;;  %v1230_v45 = vmul.f32 %v1213_v34, %v1213_v34  ;;  %v1233_v46 = vmul.f32 %v1215_v35, %v1215_v35  ;;  %v1281_v35 = vld [vmem:[%s4285_s7 + $0x18] sm:$0xff] }
 0x20b   : > { %v848_v48 = vpop.f32.mrf.mxu1  ;;  %v1234_v43 = vmul.f32 %v1221_v37, %v1221_v37 }
 0x20c   : > { %v1096_v17 = vand.u32 2147483647, %v848_v48  ;;  %v1225_v38 = vpop.f32.mrf.mxu0 }
 0x20d   : > { %v852_v49 = vpop.f32.mrf.mxu1  ;;  %v1232_v40 = vmul.f32 %v1225_v38, %v1225_v38 }
 0x20e   : > { %1033 = vadd.xlane.f32.xlu1 %v1032_v47  ;;  %v1045_v6 = vmul.f32 %v852_v49, %v852_v49  ;;  %v1227_v39 = vpop.f32.mrf.mxu0  ;;  %v1237_v47 = vadd.f32 %v1234_v43, %v1231_v42  ;;  %v1236_v49 = vadd.f32 %v1233_v46, %v1230_v45  ;;  %v1283_v45 = vld [vmem:[%s4285_s7 + $0x28] sm:$0xff] }
 0x20f   : > { %v854_v50 = vpop.f32.mrf.mxu1  ;;  %v1235_v41 = vmul.f32 %v1227_v39, %v1227_v39 }
 0x210   : > { %v1047_v11 = vadd.f32 %v1045_v6, %v1044_v5  ;;  %v1097_v18 = vand.u32 2147483647, %v854_v50  ;;  %v1240_v50 = vmax.f32 %v1237_v47, 1e-05 }
 0x211   : > { %v858_v51 = vpop.f32.mrf.mxu1  ;;  %v1238_v44 = vadd.f32 %v1235_v41, %v1232_v40  ;;  %v1282_v40 = vld [vmem:[%s4285_s7 + $0x20] sm:$0xff] }
 0x212   : > { %v1046_v12 = vmul.f32 %v858_v51, %v858_v51  ;;  %v1099_v21 = vadd.f32 %v1097_v18, %v1096_v17  ;;  %vm1251_vm15 = vcmp.eq.f32.partialorder %v1240_v50, inf  ;;  %vm1253_vm0 = vcmp.eq.f32.partialorder %v1240_v50, 0.0 }
 0x213   : > { %v860_v52 = vpop.f32.mrf.mxu1  ;;  %v1241_v48 = vmax.f32 %v1238_v44, 1e-05  ;;  %v1254_v5 = vand.u32 2147483648, %v1240_v50 }
 0x214   : > { %v1048_v20 = vadd.f32 %v1047_v11, %v1046_v12  ;;  %v1098_v22 = vand.u32 2147483647, %v860_v52  ;;  %v1239_v52 = vmax.f32 %v1236_v49, 1e-05  ;;  %v1285_v49 = vld [vmem:[%s4285_s7 + $0x38] sm:$0xff] }
 0x215   : > { %v864_v53 = vpop.f32.mrf.mxu1  ;;  %3109 = vrsqrt.f32 %v1241_v48  ;;  %vm1258_vm13 = vcmp.eq.f32.partialorder %v1241_v48, inf  ;;  %vm1260_vm14 = vcmp.eq.f32.partialorder %v1241_v48, 0.0 }
 0x216   : > { %v931_v55 = vmul.f32 %v864_v53, %v864_v53  ;;  %v1100_v23 = vadd.f32 %v1099_v21, %v1098_v22  ;;  %3111 = vrsqrt.f32 %v1240_v50  ;;  %vm1244_vm3 = vcmp.eq.f32.partialorder %v1239_v52, inf }
 0x217   : > { %v866_v54 = vpop.f32.mrf.mxu1  ;;  %3113 = vrsqrt.f32 %v1239_v52  ;;  %vm1246_vm4 = vcmp.eq.f32.partialorder %v1239_v52, 0.0 }
 0x219   : > { %v869_v56 = vpop.f32.mrf.mxu1 }
 0x21a   : > { %v932_v57 = vmul.f32 %v869_v56, %v869_v56 }
 0x21b   : > { %v871_v58 = vpop.f32.mrf.mxu1 }
 0x21c   : > { %v934_v59 = vadd.f32 %v932_v57, %v931_v55 }
 0x21d   : > { %v874_v60 = vpop.f32.mrf.mxu1 }
 0x21e   : > { %v933_v61 = vmul.f32 %v874_v60, %v874_v60 }
 0x21f   : > { %v876_v62 = vpop.f32.mrf.mxu1 }
 0x220   : > { %v935_v63 = vadd.f32 %v934_v59, %v933_v61  ;;  %v1261_v61 = vand.u32 2147483648, %v1241_v48 }
 0x221   : > { %v879_v0 = vpop.f32.mrf.mxu1 }
 0x222   : > { %936 = vadd.xlane.f32.xlu0 %v935_v63  ;;  %v999_v2 = vmul.f32 %v879_v0, %v879_v0  ;;  %v3110_v57 = vpop.eup %3109 }
 0x223   : > { %v881_v1 = vpop.f32.mrf.mxu1  ;;  %v3112_v59 = vpop.eup %3111  ;;  %v1257_v60 = vmul.f32 %v3110_v57, %v1241_v48 }
 0x224   : > { %v3114_v62 = vpop.eup %3113  ;;  %v1250_v1 = vmul.f32 %v3112_v59, %v1240_v50 }
 0x225   : > { %v884_v3 = vpop.f32.mrf.mxu1  ;;  %v1259_v0 = vsel %vm1258_vm13, %v1241_v48, %v1257_v60  ;;  %v1243_v11 = vmul.f32 %v3114_v62, %v1239_v52  ;;  %v1284_v48 = vld [vmem:[%s4285_s7 + $0x30] sm:$0xff] }
 0x226   : > { %v1000_v7 = vmul.f32 %v884_v3, %v884_v3  ;;  %v1262_v3 = vsel %vm1260_vm14, %v1261_v61, %v1259_v0 }
 0x227   : > { %v886_v8 = vpop.f32.mrf.mxu1  ;;  %v1245_v17 = vsel %vm1244_vm3, %v1239_v52, %v1243_v11 }
 0x228   : > { %v1002_v9 = vadd.f32 %v1000_v7, %v999_v2  ;;  %v1252_v7 = vsel %vm1251_vm15, %v1240_v50, %v1250_v1  ;;  %v1286_v50 = vld [vmem:[%s4285_s7 + $0x40] sm:$0xff] }
 0x229   : > { %v889_v10 = vpop.f32.mrf.mxu1 }
 0x22a   : > { %v1001_v13 = vmul.f32 %v889_v10, %v889_v10 }
 0x22b   : > { %v891_v16 = vpop.f32.mrf.mxu1 }
 0x22c   : > { %v1003_v19 = vadd.f32 %v1002_v9, %v1001_v13  ;;  %v1255_v9 = vsel %vm1253_vm0, %v1254_v5, %v1252_v7  ;;  %v1247_v16 = vand.u32 2147483648, %v1239_v52 }
 0x22e   : > { %1004 = vadd.xlane.f32.xlu0 %v1003_v19  ;;  %v1248_v18 = vsel %vm1246_vm4, %v1247_v16, %v1245_v17  ;;  %vm1907_vm4 = vcmp.lt.s32.totalorder %v3455_v15, 17 }
 0x232   : > { %1049 = vadd.xlane.f32.xlu0 %v1048_v20 }
 0x236   : > { %1101 = vadd.xlane.f32.xlu0 %v1100_v23 }
 0x287   : > { %v914_v27 = vpop.xlane.xlu0 %913 }
 0x288   : > { %v915_v28 = vrot.slane %v914_v27, 4 }
 0x289   : > { %v966_v52 = vpop.xlane.xlu1 %965 }
 0x28a   : > { %v916_v29 = vadd.f32 %v915_v28, %v914_v27 }
 0x28c   : > { %v917_v30 = vrot.slane %v916_v29, 2 }
 0x28e   : > { %v918_v31 = vadd.f32 %v917_v30, %v916_v29 }
 0x290   : > { %v919_v32 = vrot.slane %v918_v31, 1 }
 0x292   : > { %v920_v33 = vadd.f32 %v919_v32, %v918_v31 }
 0x294   : > { %2926 = vpush %v920_v33  ;;  %v1280_v33 = vld [vmem:[%s4285_s7 + $0x10] sm:$0xff] }
 0x2ab   : > { %v937_v51 = vpop.xlane.xlu0 %936 }
 0x2ac   : > { %v938_v53 = vrot.slane %v937_v51, 4 }
 0x2ae   : > { %v939_v55 = vadd.f32 %v938_v53, %v937_v51  ;;  %v1287_v51 = vld [vmem:[%s4285_s7 + $0x48] sm:$0xff]  ;;  %v967_v53 = vrot.slane %v966_v52, 4 }
 0x2b0   : > { %v940_v56 = vrot.slane %v939_v55, 2 }
 0x2b2   : > { %v941_v58 = vadd.f32 %v940_v56, %v939_v55  ;;  %v968_v56 = vadd.f32 %v967_v53, %v966_v52  ;;  %v1648_v52 = vld [vmem:[%s3744_s25 + $0x20] sm:$0xff] }
 0x2b4   : > { %v942_v63 = vrot.slane %v941_v58, 1  ;;  %v969_v59 = vrot.slane %v968_v56, 2 }
 0x2b6   : > { %v943_v13 = vadd.f32 %v942_v63, %v941_v58  ;;  %v970_v61 = vadd.f32 %v969_v59, %v968_v56 }
 0x2b7   : > { %v1005_v5 = vpop.xlane.xlu0 %1004 }
 0x2b8   : > { %v971_v63 = vrot.slane %v970_v61, 1 }
 0x2bd   : > { %v894_v34 = vpop.f32.mrf.mxu1 }
 0x2be   : > { %v1067_v37 = vmul.f32 %v894_v34, %v894_v34  ;;  %v1657_v34 = vld [vmem:[%s4287_s9 + $0x20] sm:$0xff] }
 0x2bf   : > { %v896_v36 = vpop.f32.mrf.mxu1 }
 0x2c0   : > { %v1655_v36 = vld [vmem:[%s4287_s9 + $0x10] sm:$0xff] }
 0x2c1   : > { %v899_v38 = vpop.f32.mrf.mxu1 }
 0x2c2   : > { %v1068_v39 = vmul.f32 %v899_v38, %v899_v38  ;;  %v1653_v38 = vld [vmem:[%s4287_s9] sm:$0xff] }
 0x2c3   : > { %v901_v41 = vpop.f32.mrf.mxu1 }
 0x2c4   : > { %v1070_v42 = vadd.f32 %v1068_v39, %v1067_v37  ;;  %v1654_v37 = vld [vmem:[%s4287_s9 + $0x8] sm:$0xff]  ;;  %v1644_v39 = vld [vmem:[%s3744_s25] sm:$0xff] }
 0x2c5   : > { %s2927_s26 = spop %2926  ;;  %v904_v43 = vpop.f32.mrf.mxu1 }
 0x2c6   : > { %v922_v54 = vstv %s2927_s26  ;;  %v1069_v44 = vmul.f32 %v904_v43, %v904_v43 }
 0x2c7   : > { %3115 = vrsqrt.f32 %v922_v54  ;;  %vm925_vm1 = vcmp.eq.f32.partialorder %v922_v54, inf  ;;  %v928_v8 = vand.u32 2147483648, %v922_v54  ;;  %vm927_vm2 = vcmp.eq.f32.partialorder %v922_v54, 0.0  ;;  %v906_v46 = vpop.f32.mrf.mxu1 }
 0x2c8   : > { %3117 = vlog2.f32 %v1262_v3  ;;  %v1071_v47 = vadd.f32 %v1070_v42, %v1069_v44  ;;  %v1645_v44 = vld [vmem:[%s3744_s25 + $0x8] sm:$0xff] }
 0x2c9   : > { %3119 = vlog2.f32 %v1255_v9 }
 0x2ca   : > { %3121 = vlog2.f32 %v1248_v18  ;;  %1072 = vadd.xlane.f32.xlu1 %v1071_v47  ;;  %v1646_v47 = vld [vmem:[%s3744_s25 + $0x10] sm:$0xff] }
 0x2d4   : > { %v3116_v2 = vpop.eup %3115 }
 0x2d5   : > { %v924_v6 = vmul.f32 %v3116_v2, %v922_v54  ;;  %v3118_v19 = vpop.eup %3117  ;;  %v972_v2 = vadd.f32 %v971_v63, %v970_v61  ;;  %v1651_v61 = vld [vmem:[%s3744_s25 + $0x38] sm:$0xff] }
 0x2d6   : > { %v1274_v20 = vmul.f32 0.6931472, %v3118_v19  ;;  %v3120_v21 = vpop.eup %3119 }
 0x2d7   : > { %v926_v10 = vsel %vm925_vm1, %v922_v54, %v924_v6  ;;  %v1272_v22 = vmul.f32 0.6931472, %v3120_v21  ;;  %v3122_v23 = vpop.eup %3121  ;;  %v982_v54 = vpop.xlane.xlu1 %981  ;;  %v1006_v6 = vrot.slane %v1005_v5, 4  ;;  %v1660_v21 = vld [vmem:[%s4287_s9 + $0x38] sm:$0xff] }
 0x2d8   : > { %v929_v12 = vsel %vm927_vm2, %v928_v8, %v926_v10  ;;  %2826 = vmatprep.subr.msk.mxu0 %vm1263_vm5, %v1274_v20  ;;  %v1270_v24 = vmul.f32 0.6931472, %v3122_v23  ;;  %v983_v55 = vrot.slane %v982_v54, 4  ;;  %v1658_v23 = vld [vmem:[%s4287_s9 + $0x28] sm:$0xff]  ;;  %1713 = vmatprep.subr.mxu1 %v1660_v21 }
 0x2d9   : > { %2928 = vpush %v929_v12  ;;  %2827 = vmatpush1.msk.msra.mxu0 %vm1263_vm5, %v1262_v3  ;;  %v1007_v8 = vadd.f32 %v1006_v6, %v1005_v5  ;;  %v1652_v5 = vld [vmem:[%s3744_s25 + $0x40] sm:$0xff] }
 0x2da   : > { %2930 = vpush %v943_v13  ;;  %2828 = vmatprep.subr.msk.mxu0 %vm1263_vm5, %v1272_v22  ;;  %v984_v57 = vadd.f32 %v983_v55, %v982_v54  ;;  %v1659_v22 = vld [vmem:[%s4287_s9 + $0x30] sm:$0xff]  ;;  %v1649_v55 = vld [vmem:[%s3744_s25 + $0x28] sm:$0xff] }
 0x2db   : > { %2829 = vmatpush1.msk.msra.mxu0 %vm1263_vm5, %v1255_v9  ;;  %v1008_v9 = vrot.slane %v1007_v8, 2  ;;  %1714 = vmatpush1.msra.mxu1 %v1659_v22 }
 0x2dc   : > { %2830 = vmatprep.subr.msk.mxu0 %vm1263_vm5, %v1270_v24  ;;  %v985_v60 = vrot.slane %v984_v57, 2  ;;  %1715 = vmatprep.subr.mxu1 %v1658_v23 }
 0x2dd   : > { %2831 = vmatpush1.msk.msra.mxu0 %vm1263_vm5, %v1248_v18  ;;  %v1009_v10 = vadd.f32 %v1008_v9, %v1007_v8  ;;  %1716 = vmatpush1.msra.mxu1 %v1657_v34 }
 0x2de   : > { %2832 = vmatmul.mubr.msk.f32.vlgmr.msra.gmra.mxu0 %vm1290_vm6, %v1278_v25  ;;  %v986_v62 = vadd.f32 %v985_v60, %v984_v57 }
 0x2df   : > { %1397 = vmatprep.mubr.f32.mxu0 %v3279_v4  ;;  %v1010_v12 = vrot.slane %v1009_v10, 1 }
 0x2e0   : > { %v987_v0 = vrot.slane %v986_v62, 1 }
 0x2e1   : > { %v1011_v19 = vadd.f32 %v1010_v12, %v1009_v10 }
 0x2e2   : > { %2833 = vmatmul.mubr.msk.f32.gmra.mxu0 %vm1290_vm6, %v1279_v26  ;;  %v988_v3 = vadd.f32 %v987_v0, %v986_v62 }
 0x2e3   : > { %1403 = vmatprep.mubr.f32.mxu0 %v3279_v4 }
 0x2e6   : > { %2834 = vmatmul.mubr.msk.f32.gmra.mxu0 %vm1290_vm6, %v1280_v33 }
 0x2e7   : > { %1409 = vmatprep.mubr.f32.mxu0 %v3279_v4 }
 0x2ea   : > { %2835 = vmatmul.mubr.msk.f32.gmra.mxu0 %vm1290_vm6, %v1281_v35  ;;  %v1656_v35 = vld [vmem:[%s4287_s9 + $0x18] sm:$0xff] }
 0x2eb   : > { %1415 = vmatprep.mubr.f32.mxu0 %v3279_v4  ;;  %1717 = vmatprep.subr.mxu1 %v1656_v35 }
 0x2ec   : > { %1718 = vmatpush1.msra.mxu1 %v1655_v36 }
 0x2ed   : > { %1719 = vmatprep.subr.mxu1 %v1654_v37 }
 0x2ee   : > { %2836 = vmatmul.mubr.msk.f32.gmra.mxu0 %vm1290_vm6, %v1282_v40  ;;  %1720 = vmatpush1.msra.mxu1 %v1653_v38 }
 0x2ef   : > { %1421 = vmatprep.mubr.f32.mxu0 %v3279_v4  ;;  %2844 = vmatmul.mubr.msk.f32.vlgmr.msra.gmra.mxu1 %vm1661_vm11, %v1644_v39 }
 0x2f0   : > { %1759 = vmatprep.mubr.f32.mxu1 %v3279_v4 }
 0x2f2   : > { %2837 = vmatmul.mubr.msk.f32.gmra.mxu0 %vm1290_vm6, %v1283_v45 }
 0x2f3   : > { %1427 = vmatprep.mubr.f32.mxu0 %v3279_v4  ;;  %2845 = vmatmul.mubr.msk.f32.gmra.mxu1 %vm1661_vm11, %v1645_v44 }
 0x2f4   : > { %1765 = vmatprep.mubr.f32.mxu1 %v3279_v4 }
 0x2f6   : > { %2838 = vmatmul.mubr.msk.f32.gmra.mxu0 %vm1290_vm6, %v1284_v48 }
 0x2f7   : > { %1432 = vmatprep.mubr.f32.mxu0 %v3279_v4  ;;  %2846 = vmatmul.mubr.msk.f32.gmra.mxu1 %vm1661_vm11, %v1646_v47 }
 0x2f8   : > { %1771 = vmatprep.mubr.f32.mxu1 %v3279_v4 }
 0x2fa   : > { %2839 = vmatmul.mubr.msk.f32.gmra.mxu0 %vm1290_vm6, %v1285_v49  ;;  %v1647_v49 = vld [vmem:[%s3744_s25 + $0x18] sm:$0xff] }
 0x2fb   : > { %1437 = vmatprep.mubr.f32.mxu0 %v3279_v4  ;;  %2847 = vmatmul.mubr.msk.f32.gmra.mxu1 %vm1661_vm11, %v1647_v49 }
 0x2fc   : > { %1777 = vmatprep.mubr.f32.mxu1 %v3279_v4 }
 0x2fe   : > { %2840 = vmatmul.mubr.msk.f32.gmra.mxu0 %vm1290_vm6, %v1286_v50 }
 0x2ff   : > { %1442 = vmatprep.mubr.f32.mxu0 %v3279_v4  ;;  %2848 = vmatmul.mubr.msk.f32.gmra.mxu1 %vm1661_vm11, %v1648_v52 }
 0x300   : > { %1783 = vmatprep.mubr.f32.mxu1 %v3279_v4 }
 0x302   : > { %2841 = vmatmul.mubr.msk.f32.gmra.mxu0 %vm1290_vm6, %v1287_v51 }
 0x303   : > { %1447 = vmatprep.mubr.f32.mxu0 %v3279_v4  ;;  %2849 = vmatmul.mubr.msk.f32.gmra.mxu1 %vm1661_vm11, %v1649_v55 }
 0x304   : > { %1789 = vmatprep.mubr.f32.mxu1 %v3279_v4 }
 0x30a   : > { %s3682_s30 = spop %2928 }
 0x30b   : > { %s2931_s14 = spop %2930 }
 0x30c   : > { %v945_v27 = vstv %s2931_s14 }
 0x30d   : > { %3123 = vrsqrt.f32 %v945_v27  ;;  %vm948_vm7 = vcmp.eq.f32.partialorder %v945_v27, inf  ;;  %v951_v30 = vand.u32 2147483648, %v945_v27  ;;  %vm950_vm8 = vcmp.eq.f32.partialorder %v945_v27, 0.0 }
 0x31a   : > { %v3124_v28 = vpop.eup %3123 }
 0x31b   : > { %v947_v29 = vmul.f32 %v3124_v28, %v945_v27 }
 0x31d   : > { %v949_v31 = vsel %vm948_vm7, %v945_v27, %v947_v29 }
 0x31e   : > { %v952_v32 = vsel %vm950_vm8, %v951_v30, %v949_v31 }
 0x31f   : > { %2932 = vpush %v952_v32 }
 0x350   : > { %s2933_s26 = spop %2932 }
 0x351   : > { %s954_s15 = smax.f32 %s4293_s13, %s2933_s26 }
 0x352   : > { %v955_v58 = vstv %s954_s15 }
 0x353   : > { %3125 = vrcp.f32 %v955_v58  ;;  %v1650_v58 = vld [vmem:[%s3744_s25 + $0x30] sm:$0xff] }
 0x354   : > { %2850 = vmatmul.mubr.msk.f32.gmra.mxu1 %vm1661_vm11, %v1650_v58 }
 0x355   : > { %1795 = vmatprep.mubr.f32.mxu1 %v3279_v4 }
 0x358   : > { %2851 = vmatmul.mubr.msk.f32.gmra.mxu1 %vm1661_vm11, %v1651_v61 }
 0x359   : > { %1801 = vmatprep.mubr.f32.mxu1 %v3279_v4 }
 0x35c   : > { %2852 = vmatmul.mubr.msk.f32.gmra.mxu1 %vm1661_vm11, %v1652_v5 }
 0x35d   : > { %2231 = vmatprep.mubr.f32.mxu1 %v3279_v4 }
 0x360   : > { %v3126_v1 = vpop.eup %3125 }
 0x361   : > { %2934 = vpush %v3126_v1 }
 0x362   : > { %2936 = vpush %v972_v2 }
 0x363   : > { %2938 = vpush %v988_v3 }
 0x392   : > { %s3725_s19 = spop %2934 }
 0x393   : > { %s3727_s23 = spop %2936  ;;  %s958_s5 = smul.f32 %s3725_s19, %s3682_s30 }
 0x394   : > { %s2939_s14 = spop %2938  ;;  %s974_s13 = smul.f32 0.0017825312, %s3727_s23 }
 0x395   : > { %v990_v7 = vstv %s2939_s14 }
 0x396   : > { %3127 = vrsqrt.f32 %v990_v7  ;;  %vm993_vm9 = vcmp.eq.f32.partialorder %v990_v7, inf  ;;  %v996_v16 = vand.u32 2147483648, %v990_v7  ;;  %vm995_vm10 = vcmp.eq.f32.partialorder %v990_v7, 0.0 }
 0x39e   : > { %v1393_v20 = vpop.f32.mrf.mxu0 }
 0x39f   : > { %v1458_v25 = vmul.f32 %v1393_v20, %v1393_v20 }
 0x3a0   : > { %v1395_v24 = vpop.f32.mrf.mxu0 }
 0x3a1   : > { %v1506_v27 = vand.u32 2147483647, %v1395_v24 }
 0x3a2   : > { %v1399_v26 = vpop.f32.mrf.mxu0 }
 0x3a3   : > { %v3128_v11 = vpop.eup %3127  ;;  %v1459_v28 = vmul.f32 %v1399_v26, %v1399_v26  ;;  %v1034_v26 = vpop.xlane.xlu1 %1033 }
 0x3a4   : > { %v992_v13 = vmul.f32 %v3128_v11, %v990_v7  ;;  %v1401_v29 = vpop.f32.mrf.mxu0 }
 0x3a5   : > { %v1507_v30 = vand.u32 2147483647, %v1401_v29  ;;  %v1460_v31 = vadd.f32 %v1459_v28, %v1458_v25  ;;  %v1035_v28 = vrot.slane %v1034_v26, 4 }
 0x3a6   : > { %v994_v17 = vsel %vm993_vm9, %v990_v7, %v992_v13  ;;  %v1405_v45 = vpop.f32.mrf.mxu0 }
 0x3a7   : > { %v997_v18 = vsel %vm995_vm10, %v996_v16, %v994_v17  ;;  %1461 = vadd.xlane.f32.xlu1 %v1460_v31  ;;  %v1508_v32 = vadd.f32 %v1507_v30, %v1506_v27  ;;  %v1520_v0 = vmul.f32 %v1405_v45, %v1405_v45  ;;  %v1050_v27 = vpop.xlane.xlu0 %1049  ;;  %v1036_v30 = vadd.f32 %v1035_v28, %v1034_v26 }
 0x3a8   : > { %2940 = vpush %v997_v18  ;;  %v1407_v48 = vpop.f32.mrf.mxu0  ;;  %v1051_v29 = vrot.slane %v1050_v27, 4 }
 0x3a9   : > { %2942 = vpush %v1011_v19  ;;  %v1568_v8 = vand.u32 2147483647, %v1407_v48 }
 0x3aa   : > { %v1411_v50 = vpop.f32.mrf.mxu0  ;;  %v1052_v31 = vadd.f32 %v1051_v29, %v1050_v27 }
 0x3ab   : > { %1509 = vadd.xlane.f32.xlu1 %v1508_v32  ;;  %v1521_v1 = vmul.f32 %v1411_v50, %v1411_v50 }
 0x3ac   : > { %v1413_v51 = vpop.f32.mrf.mxu0  ;;  %v1053_v34 = vrot.slane %v1052_v31, 2 }
 0x3ad   : > { %v1569_v9 = vand.u32 2147483647, %v1413_v51  ;;  %v1522_v10 = vadd.f32 %v1521_v1, %v1520_v0 }
 0x3ae   : > { %v1417_v53 = vpop.f32.mrf.mxu0  ;;  %v1054_v36 = vadd.f32 %v1053_v34, %v1052_v31 }
 0x3af   : > { %v1582_v16 = vmul.f32 %v1417_v53, %v1417_v53  ;;  %v1570_v19 = vadd.f32 %v1569_v9, %v1568_v8 }
 0x3b0   : > { %v1419_v54 = vpop.f32.mrf.mxu0  ;;  %v1055_v38 = vrot.slane %v1054_v36, 1 }
 0x3b1   : > { %v1630_v22 = vand.u32 2147483647, %v1419_v54 }
 0x3b2   : > { %v1423_v56 = vpop.f32.mrf.mxu0 }
 0x3b3   : > { %v1583_v17 = vmul.f32 %v1423_v56, %v1423_v56  ;;  %v1755_v56 = vpop.f32.mrf.mxu1 }
 0x3b4   : > { %v1425_v57 = vpop.f32.mrf.mxu0 }
 0x3b5   : > { %v1631_v23 = vand.u32 2147483647, %v1425_v57  ;;  %v1584_v24 = vadd.f32 %v1583_v17, %v1582_v16  ;;  %v1808_v57 = vmul.f32 %v1755_v56, %v1755_v56  ;;  %v1757_v58 = vpop.f32.mrf.mxu1  ;;  %v1288_v17 = vld [vmem:[%s4285_s7 + $0x50] sm:$0xff] }
 0x3b6   : > { %v1429_v59 = vpop.f32.mrf.mxu0  ;;  %2842 = vmatmul.mubr.msk.f32.gmra.mxu0 %vm1290_vm6, %v1288_v17 }
 0x3b7   : > { %v1479_v62 = vmul.f32 %v1429_v59, %v1429_v59  ;;  %v1632_v25 = vadd.f32 %v1631_v23, %v1630_v22  ;;  %v1817_v59 = vmul.f32 %v1757_v58, %v1757_v58  ;;  %1452 = vmatprep.mubr.f32.mxu0 %v3279_v4 }
 0x3b8   : > { %v1431_v60 = vpop.f32.mrf.mxu0 }
 0x3b9   : > { %v1761_v60 = vpop.f32.mrf.mxu1  ;;  %v3799_v61 = vadd.f32 %v1817_v59, %v1808_v57 }
 0x3ba   : > { %v1434_v63 = vpop.f32.mrf.mxu0 }
 0x3bb   : > { %v1480_v2 = vmul.f32 %v1434_v63, %v1434_v63 }
 0x3bc   : > { %v1436_v3 = vpop.f32.mrf.mxu0 }
 0x3bd   : > { %v1481_v6 = vadd.f32 %v1480_v2, %v1479_v62  ;;  %v1763_v62 = vpop.f32.mrf.mxu1 }
 0x3be   : > { %v1439_v7 = vpop.f32.mrf.mxu0 }
 0x3bf   : > { %1482 = vadd.xlane.f32.xlu0 %v1481_v6  ;;  %v1541_v12 = vmul.f32 %v1439_v7, %v1439_v7  ;;  %v1767_v63 = vpop.f32.mrf.mxu1 }
 0x3c0   : > { %v1441_v11 = vpop.f32.mrf.mxu0 }
 0x3c1   : > { %v1769_v0 = vpop.f32.mrf.mxu1 }
 0x3c2   : > { %v1444_v13 = vpop.f32.mrf.mxu0 }
 0x3c3   : > { %v1542_v18 = vmul.f32 %v1444_v13, %v1444_v13  ;;  %1523 = vadd.xlane.f32.xlu0 %v1522_v10  ;;  %v1773_v2 = vpop.f32.mrf.mxu1 }
 0x3c4   : > { %v1446_v20 = vpop.f32.mrf.mxu0 }
 0x3c5   : > { %v1543_v21 = vadd.f32 %v1542_v18, %v1541_v12  ;;  %v1775_v6 = vpop.f32.mrf.mxu1 }
 0x3c7   : > { %1571 = vadd.xlane.f32.xlu0 %v1570_v19  ;;  %1544 = vadd.xlane.f32.xlu1 %v1543_v21  ;;  %v1779_v9 = vpop.f32.mrf.mxu1 }
 0x3c9   : > { %v1781_v10 = vpop.f32.mrf.mxu1 }
 0x3cb   : > { %1585 = vadd.xlane.f32.xlu1 %v1584_v24  ;;  %v1785_v11 = vpop.f32.mrf.mxu1 }
 0x3cd   : > { %v1787_v12 = vpop.f32.mrf.mxu1 }
 0x3ce   : > { %v1822_v31 = vmul.f32 %v1787_v12, %v1787_v12 }
 0x3cf   : > { %1633 = vadd.xlane.f32.xlu1 %v1632_v25 }
 0x3d9   : > { %s3738_s15 = spop %2940 }
 0x3da   : > { %s2943_s14 = spop %2942 }
 0x3db   : > { %v1013_v33 = vstv %s2943_s14 }
 0x3dc   : > { %3129 = vrsqrt.f32 %v1013_v33  ;;  %vm1016_vm12 = vcmp.eq.f32.partialorder %v1013_v33, inf  ;;  %v1019_v42 = vand.u32 2147483648, %v1013_v33  ;;  %vm1018_vm13 = vcmp.eq.f32.partialorder %v1013_v33, 0.0 }
 0x3e9   : > { %v3130_v40 = vpop.eup %3129 }
 0x3ea   : > { %v1015_v41 = vmul.f32 %v3130_v40, %v1013_v33 }
 0x3ec   : > { %v1017_v43 = vsel %vm1016_vm12, %v1013_v33, %v1015_v41  ;;  %v1037_v33 = vrot.slane %v1036_v30, 2  ;;  %v1056_v41 = vadd.f32 %v1055_v38, %v1054_v36  ;;  %v1810_v36 = vmul.f32 %v1767_v63, %v1767_v63 }
 0x3ed   : > { %v1020_v46 = vsel %vm1018_vm13, %v1019_v42, %v1017_v43  ;;  %v1073_v42 = vpop.xlane.xlu1 %1072 }
 0x3ee   : > { %2944 = vpush %v1020_v46  ;;  %v1038_v35 = vadd.f32 %v1037_v33, %v1036_v30  ;;  %v1074_v43 = vrot.slane %v1073_v42, 4  ;;  %v1813_v30 = vmul.f32 %v1785_v11, %v1785_v11  ;;  %v1821_v33 = vmul.f32 %v1781_v10, %v1781_v10 }
 0x3f0   : > { %v1039_v37 = vrot.slane %v1038_v35, 1  ;;  %v1075_v45 = vadd.f32 %v1074_v43, %v1073_v42  ;;  %v1811_v43 = vmul.f32 %v1773_v2, %v1773_v2 }
 0x3f2   : > { %v1040_v40 = vadd.f32 %v1039_v37, %v1038_v35  ;;  %v1076_v46 = vrot.slane %v1075_v45, 2  ;;  %v1102_v35 = vpop.xlane.xlu0 %1101 }
 0x3f4   : > { %v1077_v47 = vadd.f32 %v1076_v46, %v1075_v45  ;;  %v1831_v45 = vadd.f32 %v1822_v31, %v1813_v30  ;;  %v1103_v46 = vrot.slane %v1102_v35, 4 }
 0x3f6   : > { %v1078_v49 = vrot.slane %v1077_v47, 1  ;;  %v3810_v57 = vmax.f32 %v1831_v45, 1e-05  ;;  %v1104_v58 = vadd.f32 %v1103_v46, %v1102_v35 }
 0x3f8   : > { %v1079_v54 = vadd.f32 %v1078_v49, %v1077_v47  ;;  %vm1881_vm10 = vcmp.eq.f32.partialorder %v3810_v57, inf  ;;  %vm1883_vm11 = vcmp.eq.f32.partialorder %v3810_v57, 0.0  ;;  %v1884_v31 = vand.u32 2147483648, %v3810_v57 }
 0x414   : > { %v1791_v13 = vpop.f32.mrf.mxu1 }
 0x415   : > { %v1814_v28 = vmul.f32 %v1791_v13, %v1791_v13 }
 0x416   : > { %v1793_v16 = vpop.f32.mrf.mxu1 }
 0x417   : > { %v1823_v29 = vmul.f32 %v1793_v16, %v1793_v16 }
 0x418   : > { %v1797_v18 = vpop.f32.mrf.mxu1 }
 0x419   : > { %v1815_v26 = vmul.f32 %v1797_v18, %v1797_v18 }
 0x41a   : > { %v1799_v19 = vpop.f32.mrf.mxu1 }
 0x41b   : > { %v1824_v27 = vmul.f32 %v1799_v19, %v1799_v19  ;;  %v1289_v19 = vld [vmem:[%s4285_s7 + $0x58] sm:$0xff] }
 0x41c   : > { %v1803_v20 = vpop.f32.mrf.mxu1  ;;  %2843 = vmatmul.mubr.msk.f32.gmra.mxu0 %vm1290_vm6, %v1289_v19 }
 0x41d   : > { %v1816_v21 = vmul.f32 %v1803_v20, %v1803_v20  ;;  %v1833_v37 = vadd.f32 %v1824_v27, %v1815_v26  ;;  %2131 = vmatprep.mubr.f32.mxu0 %v3279_v4 }
 0x41e   : > { %v1805_v22 = vpop.f32.mrf.mxu1 }
 0x41f   : > { %s2945_s2 = spop %2944  ;;  %v1825_v23 = vmul.f32 %v1805_v22, %v1805_v22 }
 0x420   : > { %s1022_s4 = smax.f32 %s4309_s3, %s2945_s2 }
 0x421   : > { %v1023_v32 = vstv %s1022_s4  ;;  %v1834_v24 = vadd.f32 %v1825_v23, %v1816_v21 }
 0x422   : > { %3131 = vrcp.f32 %v1023_v32  ;;  %v1812_v32 = vmul.f32 %v1779_v9, %v1779_v9 }
 0x423   : > { %v1843_v25 = vmax.f32 %v1834_v24, 1e-05 }
 0x425   : > { %vm1902_vm2 = vcmp.eq.f32.partialorder %v1843_v25, inf  ;;  %v1905_v38 = vand.u32 2147483648, %v1843_v25  ;;  %vm1904_vm3 = vcmp.eq.f32.partialorder %v1843_v25, 0.0 }
 0x42f   : > { %v3132_v39 = vpop.eup %3131 }
 0x430   : > { %2946 = vpush %v3132_v39  ;;  %v1819_v39 = vmul.f32 %v1769_v0, %v1769_v0  ;;  %v1462_v42 = vpop.xlane.xlu1 %1461 }
 0x431   : > { %2948 = vpush %v1040_v40  ;;  %v1832_v40 = vadd.f32 %v1823_v29, %v1814_v28  ;;  %v1463_v47 = vrot.slane %v1462_v42, 4 }
 0x432   : > { %2950 = vpush %v1056_v41 }
 0x433   : > { %v1464_v59 = vadd.f32 %v1463_v47, %v1462_v42 }
 0x435   : > { %v1465_v2 = vrot.slane %v1464_v59, 2 }
 0x461   : > { %s2947_s24 = spop %2946 }
 0x462   : > { %s1026_s25 = smul.f32 %s2947_s24, %s3738_s15  ;;  %s2949_s29 = spop %2948 }
 0x463   : > { %s1042_s26 = smul.f32 0.0017825312, %s2949_s29  ;;  %s2951_s14 = spop %2950 }
 0x464   : > { %s3793_s16 = sadd.f32 %s1026_s25, %s958_s5  ;;  %v1058_v44 = vstv %s2951_s14 }
 0x465   : > { %s3795_s22 = sadd.f32 %s1042_s26, %s974_s13  ;;  %3133 = vrsqrt.f32 %v1058_v44  ;;  %vm1061_vm14 = vcmp.eq.f32.partialorder %v1058_v44, inf  ;;  %v1064_v51 = vand.u32 2147483648, %v1058_v44  ;;  %vm1063_vm15 = vcmp.eq.f32.partialorder %v1058_v44, 0.0 }
 0x472   : > { %v3134_v48 = vpop.eup %3133 }
 0x473   : > { %v1060_v50 = vmul.f32 %v3134_v48, %v1058_v44  ;;  %v1830_v48 = vadd.f32 %v1821_v33, %v1812_v32 }
 0x475   : > { %v1062_v52 = vsel %vm1061_vm14, %v1058_v44, %v1060_v50  ;;  %v1820_v44 = vmul.f32 %v1775_v6, %v1775_v6  ;;  %v1809_v50 = vmul.f32 %v1761_v60, %v1761_v60  ;;  %v3812_v63 = vmax.f32 %v1830_v48, 1e-05 }
 0x476   : > { %v1065_v53 = vsel %vm1063_vm15, %v1064_v51, %v1062_v52  ;;  %v3806_v51 = vmax.f32 %v1833_v37, 1e-05 }
 0x477   : > { %2952 = vpush %v1065_v53  ;;  %v1818_v53 = vmul.f32 %v1763_v62, %v1763_v62  ;;  %v1829_v56 = vadd.f32 %v1820_v44, %v1811_v43  ;;  %v1105_v62 = vrot.slane %v1104_v58, 2  ;;  %vm1874_vm6 = vcmp.eq.f32.partialorder %v3812_v63, inf }
 0x478   : > { %2954 = vpush %v1079_v54  ;;  %v1828_v54 = vadd.f32 %v1819_v39, %v1810_v36  ;;  %vm1895_vm5 = vcmp.eq.f32.partialorder %v3806_v51, inf  ;;  %vm1897_vm7 = vcmp.eq.f32.partialorder %v3806_v51, 0.0  ;;  %v1898_v22 = vand.u32 2147483648, %v3806_v51 }
 0x479   : > { %v1827_v0 = vadd.f32 %v1818_v53, %v1809_v50  ;;  %v3818_v60 = vmax.f32 %v1829_v56, 1e-05  ;;  %v1106_v6 = vadd.f32 %v1105_v62, %v1104_v58  ;;  %vm1876_vm12 = vcmp.eq.f32.partialorder %v3812_v63, 0.0 }
 0x47a   : > { %v1877_v39 = vand.u32 2147483648, %v3812_v63 }
 0x47b   : > { %v1107_v10 = vrot.slane %v1106_v6, 1  ;;  %vm1867_vm13 = vcmp.eq.f32.partialorder %v3818_v60, inf  ;;  %vm1869_vm14 = vcmp.eq.f32.partialorder %v3818_v60, 0.0 }
 0x47d   : > { %v1108_v17 = vadd.f32 %v1107_v10, %v1106_v6 }
 0x4a8   : > { %s3797_s30 = spop %2952 }
 0x4a9   : > { %s2955_s19 = spop %2954 }
 0x4aa   : > { %v1081_v55 = vstv %s2955_s19 }
 0x4ab   : > { %3135 = vrsqrt.f32 %v1081_v55  ;;  %vm1084_vm0 = vcmp.eq.f32.partialorder %v1081_v55, inf  ;;  %v1087_v5 = vand.u32 2147483648, %v1081_v55  ;;  %vm1086_vm1 = vcmp.eq.f32.partialorder %v1081_v55, 0.0 }
 0x4ac   : > { %3137 = vrsqrt.f32 %v1843_v25 }
 0x4b8   : > { %v3136_v1 = vpop.eup %3135 }
 0x4b9   : > { %v1083_v3 = vmul.f32 %v3136_v1, %v1081_v55  ;;  %v3138_v34 = vpop.eup %3137  ;;  %v3815_v1 = vmax.f32 %v1828_v54, 1e-05 }
 0x4ba   : > { %v1901_v41 = vmul.f32 %v3138_v34, %v1843_v25 }
 0x4bb   : > { %v1085_v7 = vsel %vm1084_vm0, %v1081_v55, %v1083_v3  ;;  %v3808_v55 = vmax.f32 %v1832_v40, 1e-05  ;;  %v3823_v3 = vmax.f32 %v1827_v0, 1e-05  ;;  %vm1860_vm15 = vcmp.eq.f32.partialorder %v3815_v1, inf }
 0x4bc   : > { %v1088_v8 = vsel %vm1086_vm1, %v1087_v5, %v1085_v7  ;;  %v1903_v49 = vsel %vm1902_vm2, %v1843_v25, %v1901_v41  ;;  %v1466_v7 = vadd.f32 %v1465_v2, %v1464_v59  ;;  %v1870_v41 = vand.u32 2147483648, %v3818_v60 }
 0x4bd   : > { %2956 = vpush %v1088_v8  ;;  %v1906_v52 = vsel %vm1904_vm3, %v1905_v38, %v1903_v49  ;;  %v3828_v8 = vmax.f32 %v3799_v61, 1e-05  ;;  %vm1888_vm8 = vcmp.eq.f32.partialorder %v3808_v55, inf  ;;  %vm1890_vm9 = vcmp.eq.f32.partialorder %v3808_v55, 0.0 }
 0x4be   : > { %3139 = vlog2.f32 %v1906_v52  ;;  %v1467_v11 = vrot.slane %v1466_v7, 1  ;;  %v1891_v24 = vand.u32 2147483648, %v3808_v55  ;;  %vm1862_vm0 = vcmp.eq.f32.partialorder %v3815_v1, 0.0 }
 0x4bf   : > { %3141 = vrsqrt.f32 %v3806_v51  ;;  %v1863_v46 = vand.u32 2147483648, %v3815_v1  ;;  %vm1853_vm1 = vcmp.eq.f32.partialorder %v3823_v3, inf  ;;  %vm1855_vm2 = vcmp.eq.f32.partialorder %v3823_v3, 0.0 }
 0x4c0   : > { %3143 = vrsqrt.f32 %v3808_v55  ;;  %v1468_v18 = vadd.f32 %v1467_v11, %v1466_v7  ;;  %vm1846_vm3 = vcmp.eq.f32.partialorder %v3828_v8, inf  ;;  %v1849_v54 = vand.u32 2147483648, %v3828_v8 }
 0x4c1   : > { %3145 = vrsqrt.f32 %v3810_v57 }
 0x4c2   : > { %3147 = vrsqrt.f32 %v3812_v63 }
 0x4c3   : > { %3149 = vrsqrt.f32 %v3815_v1 }
 0x4c4   : > { %3151 = vrsqrt.f32 %v3818_v60 }
 0x4cb   : > { %v3140_v9 = vpop.eup %3139 }
 0x4cc   : > { %v1936_v12 = vmul.f32 0.6931472, %v3140_v9  ;;  %v3142_v13 = vpop.eup %3141 }
 0x4cd   : > { %v3144_v16 = vpop.eup %3143  ;;  %v1894_v21 = vmul.f32 %v3142_v13, %v3806_v51 }
 0x4ce   : > { %2853 = vmatprep.subr.msk.mxu0 %vm1907_vm4, %v1936_v12  ;;  %2905 = vmatprep.subr.msk.mxu1 %vm1907_vm4, %v1936_v12  ;;  %v3146_v61 = vpop.eup %3145  ;;  %v1887_v23 = vmul.f32 %v3144_v16, %v3808_v55  ;;  %v1483_v12 = vpop.xlane.xlu0 %1482 }
 0x4cf   : > { %2854 = vmatpush1.msk.msra.mxu0 %vm1907_vm4, %v1906_v52  ;;  %2914 = vmatpush1.msk.msra.mxu1 %vm1907_vm4, %v1906_v52  ;;  %v3148_v20 = vpop.eup %3147  ;;  %v1896_v26 = vsel %vm1895_vm5, %v3806_v51, %v1894_v21  ;;  %v1880_v27 = vmul.f32 %v3146_v61, %v3810_v57  ;;  %v1856_v52 = vand.u32 2147483648, %v3823_v3  ;;  %vm1848_vm5 = vcmp.eq.f32.partialorder %v3828_v8, 0.0 }
 0x4d0   : > { %v3150_v25 = vpop.eup %3149  ;;  %v1899_v29 = vsel %vm1897_vm7, %v1898_v22, %v1896_v26  ;;  %v1889_v30 = vsel %vm1888_vm8, %v3808_v55, %v1887_v23  ;;  %v1873_v32 = vmul.f32 %v3148_v20, %v3812_v63  ;;  %v1484_v13 = vrot.slane %v1483_v12, 4  ;;  %v1947_v26 = vld [vmem:[%s4288_s10 + $0x8] sm:$0xff] }
 0x4d1   : > { %v3152_v28 = vpop.eup %3151  ;;  %v1892_v34 = vsel %vm1890_vm9, %v1891_v24, %v1889_v30  ;;  %v1882_v35 = vsel %vm1881_vm10, %v3810_v57, %v1880_v27  ;;  %v1859_v42 = vmul.f32 %v3150_v25, %v3815_v1  ;;  %v1946_v25 = vld [vmem:[%s4288_s10] sm:$0xff]  ;;  %vm1976_vm8 = vcmask 588800   ;;  %v1948_v27 = vld [vmem:[%s4288_s10 + $0x10] sm:$0xff]  ;;  %v1951_v30 = vld [vmem:[%s4288_s10 + $0x28] sm:$0xff] }
 0x4d2   : > { %v1885_v36 = vsel %vm1883_vm11, %v1884_v31, %v1882_v35  ;;  %v1875_v37 = vsel %vm1874_vm6, %v3812_v63, %v1873_v32  ;;  %v1866_v40 = vmul.f32 %v3152_v28, %v3818_v60  ;;  %v1485_v61 = vadd.f32 %v1484_v13, %v1483_v12  ;;  %v1949_v28 = vld [vmem:[%s4288_s10 + $0x18] sm:$0xff]  ;;  %v1952_v31 = vld [vmem:[%s4288_s10 + $0x30] sm:$0xff] }
 0x4d3   : > { %v1878_v44 = vsel %vm1876_vm12, %v1877_v39, %v1875_v37  ;;  %v1861_v48 = vsel %vm1860_vm15, %v3815_v1, %v1859_v42  ;;  %v1953_v32 = vld [vmem:[%s4288_s10 + $0x38] sm:$0xff]  ;;  %v1956_v35 = vld [vmem:[%s4288_s10 + $0x50] sm:$0xff]  ;;  %v1959_v39 = vld [vmem:[%s4288_s10 + $0x68] sm:$0xff] }
 0x4d4   : > { %v1868_v45 = vsel %vm1867_vm13, %v3818_v60, %v1866_v40  ;;  %v1864_v50 = vsel %vm1862_vm0, %v1863_v46, %v1861_v48  ;;  %v1957_v37 = vld [vmem:[%s4288_s10 + $0x58] sm:$0xff]  ;;  %v1963_v40 = vld [vmem:[%s4288_s10 + $0x88] sm:$0xff] }
 0x4d5   : > { %v1871_v47 = vsel %vm1869_vm14, %v1870_v41, %v1868_v45  ;;  %v1964_v41 = vld [vmem:[%s4288_s10 + $0x90] sm:$0xff]  ;;  %v1961_v48 = vld [vmem:[%s4288_s10 + $0x78] sm:$0xff] }
 0x4ee   : > { %s2957_s2 = spop %2956 }
 0x4ef   : > { %s1090_s4 = smax.f32 %s4309_s3, %s2957_s2 }
 0x4f0   : > { %v1091_v5 = vstv %s1090_s4 }
 0x4f1   : > { %3153 = vrcp.f32 %v1091_v5 }
 0x4f2   : > { %3155 = vrsqrt.f32 %v3823_v3 }
 0x4f3   : > { %3157 = vrsqrt.f32 %v3828_v8 }
 0x4f4   : > { %3159 = vlog2.f32 %v1899_v29 }
 0x4f5   : > { %3161 = vlog2.f32 %v1892_v34 }
 0x4f6   : > { %3163 = vlog2.f32 %v1885_v36 }
 0x4f7   : > { %3165 = vlog2.f32 %v1878_v44 }
 0x4f8   : > { %3167 = vlog2.f32 %v1871_v47 }
 0x4f9   : > { %3169 = vlog2.f32 %v1864_v50 }
 0x4fe   : > { %v3154_v33 = vpop.eup %3153 }
 0x4ff   : > { %2958 = vpush %v3154_v33  ;;  %v3156_v38 = vpop.eup %3155  ;;  %v1954_v33 = vld [vmem:[%s4288_s10 + $0x40] sm:$0xff] }
 0x500   : > { %2960 = vpush %v1108_v17  ;;  %v3158_v43 = vpop.eup %3157  ;;  %v1852_v49 = vmul.f32 %v3156_v38, %v3823_v3  ;;  %v1486_v17 = vrot.slane %v1485_v61, 2  ;;  %v1958_v38 = vld [vmem:[%s4288_s10 + $0x60] sm:$0xff] }
 0x501   : > { %2962 = vpush %v1468_v18  ;;  %v1845_v53 = vmul.f32 %v3158_v43, %v3828_v8  ;;  %v3160_v58 = vpop.eup %3159  ;;  %v1960_v43 = vld [vmem:[%s4288_s10 + $0x70] sm:$0xff] }
 0x502   : > { %v1854_v51 = vsel %vm1853_vm1, %v3823_v3, %v1852_v49  ;;  %v3162_v59 = vpop.eup %3161  ;;  %v1934_v63 = vmul.f32 0.6931472, %v3160_v58  ;;  %v1487_v18 = vadd.f32 %v1486_v17, %v1485_v61  ;;  %v1962_v49 = vld [vmem:[%s4288_s10 + $0x80] sm:$0xff]  ;;  %v1510_v58 = vpop.xlane.xlu1 %1509 }
 0x503   : > { %v1857_v55 = vsel %vm1855_vm2, %v1856_v52, %v1854_v51  ;;  %v1847_v56 = vsel %vm1846_vm3, %v3828_v8, %v1845_v53  ;;  %v3164_v0 = vpop.eup %3163  ;;  %v1932_v1 = vmul.f32 0.6931472, %v3162_v59  ;;  %v1449_v51 = vpop.f32.mrf.mxu0  ;;  %v1966_v52 = vld [vmem:[%s4288_s10 + $0xa0] sm:$0xff]  ;;  %v1511_v59 = vrot.slane %v1510_v58, 4 }
 0x504   : > { %3171 = vlog2.f32 %v1857_v55  ;;  %v1850_v57 = vsel %vm1848_vm5, %v1849_v54, %v1847_v56  ;;  %2855 = vmatprep.subr.msk.mxu0 %vm1907_vm4, %v1934_v63  ;;  %2906 = vmatprep.subr.msk.mxu1 %vm1907_vm4, %v1934_v63  ;;  %v1930_v60 = vmul.f32 0.6931472, %v3164_v0  ;;  %v3166_v62 = vpop.eup %3165  ;;  %v1488_v20 = vrot.slane %v1487_v18, 1  ;;  %v1967_v54 = vld [vmem:[%s4288_s10 + $0xa8] sm:$0xff]  ;;  %v1969_v56 = vld [vmem:[%s4288_s10 + $0xb8] sm:$0xff]  ;;  %v1524_v63 = vpop.xlane.xlu0 %1523 }
 0x505   : > { %3173 = vlog2.f32 %v1850_v57  ;;  %2856 = vmatpush1.msk.msra.mxu0 %vm1907_vm4, %v1899_v29  ;;  %2915 = vmatpush1.msk.msra.mxu1 %vm1907_vm4, %v1899_v29  ;;  %v3168_v2 = vpop.eup %3167  ;;  %v1928_v3 = vmul.f32 0.6931472, %v3166_v62  ;;  %v1950_v29 = vld [vmem:[%s4288_s10 + $0x20] sm:$0xff]  ;;  %v1451_v53 = vpop.f32.mrf.mxu0  ;;  %v1603_v0 = vmul.f32 %v1449_v51, %v1449_v51 }
 0x506   : > { %2857 = vmatprep.subr.msk.mxu0 %vm1907_vm4, %v1932_v1  ;;  %2907 = vmatprep.subr.msk.mxu1 %vm1907_vm4, %v1932_v1  ;;  %v3170_v5 = vpop.eup %3169  ;;  %v1926_v6 = vmul.f32 0.6931472, %v3168_v2  ;;  %v1489_v24 = vadd.f32 %v1488_v20, %v1487_v18  ;;  %v1525_v1 = vrot.slane %v1524_v63, 4  ;;  %v1545_v18 = vpop.xlane.xlu1 %1544 }
 0x507   : > { %2858 = vmatpush1.msk.msra.mxu0 %vm1907_vm4, %v1892_v34  ;;  %2916 = vmatpush1.msk.msra.mxu1 %vm1907_vm4, %v1892_v34  ;;  %v1924_v7 = vmul.f32 0.6931472, %v3170_v5  ;;  %v1955_v34 = vld [vmem:[%s4288_s10 + $0x48] sm:$0xff] }
 0x508   : > { %2859 = vmatprep.subr.msk.mxu0 %vm1907_vm4, %v1930_v60  ;;  %2908 = vmatprep.subr.msk.mxu1 %vm1907_vm4, %v1930_v60  ;;  %v1454_v60 = vpop.f32.mrf.mxu0 }
 0x509   : > { %2860 = vmatpush1.msk.msra.mxu0 %vm1907_vm4, %v1885_v36  ;;  %2917 = vmatpush1.msk.msra.mxu1 %vm1907_vm4, %v1885_v36  ;;  %v1604_v62 = vmul.f32 %v1454_v60, %v1454_v60 }
 0x50a   : > { %2861 = vmatprep.subr.msk.mxu0 %vm1907_vm4, %v1928_v3  ;;  %2909 = vmatprep.subr.msk.mxu1 %vm1907_vm4, %v1928_v3  ;;  %v1456_v2 = vpop.f32.mrf.mxu0  ;;  %v1512_v3 = vadd.f32 %v1511_v59, %v1510_v58 }
 0x50b   : > { %2862 = vmatpush1.msk.msra.mxu0 %vm1907_vm4, %v1878_v44  ;;  %2918 = vmatpush1.msk.msra.mxu1 %vm1907_vm4, %v1878_v44  ;;  %v1605_v5 = vadd.f32 %v1604_v62, %v1603_v0 }
 0x50c   : > { %2863 = vmatprep.subr.msk.mxu0 %vm1907_vm4, %v1926_v6  ;;  %2910 = vmatprep.subr.msk.mxu1 %vm1907_vm4, %v1926_v6  ;;  %v1526_v6 = vadd.f32 %v1525_v1, %v1524_v63 }
 0x50d   : > { %2864 = vmatpush1.msk.msra.mxu0 %vm1907_vm4, %v1871_v47  ;;  %2919 = vmatpush1.msk.msra.mxu1 %vm1907_vm4, %v1871_v47 }
 0x50e   : > { %2865 = vmatprep.subr.msk.mxu0 %vm1907_vm4, %v1924_v7  ;;  %2911 = vmatprep.subr.msk.mxu1 %vm1907_vm4, %v1924_v7 }
 0x50f   : > { %2866 = vmatpush1.msk.msra.mxu0 %vm1907_vm4, %v1864_v50  ;;  %2920 = vmatpush1.msk.msra.mxu1 %vm1907_vm4, %v1864_v50  ;;  %v1965_v50 = vld [vmem:[%s4288_s10 + $0x98] sm:$0xff] }
 0x510   : > { %1606 = vadd.xlane.f32.xlu0 %v1605_v5 }
 0x511   : > { %v3172_v8 = vpop.eup %3171 }
 0x512   : > { %v3174_v9 = vpop.eup %3173  ;;  %v1922_v10 = vmul.f32 0.6931472, %v3172_v8  ;;  %v1513_v8 = vrot.slane %v1512_v3, 2 }
 0x513   : > { %v1920_v11 = vmul.f32 0.6931472, %v3174_v9  ;;  %v1527_v9 = vrot.slane %v1526_v6, 2 }
 0x514   : > { %2867 = vmatprep.subr.msk.mxu0 %vm1907_vm4, %v1922_v10  ;;  %2912 = vmatprep.subr.msk.mxu1 %vm1907_vm4, %v1922_v10  ;;  %v1514_v10 = vadd.f32 %v1513_v8, %v1512_v3 }
 0x515   : > { %2868 = vmatpush1.msk.msra.mxu0 %vm1907_vm4, %v1857_v55  ;;  %2921 = vmatpush1.msk.msra.mxu1 %vm1907_vm4, %v1857_v55  ;;  %v1968_v55 = vld [vmem:[%s4288_s10 + $0xb0] sm:$0xff] }
 0x516   : > { %2869 = vmatprep.subr.msk.mxu0 %vm1907_vm4, %v1920_v11  ;;  %2913 = vmatprep.subr.msk.mxu1 %vm1907_vm4, %v1920_v11  ;;  %v1528_v11 = vadd.f32 %v1527_v9, %v1526_v6  ;;  %v1515_v12 = vrot.slane %v1514_v10, 1 }
 0x517   : > { %2870 = vmatpush1.msk.msra.mxu0 %vm1907_vm4, %v1850_v57  ;;  %2922 = vmatpush1.msk.msra.mxu1 %vm1907_vm4, %v1850_v57  ;;  %v1970_v57 = vld [vmem:[%s4288_s10 + $0xc0] sm:$0xff] }
 0x518   : > { %2871 = vmatmul.mubr.msk.f32.vlgmr.msra.gmra.mxu0 %vm1976_vm8, %v1946_v25  ;;  %2888 = vmatmul.mubr.msk.f32.vlgmr.msra.gmra.mxu1 %vm1976_vm8, %v1963_v40  ;;  %v1529_v13 = vrot.slane %v1528_v11, 1  ;;  %v1516_v61 = vadd.f32 %v1515_v12, %v1514_v10 }
 0x519   : > { %2137 = vmatprep.mubr.f32.mxu0 %v3279_v4  ;;  %2236 = vmatprep.mubr.f32.mxu1 %v3279_v4 }
 0x51a   : > { %v1530_v17 = vadd.f32 %v1529_v13, %v1528_v11 }
 0x51c   : > { %2872 = vmatmul.mubr.msk.f32.gmra.mxu0 %vm1976_vm8, %v1947_v26  ;;  %2889 = vmatmul.mubr.msk.f32.gmra.mxu1 %vm1976_vm8, %v1964_v41 }
 0x51d   : > { %2143 = vmatprep.mubr.f32.mxu0 %v3279_v4  ;;  %2241 = vmatprep.mubr.f32.mxu1 %v3279_v4 }
 0x520   : > { %2873 = vmatmul.mubr.msk.f32.gmra.mxu0 %vm1976_vm8, %v1948_v27  ;;  %2890 = vmatmul.mubr.msk.f32.gmra.mxu1 %vm1976_vm8, %v1965_v50 }
 0x521   : > { %2149 = vmatprep.mubr.f32.mxu0 %v3279_v4  ;;  %2246 = vmatprep.mubr.f32.mxu1 %v3279_v4 }
 0x524   : > { %2874 = vmatmul.mubr.msk.f32.gmra.mxu0 %vm1976_vm8, %v1949_v28  ;;  %2891 = vmatmul.mubr.msk.f32.gmra.mxu1 %vm1976_vm8, %v1966_v52 }
 0x525   : > { %2155 = vmatprep.mubr.f32.mxu0 %v3279_v4  ;;  %2251 = vmatprep.mubr.f32.mxu1 %v3279_v4 }
 0x528   : > { %2875 = vmatmul.mubr.msk.f32.gmra.mxu0 %vm1976_vm8, %v1950_v29  ;;  %2892 = vmatmul.mubr.msk.f32.gmra.mxu1 %vm1976_vm8, %v1967_v54 }
 0x529   : > { %2161 = vmatprep.mubr.f32.mxu0 %v3279_v4  ;;  %2256 = vmatprep.mubr.f32.mxu1 %v3279_v4 }
 0x52c   : > { %2876 = vmatmul.mubr.msk.f32.gmra.mxu0 %vm1976_vm8, %v1951_v30  ;;  %2893 = vmatmul.mubr.msk.f32.gmra.mxu1 %vm1976_vm8, %v1968_v55 }
 0x52d   : > { %2167 = vmatprep.mubr.f32.mxu0 %v3279_v4  ;;  %2261 = vmatprep.mubr.f32.mxu1 %v3279_v4 }
 0x530   : > { %s2959_s24 = spop %2958  ;;  %2877 = vmatmul.mubr.msk.f32.gmra.mxu0 %vm1976_vm8, %v1952_v31  ;;  %2894 = vmatmul.mubr.msk.f32.gmra.mxu1 %vm1976_vm8, %v1969_v56 }
 0x531   : > { %s1094_s25 = smul.f32 %s2959_s24, %s3797_s30  ;;  %s2961_s29 = spop %2960  ;;  %2173 = vmatprep.mubr.f32.mxu0 %v3279_v4  ;;  %2266 = vmatprep.mubr.f32.mxu1 %v3279_v4 }
 0x532   : > { %s1110_s26 = smul.f32 0.0017825312, %s2961_s29  ;;  %s2963_s14 = spop %2962 }
 0x533   : > { %s3952_s19 = sadd.f32 %s1094_s25, %s3793_s16  ;;  %v1470_v16 = vstv %s2963_s14 }
 0x534   : > { %s3955_s23 = sadd.f32 %s1110_s26, %s3795_s22  ;;  %3175 = vrsqrt.f32 %v1470_v16  ;;  %vm1473_vm4 = vcmp.eq.f32.partialorder %v1470_v16, inf  ;;  %v1476_v21 = vand.u32 2147483648, %v1470_v16  ;;  %vm1475_vm7 = vcmp.eq.f32.partialorder %v1470_v16, 0.0  ;;  %2878 = vmatmul.mubr.msk.f32.gmra.mxu0 %vm1976_vm8, %v1953_v32  ;;  %2895 = vmatmul.mubr.msk.f32.gmra.mxu1 %vm1976_vm8, %v1970_v57 }
 0x535   : > { %2179 = vmatprep.mubr.f32.mxu0 %v3279_v4  ;;  %2271 = vmatprep.mubr.f32.mxu1 %v3279_v4 }
 0x538   : > { %2879 = vmatmul.mubr.msk.f32.gmra.mxu0 %vm1976_vm8, %v1954_v33 }
 0x539   : > { %2185 = vmatprep.mubr.f32.mxu0 %v3279_v4 }
 0x53c   : > { %2880 = vmatmul.mubr.msk.f32.gmra.mxu0 %vm1976_vm8, %v1955_v34 }
 0x53d   : > { %2191 = vmatprep.mubr.f32.mxu0 %v3279_v4 }
 0x540   : > { %2881 = vmatmul.mubr.msk.f32.gmra.mxu0 %vm1976_vm8, %v1956_v35 }
 0x541   : > { %v3176_v19 = vpop.eup %3175  ;;  %2197 = vmatprep.mubr.f32.mxu0 %v3279_v4 }
 0x542   : > { %v1472_v15 = vmul.f32 %v3176_v19, %v1470_v16  ;;  %v1546_v19 = vrot.slane %v1545_v18, 4 }
 0x544   : > { %v1474_v22 = vsel %vm1473_vm4, %v1470_v16, %v1472_v15  ;;  %2882 = vmatmul.mubr.msk.f32.gmra.mxu0 %vm1976_vm8, %v1957_v37  ;;  %v1547_v15 = vadd.f32 %v1546_v19, %v1545_v18 }
 0x545   : > { %v1477_v23 = vsel %vm1475_vm7, %v1476_v21, %v1474_v22  ;;  %2203 = vmatprep.mubr.f32.mxu0 %v3279_v4 }
 0x546   : > { %2964 = vpush %v1477_v23  ;;  %v1548_v21 = vrot.slane %v1547_v15, 2 }
 0x547   : > { %2966 = vpush %v1489_v24 }
 0x548   : > { %2883 = vmatmul.mubr.msk.f32.gmra.mxu0 %vm1976_vm8, %v1958_v38  ;;  %v1549_v22 = vadd.f32 %v1548_v21, %v1547_v15 }
 0x549   : > { %2209 = vmatprep.mubr.f32.mxu0 %v3279_v4 }
 0x54a   : > { %v1550_v24 = vrot.slane %v1549_v22, 1 }
 0x54c   : > { %2884 = vmatmul.mubr.msk.f32.gmra.mxu0 %vm1976_vm8, %v1959_v39  ;;  %v1551_v31 = vadd.f32 %v1550_v24, %v1549_v22 }
 0x54d   : > { %2215 = vmatprep.mubr.f32.mxu0 %v3279_v4 }
 0x550   : > { %2885 = vmatmul.mubr.msk.f32.gmra.mxu0 %vm1976_vm8, %v1960_v43 }
 0x551   : > { %2221 = vmatprep.mubr.f32.mxu0 %v3279_v4 }
 0x554   : > { %2886 = vmatmul.mubr.msk.f32.gmra.mxu0 %vm1976_vm8, %v1961_v48 }
 0x555   : > { %2226 = vmatprep.mubr.f32.mxu0 %v3279_v4 }
 0x558   : > { %2887 = vmatmul.mubr.msk.f32.gmra.mxu0 %vm1976_vm8, %v1962_v49 }
 0x577   : > { %s4010_s25 = spop %2964 }
 0x578   : > { %s2967_s29 = spop %2966 }
 0x579   : > { %v1491_v36 = vstv %s2967_s29 }
 0x57a   : > { %3177 = vrsqrt.f32 %v1491_v36  ;;  %vm1494_vm9 = vcmp.eq.f32.partialorder %v1491_v36, inf  ;;  %v1497_v45 = vand.u32 2147483648, %v1491_v36  ;;  %vm1496_vm10 = vcmp.eq.f32.partialorder %v1491_v36, 0.0 }
 0x587   : > { %v3178_v42 = vpop.eup %3177 }
 0x588   : > { %v1493_v44 = vmul.f32 %v3178_v42, %v1491_v36 }
 0x58a   : > { %v1495_v46 = vsel %vm1494_vm9, %v1491_v36, %v1493_v44  ;;  %vm2553_vm9 = vcmask 1040384  }
 0x58b   : > { %v1498_v47 = vsel %vm1496_vm10, %v1497_v45, %v1495_v46 }
 0x58c   : > { %2968 = vpush %v1498_v47 }
 0x5bd   : > { %s2969_s22 = spop %2968 }
 0x5be   : > { %s1500_s15 = smax.f32 %s4309_s3, %s2969_s22 }
 0x5bf   : > { %v1501_v7 = vstv %s1500_s15 }
 0x5c0   : > { %3179 = vrcp.f32 %v1501_v7 }
 0x5cd   : > { %v3180_v16 = vpop.eup %3179 }
 0x5ce   : > { %2970 = vpush %v3180_v16 }
 0x5cf   : > { %2972 = vpush %v1516_v61 }
 0x5d0   : > { %2974 = vpush %v1530_v17 }
 0x5d8   : > { %v2133_v26 = vpop.f32.mrf.mxu0  ;;  %v2233_v19 = vpop.f32.mrf.mxu1 }
 0x5d9   : > { %v2297_v34 = vmul.f32 %v2133_v26, %v2133_v26 }
 0x5da   : > { %v2135_v29 = vpop.f32.mrf.mxu0 }
 0x5db   : > { %v2357_v36 = vand.u32 2147483647, %v2135_v29 }
 0x5dc   : > { %v2139_v32 = vpop.f32.mrf.mxu0 }
 0x5dd   : > { %v2298_v35 = vmul.f32 %v2139_v32, %v2139_v32 }
 0x5de   : > { %v2141_v33 = vpop.f32.mrf.mxu0 }
 0x5df   : > { %v2358_v37 = vand.u32 2147483647, %v2141_v33  ;;  %v2302_v39 = vadd.f32 %v2298_v35, %v2297_v34 }
 0x5e0   : > { %v2145_v38 = vpop.f32.mrf.mxu0 }
 0x5e1   : > { %v2299_v40 = vmul.f32 %v2145_v38, %v2145_v38  ;;  %v2362_v41 = vadd.f32 %v2358_v37, %v2357_v36 }
 0x5e2   : > { %v2147_v42 = vpop.f32.mrf.mxu0 }
 0x5e3   : > { %v2303_v43 = vadd.f32 %v2302_v39, %v2299_v40  ;;  %v2359_v44 = vand.u32 2147483647, %v2147_v42 }
 0x5e4   : > { %v2151_v45 = vpop.f32.mrf.mxu0 }
 0x5e5   : > { %v2363_v46 = vadd.f32 %v2362_v41, %v2359_v44  ;;  %v2300_v47 = vmul.f32 %v2151_v45, %v2151_v45 }
 0x5e6   : > { %v2153_v48 = vpop.f32.mrf.mxu0 }
 0x5e7   : > { %v2304_v49 = vadd.f32 %v2303_v43, %v2300_v47  ;;  %v2360_v50 = vand.u32 2147483647, %v2153_v48 }
 0x5e8   : > { %v2157_v51 = vpop.f32.mrf.mxu0 }
 0x5e9   : > { %v2364_v52 = vadd.f32 %v2363_v46, %v2360_v50  ;;  %v2301_v53 = vmul.f32 %v2157_v51, %v2157_v51 }
 0x5ea   : > { %v2159_v54 = vpop.f32.mrf.mxu0 }
 0x5eb   : > { %v2361_v55 = vand.u32 2147483647, %v2159_v54  ;;  %v2305_v56 = vadd.f32 %v2304_v49, %v2301_v53 }
 0x5ec   : > { %v2163_v57 = vpop.f32.mrf.mxu0 }
 0x5ed   : > { %2306 = vadd.xlane.f32.xlu0 %v2305_v56  ;;  %v2365_v58 = vadd.f32 %v2364_v52, %v2361_v55 }
 0x5ee   : > { %v2165_v59 = vpop.f32.mrf.mxu0 }
 0x5ef   : > { %v2437_v24 = vand.u32 2147483647, %v2165_v59 }
 0x5f0   : > { %v2169_v63 = vpop.f32.mrf.mxu0 }
 0x5f1   : > { %2366 = vadd.xlane.f32.xlu0 %v2365_v58  ;;  %v2378_v15 = vmul.f32 %v2169_v63, %v2169_v63 }
 0x5f2   : > { %v2171_v0 = vpop.f32.mrf.mxu0 }
 0x5f4   : > { %v2175_v1 = vpop.f32.mrf.mxu0 }
 0x5f5   : > { %v2379_v33 = vmul.f32 %v2175_v1, %v2175_v1 }
 0x5f6   : > { %v2177_v60 = vpop.f32.mrf.mxu0 }
 0x5f7   : > { %v2439_v41 = vand.u32 2147483647, %v2177_v60 }
 0x5f8   : > { %v2181_v62 = vpop.f32.mrf.mxu0 }
 0x5f9   : > { %v2380_v46 = vmul.f32 %v2181_v62, %v2181_v62 }
 0x5fa   : > { %v2183_v2 = vpop.f32.mrf.mxu0 }
 0x5fb   : > { %v2440_v51 = vand.u32 2147483647, %v2183_v2 }
 0x5fc   : > { %v2187_v3 = vpop.f32.mrf.mxu0 }
 0x5fd   : > { %v2381_v55 = vmul.f32 %v2187_v3, %v2187_v3 }
 0x5fe   : > { %v4091_v5 = vpop.f32.mrf.mxu0 }
 0x5ff   : > { %s2971_s2 = spop %2970  ;;  %v2441_v58 = vand.u32 2147483647, %v4091_v5 }
 0x600   : > { %s1504_s4 = smul.f32 %s2971_s2, %s4010_s25  ;;  %s2973_s5 = spop %2972  ;;  %v2193_v6 = vpop.f32.mrf.mxu0 }
 0x601   : > { %s1518_s13 = smul.f32 0.0017094017, %s2973_s5  ;;  %s2975_s24 = spop %2974 }
 0x602   : > { %s4086_s29 = sadd.f32 %s1504_s4, %s3952_s19  ;;  %v1532_v20 = vstv %s2975_s24  ;;  %v4093_v7 = vpop.f32.mrf.mxu0 }
 0x603   : > { %s4089_s26 = sadd.f32 %s1518_s13, %s3955_s23  ;;  %3181 = vrsqrt.f32 %v1532_v20  ;;  %vm1535_vm11 = vcmp.eq.f32.partialorder %v1532_v20, inf  ;;  %v1538_v27 = vand.u32 2147483648, %v1532_v20  ;;  %vm1537_vm6 = vcmp.eq.f32.partialorder %v1532_v20, 0.0 }
 0x604   : > { %v2199_v8 = vpop.f32.mrf.mxu0  ;;  %v2517_v2 = vand.u32 2147483647, %v4093_v7 }
 0x605   : > { %v2458_v1 = vmul.f32 %v2199_v8, %v2199_v8 }
 0x606   : > { %v4095_v9 = vpop.f32.mrf.mxu0 }
 0x608   : > { %v4097_v10 = vpop.f32.mrf.mxu0 }
 0x60a   : > { %v4101_v11 = vpop.f32.mrf.mxu0 }
 0x60b   : > { %v2519_v8 = vand.u32 2147483647, %v4101_v11 }
 0x60c   : > { %v4103_v13 = vpop.f32.mrf.mxu0 }
 0x60e   : > { %v4105_v16 = vpop.f32.mrf.mxu0 }
 0x610   : > { %v3182_v23 = vpop.eup %3181  ;;  %v4107_v61 = vpop.f32.mrf.mxu0 }
 0x611   : > { %v1534_v25 = vmul.f32 %v3182_v23, %v1532_v20  ;;  %v2235_v23 = vpop.f32.mrf.mxu1 }
 0x612   : > { %v4109_v17 = vpop.f32.mrf.mxu0 }
 0x613   : > { %v1536_v28 = vsel %vm1535_vm11, %v1532_v20, %v1534_v25  ;;  %v2377_v20 = vmul.f32 %v2163_v57, %v2163_v57  ;;  %v2438_v25 = vand.u32 2147483647, %v2171_v0  ;;  %v2457_v0 = vmul.f32 %v2193_v6, %v2193_v6 }
 0x614   : > { %v1539_v30 = vsel %vm1537_vm6, %v1538_v27, %v1536_v28  ;;  %v2223_v18 = vpop.f32.mrf.mxu0  ;;  %v2326_v28 = vmul.f32 %v2233_v19, %v2233_v19 }
 0x615   : > { %2976 = vpush %v1539_v30  ;;  %v2324_v22 = vmul.f32 %v2223_v18, %v2223_v18  ;;  %v2238_v30 = vpop.f32.mrf.mxu1  ;;  %v2382_v32 = vadd.f32 %v2378_v15, %v2377_v20  ;;  %v2442_v40 = vadd.f32 %v2438_v25, %v2437_v24  ;;  %v2518_v20 = vand.u32 2147483647, %v4095_v9 }
 0x616   : > { %2978 = vpush %v1551_v31  ;;  %v2225_v21 = vpop.f32.mrf.mxu0  ;;  %v2327_v37 = vmul.f32 %v2238_v30, %v2238_v30  ;;  %v2462_v15 = vadd.f32 %v2458_v1, %v2457_v0 }
 0x617   : > { %v2240_v38 = vpop.f32.mrf.mxu1  ;;  %v2383_v45 = vadd.f32 %v2382_v32, %v2379_v33  ;;  %v2443_v50 = vadd.f32 %v2442_v40, %v2439_v41  ;;  %v2459_v21 = vmul.f32 %v4097_v10, %v4097_v10  ;;  %v2522_v6 = vadd.f32 %v2518_v20, %v2517_v2  ;;  %v1971_v20 = vld [vmem:[%s4288_s10 + $0xc8] sm:$0xff] }
 0x618   : > { %v2228_v26 = vpop.f32.mrf.mxu0  ;;  %v2520_v10 = vand.u32 2147483647, %v4105_v16  ;;  %2896 = vmatmul.mubr.msk.f32.gmra.mxu1 %vm1976_vm8, %v1971_v20 }
 0x619   : > { %v2325_v29 = vmul.f32 %v2228_v26, %v2228_v26  ;;  %v2243_v44 = vpop.f32.mrf.mxu1  ;;  %v2384_v54 = vadd.f32 %v2383_v45, %v2380_v46  ;;  %v2444_v57 = vadd.f32 %v2443_v50, %v2440_v51  ;;  %v2463_v25 = vadd.f32 %v2462_v15, %v2459_v21  ;;  %2276 = vmatprep.mubr.f32.mxu1 %v3279_v4  ;;  %v1973_v15 = vld [vmem:[%s4288_s10 + $0xd8] sm:$0xff]  ;;  %v1974_v21 = vld [vmem:[%s4288_s10 + $0xe0] sm:$0xff] }
 0x61a   : > { %v2230_v34 = vpop.f32.mrf.mxu0  ;;  %v2328_v47 = vmul.f32 %v2243_v44, %v2243_v44  ;;  %v2460_v26 = vmul.f32 %v4103_v13, %v4103_v13 }
 0x61b   : > { %v2329_v36 = vadd.f32 %v2325_v29, %v2324_v22  ;;  %v2245_v49 = vpop.f32.mrf.mxu1  ;;  %v2385_v62 = vadd.f32 %v2384_v54, %v2381_v55  ;;  %v2445_v19 = vadd.f32 %v2444_v57, %v2441_v58 }
 0x61c   : > { %v2464_v30 = vadd.f32 %v2463_v25, %v2460_v26 }
 0x61d   : > { %v2330_v43 = vadd.f32 %v2329_v36, %v2326_v28  ;;  %v2248_v52 = vpop.f32.mrf.mxu1  ;;  %v2523_v28 = vadd.f32 %v2522_v6, %v2519_v8 }
 0x61e   : > { %v2404_v59 = vmul.f32 %v2248_v52, %v2248_v52 }
 0x61f   : > { %v2331_v48 = vadd.f32 %v2330_v43, %v2327_v37  ;;  %v2250_v56 = vpop.f32.mrf.mxu1  ;;  %v2524_v11 = vadd.f32 %v2523_v28, %v2520_v10  ;;  %v1572_v37 = vpop.xlane.xlu0 %1571 }
 0x620   : > { %v1573_v38 = vrot.slane %v1572_v37, 4 }
 0x621   : > { %v2332_v53 = vadd.f32 %v2331_v48, %v2328_v47  ;;  %v2253_v63 = vpop.f32.mrf.mxu1 }
 0x622   : > { %v2405_v60 = vmul.f32 %v2253_v63, %v2253_v63  ;;  %v1574_v41 = vadd.f32 %v1573_v38, %v1572_v37 }
 0x623   : > { %2333 = vadd.xlane.f32.xlu1 %v2332_v53  ;;  %v1607_v50 = vpop.xlane.xlu0 %1606 }
 0x624   : > { %v2409_v18 = vadd.f32 %v2405_v60, %v2404_v59  ;;  %v1608_v51 = vrot.slane %v1607_v50, 4 }
 0x626   : > { %v1609_v53 = vadd.f32 %v1608_v51, %v1607_v50 }
 0x627   : > { %2386 = vadd.xlane.f32.xlu1 %v2385_v62 }
 0x628   : > { %v1610_v54 = vrot.slane %v1609_v53, 2 }
 0x62a   : > { %v1611_v55 = vadd.f32 %v1610_v54, %v1609_v53 }
 0x62b   : > { %2446 = vadd.xlane.f32.xlu1 %v2445_v19 }
 0x62c   : > { %v1612_v57 = vrot.slane %v1611_v55, 1 }
 0x62e   : > { %v1613_v1 = vadd.f32 %v1612_v57, %v1611_v55 }
 0x646   : > { %s4099_s19 = spop %2976 }
 0x647   : > { %s2979_s23 = spop %2978 }
 0x648   : > { %v1553_v12 = vstv %s2979_s23 }
 0x649   : > { %3183 = vrsqrt.f32 %v1553_v12  ;;  %vm1556_vm12 = vcmp.eq.f32.partialorder %v1553_v12, inf  ;;  %v1559_v35 = vand.u32 2147483648, %v1553_v12  ;;  %vm1558_vm13 = vcmp.eq.f32.partialorder %v1553_v12, 0.0 }
 0x656   : > { %v3184_v27 = vpop.eup %3183 }
 0x657   : > { %v1555_v31 = vmul.f32 %v3184_v27, %v1553_v12 }
 0x659   : > { %v1557_v39 = vsel %vm1556_vm12, %v1553_v12, %v1555_v31  ;;  %v2255_v12 = vpop.f32.mrf.mxu1  ;;  %v2461_v31 = vmul.f32 %v4107_v61, %v4107_v61 }
 0x65a   : > { %v1560_v42 = vsel %vm1558_vm13, %v1559_v35, %v1557_v39  ;;  %v2521_v35 = vand.u32 2147483647, %v4109_v17  ;;  %v1586_v39 = vpop.xlane.xlu1 %1585 }
 0x65b   : > { %2980 = vpush %v1560_v42  ;;  %v2258_v3 = vpop.f32.mrf.mxu1  ;;  %v2465_v36 = vadd.f32 %v2464_v30, %v2461_v31  ;;  %v1587_v40 = vrot.slane %v1586_v39, 4  ;;  %v1575_v42 = vrot.slane %v1574_v41, 2 }
 0x65c   : > { %v2406_v5 = vmul.f32 %v2258_v3, %v2258_v3  ;;  %v2525_v13 = vadd.f32 %v2524_v11, %v2521_v35  ;;  %v1972_v3 = vld [vmem:[%s4288_s10 + $0xd0] sm:$0xff] }
 0x65d   : > { %v2260_v22 = vpop.f32.mrf.mxu1  ;;  %v1588_v16 = vadd.f32 %v1587_v40, %v1586_v39  ;;  %v1576_v17 = vadd.f32 %v1575_v42, %v1574_v41  ;;  %2897 = vmatmul.mubr.msk.f32.gmra.mxu1 %vm1976_vm8, %v1972_v3 }
 0x65e   : > { %v2410_v23 = vadd.f32 %v2409_v18, %v2406_v5  ;;  %2281 = vmatprep.mubr.f32.mxu1 %v3279_v4  ;;  %v1975_v5 = vld [vmem:[%s4288_s10 + $0xe8] sm:$0xff]  ;;  %v1634_v22 = vpop.xlane.xlu1 %1633 }
 0x65f   : > { %v2263_v24 = vpop.f32.mrf.mxu1  ;;  %v1589_v43 = vrot.slane %v1588_v16, 2  ;;  %v1577_v45 = vrot.slane %v1576_v17, 1 }
 0x660   : > { %v2407_v7 = vmul.f32 %v2263_v24, %v2263_v24 }
 0x661   : > { %v2265_v27 = vpop.f32.mrf.mxu1  ;;  %v1590_v44 = vadd.f32 %v1589_v43, %v1588_v16  ;;  %v1578_v48 = vadd.f32 %v1577_v45, %v1576_v17  ;;  %2898 = vmatmul.mubr.msk.f32.gmra.mxu1 %vm1976_vm8, %v1973_v15 }
 0x662   : > { %v2411_v9 = vadd.f32 %v2410_v23, %v2407_v7  ;;  %2286 = vmatprep.mubr.f32.mxu1 %v3279_v4  ;;  %v1635_v23 = vrot.slane %v1634_v22, 4 }
 0x663   : > { %v2268_v29 = vpop.f32.mrf.mxu1  ;;  %v1591_v46 = vrot.slane %v1590_v44, 1 }
 0x664   : > { %v2408_v32 = vmul.f32 %v2268_v29, %v2268_v29  ;;  %v1636_v24 = vadd.f32 %v1635_v23, %v1634_v22 }
 0x665   : > { %v2270_v33 = vpop.f32.mrf.mxu1  ;;  %v1592_v49 = vadd.f32 %v1591_v46, %v1590_v44  ;;  %2899 = vmatmul.mubr.msk.f32.gmra.mxu1 %vm1976_vm8, %v1974_v21 }
 0x666   : > { %v2412_v34 = vadd.f32 %v2411_v9, %v2408_v32  ;;  %2291 = vmatprep.mubr.f32.mxu1 %v3279_v4  ;;  %v1637_v7 = vrot.slane %v1636_v24, 2 }
 0x668   : > { %2413 = vadd.xlane.f32.xlu0 %v2412_v34  ;;  %v1638_v27 = vadd.f32 %v1637_v7, %v1636_v24 }
 0x669   : > { %2900 = vmatmul.mubr.msk.f32.gmra.mxu1 %vm1976_vm8, %v1975_v5 }
 0x66a   : > { %v1639_v28 = vrot.slane %v1638_v27, 1 }
 0x66c   : > { %2466 = vadd.xlane.f32.xlu0 %v2465_v36  ;;  %v1640_v10 = vadd.f32 %v1639_v28, %v1638_v27 }
 0x670   : > { %2526 = vadd.xlane.f32.xlu0 %v2525_v13 }
 0x676   : > { %v2307_v6 = vpop.xlane.xlu0 %2306 }
 0x677   : > { %v2308_v8 = vrot.slane %v2307_v6, 4 }
 0x679   : > { %v2309_v25 = vadd.f32 %v2308_v8, %v2307_v6 }
 0x67b   : > { %v2310_v4 = vrot.slane %v2309_v25, 2 }
 0x67d   : > { %v2311_v9 = vadd.f32 %v2310_v4, %v2309_v25 }
 0x67f   : > { %v2312_v29 = vrot.slane %v2311_v9, 1 }
 0x681   : > { %v2313_v31 = vadd.f32 %v2312_v29, %v2311_v9 }
 0x68c   : > { %s2981_s25 = spop %2980 }
 0x68d   : > { %s1562_s14 = smax.f32 %s4309_s3, %s2981_s25 }
 0x68e   : > { %v1563_v61 = vstv %s1562_s14 }
 0x68f   : > { %3185 = vrcp.f32 %v1563_v61 }
 0x69c   : > { %v3186_v47 = vpop.eup %3185 }
 0x69d   : > { %2982 = vpush %v3186_v47 }
 0x69e   : > { %2984 = vpush %v1578_v48 }
 0x69f   : > { %2986 = vpush %v1592_v49 }
 0x6ac   : > { %v2334_v32 = vpop.xlane.xlu1 %2333 }
 0x6ad   : > { %v2335_v33 = vrot.slane %v2334_v32, 4 }
 0x6af   : > { %v2336_v11 = vadd.f32 %v2335_v33, %v2334_v32 }
 0x6b1   : > { %v2337_v35 = vrot.slane %v2336_v11, 2 }
 0x6b3   : > { %v2338_v36 = vadd.f32 %v2337_v35, %v2336_v11  ;;  %v2544_v35 = vshrl.u32 %v646_v14, 7 }
 0x6b5   : > { %v2339_v37 = vrot.slane %v2338_v36, 1 }
 0x6b7   : > { %v2340_v16 = vadd.f32 %v2339_v37, %v2338_v36  ;;  %v4187_v37 = vsub.s32 1, %v2544_v35 }
 0x6ce   : > { %s2983_s16 = spop %2982 }
 0x6cf   : > { %s1566_s30 = smul.f32 %s2983_s16, %s4099_s19  ;;  %s2985_s22 = spop %2984 }
 0x6d0   : > { %s1580_s15 = smul.f32 0.0017094017, %s2985_s22  ;;  %s2987_s2 = spop %2986 }
 0x6d1   : > { %s4126_s4 = sadd.f32 %s1566_s30, %s4086_s29  ;;  %v1594_v52 = vstv %s2987_s2 }
 0x6d2   : > { %s4129_s5 = sadd.f32 %s1580_s15, %s4089_s26  ;;  %3187 = vrsqrt.f32 %v1594_v52  ;;  %vm1597_vm14 = vcmp.eq.f32.partialorder %v1594_v52, inf  ;;  %v1600_v59 = vand.u32 2147483648, %v1594_v52  ;;  %vm1599_vm15 = vcmp.eq.f32.partialorder %v1594_v52, 0.0 }
 0x6d8   : > { %v2273_v46 = vpop.f32.mrf.mxu1 }
 0x6d9   : > { %v2484_v48 = vmul.f32 %v2273_v46, %v2273_v46 }
 0x6da   : > { %v2275_v47 = vpop.f32.mrf.mxu1 }
 0x6df   : > { %v3188_v56 = vpop.eup %3187 }
 0x6e0   : > { %v1596_v58 = vmul.f32 %v3188_v56, %v1594_v52 }
 0x6e2   : > { %v1598_v63 = vsel %vm1597_vm14, %v1594_v52, %v1596_v58 }
 0x6e3   : > { %v1601_v0 = vsel %vm1599_vm15, %v1600_v59, %v1598_v63 }
 0x6e4   : > { %2988 = vpush %v1601_v0 }
 0x6e5   : > { %2990 = vpush %v1613_v1 }
 0x715   : > { %s4131_s13 = spop %2988 }
 0x716   : > { %s2991_s24 = spop %2990 }
 0x717   : > { %v1615_v60 = vstv %s2991_s24 }
 0x718   : > { %3189 = vrsqrt.f32 %v1615_v60  ;;  %vm1618_vm0 = vcmp.eq.f32.partialorder %v1615_v60, inf  ;;  %v1621_v18 = vand.u32 2147483648, %v1615_v60  ;;  %vm1620_vm1 = vcmp.eq.f32.partialorder %v1615_v60, 0.0 }
 0x71d   : > { %v2278_v49 = vpop.f32.mrf.mxu1 }
 0x71e   : > { %v2485_v50 = vmul.f32 %v2278_v49, %v2278_v49 }
 0x71f   : > { %v2280_v51 = vpop.f32.mrf.mxu1 }
 0x720   : > { %v2489_v52 = vadd.f32 %v2485_v50, %v2484_v48 }
 0x721   : > { %v2283_v53 = vpop.f32.mrf.mxu1 }
 0x722   : > { %v2486_v54 = vmul.f32 %v2283_v53, %v2283_v53 }
 0x723   : > { %v2285_v55 = vpop.f32.mrf.mxu1 }
 0x724   : > { %v2490_v56 = vadd.f32 %v2489_v52, %v2486_v54 }
 0x725   : > { %v3190_v62 = vpop.eup %3189  ;;  %v2288_v57 = vpop.f32.mrf.mxu1 }
 0x726   : > { %v1617_v12 = vmul.f32 %v3190_v62, %v1615_v60  ;;  %v2487_v58 = vmul.f32 %v2288_v57, %v2288_v57 }
 0x727   : > { %v2290_v59 = vpop.f32.mrf.mxu1 }
 0x728   : > { %v1619_v19 = vsel %vm1618_vm0, %v1615_v60, %v1617_v12  ;;  %v2491_v63 = vadd.f32 %v2490_v56, %v2487_v58  ;;  %v2367_v12 = vpop.xlane.xlu0 %2366 }
 0x729   : > { %v1622_v2 = vsel %vm1620_vm1, %v1621_v18, %v1619_v19  ;;  %v2293_v0 = vpop.f32.mrf.mxu1  ;;  %v2368_v18 = vrot.slane %v2367_v12, 4  ;;  %v2387_v19 = vpop.xlane.xlu1 %2386 }
 0x72a   : > { %2992 = vpush %v1622_v2  ;;  %v2488_v1 = vmul.f32 %v2293_v0, %v2293_v0  ;;  %v2388_v2 = vrot.slane %v2387_v19, 4 }
 0x72b   : > { %v2295_v60 = vpop.f32.mrf.mxu1  ;;  %v2369_v20 = vadd.f32 %v2368_v18, %v2367_v12 }
 0x72c   : > { %v2492_v62 = vadd.f32 %v2491_v63, %v2488_v1  ;;  %v2389_v3 = vadd.f32 %v2388_v2, %v2387_v19  ;;  %v2414_v7 = vpop.xlane.xlu0 %2413 }
 0x72d   : > { %v2370_v21 = vrot.slane %v2369_v20, 2  ;;  %v2415_v4 = vrot.slane %v2414_v7, 4  ;;  %v2447_v53 = vpop.xlane.xlu1 %2446 }
 0x72e   : > { %2493 = vadd.xlane.f32.xlu1 %v2492_v62  ;;  %v2390_v5 = vrot.slane %v2389_v3, 2  ;;  %v2448_v54 = vrot.slane %v2447_v53, 4 }
 0x72f   : > { %v2371_v22 = vadd.f32 %v2370_v21, %v2369_v20  ;;  %v2416_v9 = vadd.f32 %v2415_v4, %v2414_v7 }
 0x730   : > { %v2391_v23 = vadd.f32 %v2390_v5, %v2389_v3  ;;  %v2467_v55 = vpop.xlane.xlu0 %2466  ;;  %v2449_v57 = vadd.f32 %v2448_v54, %v2447_v53 }
 0x731   : > { %v2372_v6 = vrot.slane %v2371_v22, 1  ;;  %v2417_v28 = vrot.slane %v2416_v9, 2  ;;  %v2468_v56 = vrot.slane %v2467_v55, 4 }
 0x732   : > { %v2392_v8 = vrot.slane %v2391_v23, 1  ;;  %v2450_v63 = vrot.slane %v2449_v57, 2 }
 0x733   : > { %v2373_v25 = vadd.f32 %v2372_v6, %v2371_v22  ;;  %v2418_v29 = vadd.f32 %v2417_v28, %v2416_v9  ;;  %v2469_v58 = vadd.f32 %v2468_v56, %v2467_v55 }
 0x734   : > { %v2451_v1 = vadd.f32 %v2450_v63, %v2449_v57 }
 0x735   : > { %v2470_v0 = vrot.slane %v2469_v58, 2 }
 0x736   : > { %v2452_v62 = vrot.slane %v2451_v1, 1 }
 0x737   : > { %v2471_v60 = vadd.f32 %v2470_v0, %v2469_v58 }
 0x738   : > { %v2453_v19 = vadd.f32 %v2452_v62, %v2451_v1 }
 0x739   : > { %v2472_v12 = vrot.slane %v2471_v60, 1 }
 0x73b   : > { %v2473_v2 = vadd.f32 %v2472_v12, %v2471_v60 }
 0x75b   : > { %s2993_s2 = spop %2992 }
 0x75c   : > { %s1624_s24 = smax.f32 %s4309_s3, %s2993_s2 }
 0x75d   : > { %v1625_v26 = vstv %s1624_s24 }
 0x75e   : > { %3191 = vrcp.f32 %v1625_v26  ;;  %v2393_v26 = vadd.f32 %v2392_v8, %v2391_v23 }
 0x76b   : > { %v3192_v30 = vpop.eup %3191 }
 0x76c   : > { %2994 = vpush %v3192_v30 }
 0x76d   : > { %2996 = vpush %v1640_v10  ;;  %v2419_v10 = vrot.slane %v2418_v29, 1 }
 0x76e   : > { %2998 = vpush %v2313_v31 }
 0x76f   : > { %v2420_v11 = vadd.f32 %v2419_v10, %v2418_v29  ;;  %v2527_v10 = vpop.xlane.xlu0 %2526 }
 0x79d   : > { %s2995_s29 = spop %2994 }
 0x79e   : > { %s1628_s26 = smul.f32 %s2995_s29, %s4131_s13  ;;  %s2997_s19 = spop %2996 }
 0x79f   : > { %s1642_s23 = smul.f32 0.0017094017, %s2997_s19  ;;  %s2999_s25 = spop %2998 }
 0x7a0   : > { %s4160_s14 = sadd.f32 %s1628_s26, %s4126_s4  ;;  %v2315_v34 = vstv %s2999_s25 }
 0x7a1   : > { %s4163_s16 = sadd.f32 %s1642_s23, %s4129_s5  ;;  %3193 = vrsqrt.f32 %v2315_v34  ;;  %vm2318_vm2 = vcmp.eq.f32.partialorder %v2315_v34, inf  ;;  %v2321_v39 = vand.u32 2147483648, %v2315_v34  ;;  %vm2320_vm3 = vcmp.eq.f32.partialorder %v2315_v34, 0.0  ;;  %s2788_s23 = sshll.u32 %s3412_s12, 1 }
 0x7ae   : > { %v3194_v13 = vpop.eup %3193 }
 0x7af   : > { %v2317_v38 = vmul.f32 %v3194_v13, %v2315_v34  ;;  %v4185_v13 = vsub.s32 0, %v2544_v35 }
 0x7b1   : > { %v2319_v40 = vsel %vm2318_vm2, %v2315_v34, %v2317_v38 }
 0x7b2   : > { %v2322_v41 = vsel %vm2320_vm3, %v2321_v39, %v2319_v40 }
 0x7b3   : > { %3000 = vpush %v2322_v41 }
 0x7b4   : > { %3002 = vpush %v2340_v16 }
 0x7b7   : > { %v2494_v20 = vpop.xlane.xlu1 %2493 }
 0x7b8   : > { %v2495_v3 = vrot.slane %v2494_v20, 4 }
 0x7ba   : > { %v2496_v21 = vadd.f32 %v2495_v3, %v2494_v20 }
 0x7bc   : > { %v2497_v5 = vrot.slane %v2496_v21, 2 }
 0x7be   : > { %v2498_v22 = vadd.f32 %v2497_v5, %v2496_v21 }
 0x7c0   : > { %v2499_v6 = vrot.slane %v2498_v22, 1 }
 0x7c2   : > { %v2500_v7 = vadd.f32 %v2499_v6, %v2498_v22 }
 0x7e4   : > { %s4165_s4 = spop %3000 }
 0x7e5   : > { %s3003_s13 = spop %3002 }
 0x7e6   : > { %v2342_v61 = vstv %s3003_s13 }
 0x7e7   : > { %3195 = vrsqrt.f32 %v2342_v61  ;;  %vm2345_vm5 = vcmp.eq.f32.partialorder %v2342_v61, inf  ;;  %v2348_v17 = vand.u32 2147483648, %v2342_v61  ;;  %vm2347_vm4 = vcmp.eq.f32.partialorder %v2342_v61, 0.0 }
 0x7f4   : > { %v3196_v42 = vpop.eup %3195 }
 0x7f5   : > { %v2344_v43 = vmul.f32 %v3196_v42, %v2342_v61 }
 0x7f7   : > { %v2346_v44 = vsel %vm2345_vm5, %v2342_v61, %v2344_v43 }
 0x7f8   : > { %v2349_v45 = vsel %vm2347_vm4, %v2348_v17, %v2346_v44 }
 0x7f9   : > { %3004 = vpush %v2349_v45 }
 0x82a   : > { %s3005_s5 = spop %3004 }
 0x82b   : > { %s2351_s30 = smax.f32 %s4309_s3, %s3005_s5  ;;  %s439_s5 = scalar_lea.vmem %s4310_s0, %s2788_s23 }
 0x82c   : > { %v2352_v15 = vstv %s2351_s30  ;;  %v4189_v38 = vld [vmem:[%s439_s5] sm:$0x3] }
 0x82d   : > { %3197 = vrcp.f32 %v2352_v15 }
 0x83a   : > { %v3198_v24 = vpop.eup %3197 }
 0x83b   : > { %3006 = vpush %v3198_v24 }
 0x83c   : > { %3008 = vpush %v2373_v25 }
 0x83d   : > { %3010 = vpush %v2393_v26 }
 0x86c   : > { %s3007_s22 = spop %3006 }
 0x86d   : > { %s2355_s15 = smul.f32 %s3007_s22, %s4165_s4  ;;  %s3009_s2 = spop %3008 }
 0x86e   : > { %s2375_s24 = smul.f32 0.0017825312, %s3009_s2  ;;  %s3011_s29 = spop %3010 }
 0x86f   : > { %s4170_s26 = sadd.f32 %s2355_s15, %s4160_s14  ;;  %v2395_v27 = vstv %s3011_s29 }
 0x870   : > { %s4173_s19 = sadd.f32 %s2375_s24, %s4163_s16  ;;  %3199 = vrsqrt.f32 %v2395_v27  ;;  %vm2398_vm7 = vcmp.eq.f32.partialorder %v2395_v27, inf  ;;  %v2401_v32 = vand.u32 2147483648, %v2395_v27  ;;  %vm2400_vm8 = vcmp.eq.f32.partialorder %v2395_v27, 0.0  ;;  %s443_s16 = scalar_lea.vmem %s4279_s1, %s2788_s23 }
 0x871   : > { %v4183_v36 = vld [vmem:[%s443_s16] sm:$0x3] }
 0x872   : > { %v2567_v39 = vmul.f32 %v4183_v36, %v4183_v36  ;;  %v2541_v14 = vmul.f32 %v4183_v36, %v4189_v38 }
 0x874   : > { %v2572_v40 = vrot.slane %v2567_v39, %v4185_v13  ;;  %v2576_v41 = vrot.slane %v2567_v39, %v4187_v37  ;;  %v2546_v16 = vrot.slane %v2541_v14, %v4185_v13  ;;  %v2550_v61 = vrot.slane %v2541_v14, %v4187_v37 }
 0x876   : > { %v2579_v42 = vsel %vm2553_vm9, %v2572_v40, 0.0  ;;  %v2580_v43 = vsel %vm2553_vm9, %v2576_v41, 0.0  ;;  %v2554_v17 = vsel %vm2553_vm9, %v2546_v16, 0.0  ;;  %v2555_v44 = vsel %vm2553_vm9, %v2550_v61, 0.0 }
 0x877   : > { %v2581_v45 = vadd.f32 %v2580_v43, %v2579_v42  ;;  %v2556_v46 = vadd.f32 %v2555_v44, %v2554_v17 }
 0x879   : > { %2582 = vadd.xlane.f32.xlu0 %v2581_v45  ;;  %2557 = vadd.xlane.f32.xlu1 %v2556_v46 }
 0x87d   : > { %v3200_v30 = vpop.eup %3199 }
 0x87e   : > { %v2397_v31 = vmul.f32 %v3200_v30, %v2395_v27 }
 0x880   : > { %v2399_v33 = vsel %vm2398_vm7, %v2395_v27, %v2397_v31 }
 0x881   : > { %v2402_v34 = vsel %vm2400_vm8, %v2401_v32, %v2399_v33  ;;  %v2528_v33 = vrot.slane %v2527_v10, 4 }
 0x882   : > { %3012 = vpush %v2402_v34 }
 0x883   : > { %3014 = vpush %v2420_v11  ;;  %v2529_v35 = vadd.f32 %v2528_v33, %v2527_v10 }
 0x885   : > { %v2530_v41 = vrot.slane %v2529_v35, 2 }
 0x887   : > { %v2531_v42 = vadd.f32 %v2530_v41, %v2529_v35 }
 0x889   : > { %v2532_v44 = vrot.slane %v2531_v42, 1 }
 0x8b3   : > { %s4203_s12 = spop %3012 }
 0x8b4   : > { %s3015_s30 = spop %3014 }
 0x8b5   : > { %v2422_v47 = vstv %s3015_s30 }
 0x8b6   : > { %3201 = vrsqrt.f32 %v2422_v47  ;;  %vm2425_vm10 = vcmp.eq.f32.partialorder %v2422_v47, inf  ;;  %v2428_v50 = vand.u32 2147483648, %v2422_v47  ;;  %vm2427_vm11 = vcmp.eq.f32.partialorder %v2422_v47, 0.0 }
 0x8c3   : > { %v3202_v48 = vpop.eup %3201 }
 0x8c4   : > { %v2424_v49 = vmul.f32 %v3202_v48, %v2422_v47  ;;  %v2533_v48 = vadd.f32 %v2532_v44, %v2531_v42 }
 0x8c6   : > { %v2426_v51 = vsel %vm2425_vm10, %v2422_v47, %v2424_v49 }
 0x8c7   : > { %v2429_v52 = vsel %vm2427_vm11, %v2428_v50, %v2426_v51 }
 0x8c8   : > { %3016 = vpush %v2429_v52 }
 0x8f9   : > { %s3017_s22 = spop %3016 }
 0x8fa   : > { %s2431_s15 = smax.f32 %s4309_s3, %s3017_s22 }
 0x8fb   : > { %v2432_v59 = vstv %s2431_s15 }
 0x8fc   : > { %3203 = vrcp.f32 %v2432_v59 }
 0x902   : > { %v2558_v31 = vpop.xlane.xlu1 %2557  ;;  %v2583_v32 = vpop.xlane.xlu0 %2582 }
 0x903   : > { %v2559_v34 = vrot.slane %v2558_v31, 4  ;;  %v2584_v11 = vrot.slane %v2583_v32, 4 }
 0x905   : > { %v2560_v39 = vadd.f32 %v2559_v34, %v2558_v31  ;;  %v2585_v14 = vadd.f32 %v2584_v11, %v2583_v32 }
 0x907   : > { %v2561_v16 = vrot.slane %v2560_v39, 2  ;;  %v2586_v61 = vrot.slane %v2585_v14, 2 }
 0x909   : > { %v3204_v18 = vpop.eup %3203  ;;  %v2562_v43 = vadd.f32 %v2561_v16, %v2560_v39  ;;  %v2587_v17 = vadd.f32 %v2586_v61, %v2585_v14 }
 0x90a   : > { %3018 = vpush %v3204_v18 }
 0x90b   : > { %3020 = vpush %v2453_v19  ;;  %v2563_v45 = vrot.slane %v2562_v43, 1  ;;  %v2588_v46 = vrot.slane %v2587_v17, 1 }
 0x90c   : > { %3022 = vpush %v2473_v2 }
 0x90d   : > { %v2564_v49 = vadd.f32 %v2563_v45, %v2562_v43  ;;  %v2589_v50 = vadd.f32 %v2588_v46, %v2587_v17 }
 0x93b   : > { %s3019_s2 = spop %3018 }
 0x93c   : > { %s2435_s24 = smul.f32 %s3019_s2, %s4203_s12  ;;  %s3021_s29 = spop %3020 }
 0x93d   : > { %s2455_s23 = smul.f32 0.0017825312, %s3021_s29  ;;  %s3023_s25 = spop %3022 }
 0x93e   : > { %s4208_s14 = sadd.f32 %s2435_s24, %s4170_s26  ;;  %v2475_v15 = vstv %s3023_s25 }
 0x93f   : > { %s4211_s16 = sadd.f32 %s2455_s23, %s4173_s19  ;;  %3205 = vrsqrt.f32 %v2475_v15  ;;  %vm2478_vm6 = vcmp.eq.f32.partialorder %v2475_v15, inf  ;;  %v2481_v24 = vand.u32 2147483648, %v2475_v15  ;;  %vm2480_vm12 = vcmp.eq.f32.partialorder %v2475_v15, 0.0 }
 0x94c   : > { %v3206_v23 = vpop.eup %3205 }
 0x94d   : > { %v2477_v8 = vmul.f32 %v3206_v23, %v2475_v15 }
 0x94f   : > { %v2479_v25 = vsel %vm2478_vm6, %v2475_v15, %v2477_v8 }
 0x950   : > { %v2482_v26 = vsel %vm2480_vm12, %v2481_v24, %v2479_v25 }
 0x951   : > { %3024 = vpush %v2482_v26 }
 0x952   : > { %3026 = vpush %v2500_v7 }
 0x982   : > { %s4213_s26 = spop %3024 }
 0x983   : > { %s3027_s4 = spop %3026 }
 0x984   : > { %v2502_v4 = vstv %s3027_s4 }
 0x985   : > { %3207 = vrsqrt.f32 %v2502_v4  ;;  %vm2505_vm13 = vcmp.eq.f32.partialorder %v2502_v4, inf  ;;  %v2508_v28 = vand.u32 2147483648, %v2502_v4  ;;  %vm2507_vm14 = vcmp.eq.f32.partialorder %v2502_v4, 0.0 }
 0x992   : > { %v3208_v27 = vpop.eup %3207 }
 0x993   : > { %v2504_v9 = vmul.f32 %v3208_v27, %v2502_v4 }
 0x995   : > { %v2506_v29 = vsel %vm2505_vm13, %v2502_v4, %v2504_v9 }
 0x996   : > { %v2509_v30 = vsel %vm2507_vm14, %v2508_v28, %v2506_v29 }
 0x997   : > { %3028 = vpush %v2509_v30 }
 0x9c8   : > { %s3029_s19 = spop %3028 }
 0x9c9   : > { %s2511_s13 = smax.f32 %s4309_s3, %s3029_s19 }
 0x9ca   : > { %v2512_v40 = vstv %s2511_s13 }
 0x9cb   : > { %3209 = vrcp.f32 %v2512_v40 }
 0x9d8   : > { %v3210_v47 = vpop.eup %3209 }
 0x9d9   : > { %3030 = vpush %v3210_v47 }
 0x9da   : > { %3032 = vpush %v2533_v48 }
 0x9db   : > { %3034 = vpush %v2564_v49 }
 0x9dc   : > { %3036 = vpush %v2589_v50 }
 0xa0a   : > { %s3031_s3 = spop %3030 }
 0xa0b   : > { %s2515_s5 = smul.f32 %s3031_s3, %s4213_s26  ;;  %s3033_s12 = spop %3032 }
 0xa0c   : > { %s2535_s30 = smul.f32 0.0017825312, %s3033_s12  ;;  %s3035_s22 = spop %3034 }
 0xa0d   : > { %s4218_s15 = sadd.f32 %s2515_s5, %s4208_s14  ;;  %s3037_s24 = spop %3036 }
 0xa0e   : > { %s4221_s2 = sadd.f32 %s2535_s30, %s4211_s16  ;;  %s433_s12 = sand.u32 1, %s3269_s18  }
 0xa0f   : > { %s2591_s23 = sadd.f32 1.1920929e-07, %s3037_s24  ;;  %s2787_s30 = sshll.u32 %s433_s12, 3 }
 0xa10   : > { %s2537_s29 = sadd.f32 %s4221_s2, %s4218_s15  ;;  %s3281_s15 = smov [#allocation2]  }
 0xa11   : > { %v2592_v51 = vstv %s2591_s23  ;;  %s2566_s25 = sadd.f32 1.1920929e-07, %s3035_s22 }
 0xa12   : > { %3211 = vrcp.f32 %v2592_v51  ;;  %s2538_s23 = smul.f32 0.33333334, %s2537_s29 }
 0xa1f   : > { %v3212_v52 = vpop.eup %3211 }
 0xa20   : > { %3038 = vpush %v3212_v52 }
 0xa51   : > { %s3039_s4 = spop %3038 }
 0xa52   : > { %s2595_s19 = smul.f32 %s3039_s4, %s2566_s25  ;;  %s2902_s25 = sshll.u32 %s3363_s21, 7 }
 0xa53   : > { %s3221_s21 = sshll.u32 %s3281_s15, 4  ;;  %s3222_s21 = int_to_ptr.vmem [resolvable:$false] %s3221_s21 }
 0xa54   : > { %v2596_v53 = vstv %s2595_s19  ;;  %s435_s19 = scalar_lea.vmem [#allocation2], %s2787_s30  ;;  %s3223_s2 = scalar_lea.vmem %s3222_s21, 256 }
 0xa55   : > { %v2597_v54 = vmul.f32 %v2596_v53, %v4183_v36 }
 0xa57   : > { %v2598_v55 = vsub.f32 %v2597_v54, %v4189_v38  ;;  %v2599_v56 = vmul.f32 %v2597_v54, %v2597_v54 }
 0xa59   : > { %v2624_v57 = vmul.f32 %v2598_v55, %v2598_v55  ;;  %v2604_v58 = vrot.slane %v2599_v56, %v4185_v13  ;;  %v2608_v59 = vrot.slane %v2599_v56, %v4187_v37 }
 0xa5b   : > { %v2611_v63 = vsel %vm2553_vm9, %v2604_v58, 0.0  ;;  %v2612_v0 = vsel %vm2553_vm9, %v2608_v59, 0.0  ;;  %v2629_v1 = vrot.slane %v2624_v57, %v4185_v13  ;;  %v2633_v60 = vrot.slane %v2624_v57, %v4187_v37 }
 0xa5c   : > { %v2613_v62 = vadd.f32 %v2612_v0, %v2611_v63 }
 0xa5d   : > { %v2636_v12 = vsel %vm2553_vm9, %v2629_v1, 0.0  ;;  %v2637_v36 = vsel %vm2553_vm9, %v2633_v60, 0.0 }
 0xa5e   : > { %2614 = vadd.xlane.f32.xlu1 %v2613_v62  ;;  %v2638_v38 = vadd.f32 %v2637_v36, %v2636_v12 }
 0xa60   : > { %2639 = vadd.xlane.f32.xlu0 %v2638_v38 }
 0xae7   : > { %v2615_v18 = vpop.xlane.xlu1 %2614 }
 0xae8   : > { %v2616_v19 = vrot.slane %v2615_v18, 4 }
 0xae9   : > { %v2640_v2 = vpop.xlane.xlu0 %2639 }
 0xaea   : > { %v2617_v20 = vadd.f32 %v2616_v19, %v2615_v18  ;;  %v2641_v3 = vrot.slane %v2640_v2, 4 }
 0xaec   : > { %v2618_v15 = vrot.slane %v2617_v20, 2  ;;  %v2642_v21 = vadd.f32 %v2641_v3, %v2640_v2 }
 0xaee   : > { %v2619_v5 = vadd.f32 %v2618_v15, %v2617_v20  ;;  %v2643_v22 = vrot.slane %v2642_v21, 2 }
 0xaf0   : > { %v2644_v13 = vadd.f32 %v2643_v22, %v2642_v21  ;;  %v2620_v23 = vrot.slane %v2619_v5, 1 }
 0xaf2   : > { %v2621_v37 = vadd.f32 %v2620_v23, %v2619_v5  ;;  %v2645_v6 = vrot.slane %v2644_v13, 1 }
 0xaf4   : > { %3040 = vpush %v2621_v37  ;;  %v2646_v8 = vadd.f32 %v2645_v6, %v2644_v13 }
 0xaf6   : > { %3042 = vpush %v2646_v8 }
 0xb25   : > { %s3041_s14 = spop %3040 }
 0xb26   : > { %s2623_s13 = sadd.f32 1.1920929e-07, %s3041_s14 }
 0xb27   : > { %s3043_s16 = spop %3042 }
 0xb28   : > { %s2648_s26 = sadd.f32 1.1920929e-07, %s3043_s16  ;;  %s2676_s16 = sshll.u32 %s435_s19, 4  ;;  %s2677_s16 = int_to_ptr.vmem [resolvable:$true] %s2676_s16 }
 0xb29   : > { %p3224_p0 = scmp.lt.s32.totalorder %s2677_s16, %s3222_s21 }
 0xb2a   : > { %v2649_v24 = vstv %s2648_s26 }
 0xb2b   : > { %3213 = vrcp.f32 %v2649_v24 }
 0xb38   : > { %v3214_v25 = vpop.eup %3213 }
 0xb39   : > { %3044 = vpush %v3214_v25 }
 0xb6a   : > { %s3045_s3 = spop %3044 }
 0xb6b   : > { %s2652_s5 = smul.f32 %s3045_s3, %s2623_s13  ;;  %s4243_s13 = scalar_lea.hbm %s4289_s11, %s2902_s25 }
 0xb6c   : > { %s2663_s3 = scalar_lea.sflag [#allocation3], %s433_s12 }
 0xb6d   : > { %v2653_v26 = vstv %s2652_s5  ;;  %s3217_s5 = scalar_lea.vmem %s2677_s16, 128 }
 0xb6e   : > { %3215 = vlog2.f32 %v2653_v26  ;;  %p3218_p11 = scmp.ne.s32.totalorder %s2677_s16, %s3217_s5  ;;  %p3225_p1 = scmp.lt.s32.totalorder %s3223_s2, %s3217_s5 }
 0xb70   : > { %p3219_p12 = pnand %p3218_p11, %p3380_p5  ;;  %p3226_p2 = por %p3225_p1, %p3224_p0 }
 0xb72   : > { %p3220_p13 = pneg %p3219_p12 }
 0xb74   : > { %p3227_p3 = pnand %p3226_p2, %p3220_p13 }
 0xb7b   : > { %v3216_v7 = vpop.eup %3215 }
 0xb7c   : > { %v2655_v4 = vmul.f32 0.6931472, %v3216_v7 }
 0xb7e   : > { %3046 = vpush %v2655_v4 }
 0xbaf   : > { %s3047_s22 = spop %3046 }
 0xbb0   : > { %s2657_s24 = smul.f32 10.0, %s3047_s22 }
 0xbb2   : > { %s2658_s4 = smul.f32 0.4342945, %s2657_s24 }
 0xbb4   : > { %s2659_s26 = ssub.f32 %s2538_s23, %s2658_s4 }
 0xbb6   : > { %v2660_v27 = vstv %s2659_s26 }
 0xbb7   : > { %2661 = vst [vmem:[%s435_s19] sm:$0xff] %v2660_v27 }
 0xbb8   : > { %3230 = shalt.err (!%p3227_p3)
}
 0xbb9   : > { %s3231_s0 = scalar_lea.hbm %s4243_s13, 128  ;;  %s3235_s30 = scalar_lea.hbm %s4289_s11, 512 }
 0xbba   : > { %p3232_p4 = scmp.ne.s32.totalorder %s4243_s13, %s3231_s0  ;;  %p3236_p9 = scmp.lt.s32.totalorder %s4243_s13, %s4289_s11 }
 0xbbb   : > { %p3237_p10 = scmp.lt.s32.totalorder %s3235_s30, %s3231_s0 }
 0xbbc   : > { %p3233_p7 = pnand %p3232_p4, %p3380_p5 }
 0xbbd   : > { %p3238_p11 = por %p3237_p10, %p3236_p9 }
 0xbbe   : > { %p3234_p8 = pneg %p3233_p7 }
 0xbc0   : > { %p3239_p12 = pnand %p3238_p11, %p3234_p8 }
 0xbc2   : > { %3242 = shalt.err (!%p3239_p12)
}
 0xbc3   : > { %3048 = dma.vmem_to_hbm [thread:$0]  (%p3380_p5), %s2677_s16, 128, %s4243_s13, %s2663_s3  }
 0xbc4 PF: > { %p3054_p13 = scmp.ge.s32.totalorder %s3277_s20, 2  ;;  %s2688_s23 = sand.u32 1, %s3265_s17  }
 0xbc5   : > { %s2689_s25 = scalar_lea.sflag [#allocation3], %s2688_s23 }
 0xbc6   : > { %p3051_p0 = pnand %p3054_p13, %p3384_p6 }
 0xbc8   : > { %p3052_p1 = pneg %p3051_p0 }
 0xbca   : > { %3260 = dma.done.wait (%p3052_p1), %s2689_s25, 128  }
 0xbcb   : > { %3262 = vsyncadd (%p3052_p1), %s2689_s25, 4294967168  ;;  %s4311_s20 = sld [smem:[#allocation6_spill]]  ;;  %s4314_s17 = smov %s3269_s18 }
 0xbcc   : > { %s4312_s4 = sld [smem:[#allocation5_spill]] }
 0xbcd   : > { %s4313_s19 = sld [smem:[#allocation7_spill]] }
 0xbd1   : > { %p21_p2 = scmp.ge.s32.totalorder %s4311_s20, 6  }
 0xbd2   : > { %s4315_s18 = smov %s4312_s4 }
 0xbd3   :  { %23 = sbr.rel (!%p21_p2) target bundleno = 9 (0x9), region = 111 }
 0xbd8   :  { %2694 = vsyncpa [#allocation3], 1 }
 0xbd9   :  { %2696 = vsyncpa [#allocation3 + $0x1], 1 }

</bundles_post_ra>
